<compile_context>
chip_gen: v7x
topology: tpu7x:2x2x1
jax: 0.10.0
libtpu: 0.0.40
codegen_flags: <defaults>
</compile_context>

<pallas_src>
import functools

import jax
import jax.numpy as jnp
from jax import lax
from jax.experimental import pallas as pl
from jax.experimental.pallas import tpu as pltpu

NUM_TURN = 5     # decoder_num_turn default
LANE = 128


def _round_up(v, m):
    return ((v + m - 1) // m) * m


def san_classifier_kernel(
    x_ref, h_seq_ref, x_mask_ref, h_mask_ref,
    w_sum_ref, b_sum_ref,          # LinearSelfAttn:  (1, D) VMEM, (1, 1) SMEM
    attn_w_ref, b_attn_ref,        # FlatSimV2:       (4, D) VMEM, (1, 1) SMEM  rows=[x, y, x*y, |x-y|]
    wpxh_ref, bp_ref,              # Classifier:      (2D, Lp) fused [wpx; wph], (1, Lp)
    wih_ref, whh_ref, bih_ref, bhh_ref,   # GRUCell (transposed): (D, 3H), (H, 3H), (1, 3H), (1, 3H)
    out_ref,                       # (Bt, Lp)
    *, mxu_dtype,
):
    Bt = x_ref.shape[0]
    D = x_ref.shape[2]
    H = whh_ref.shape[0]

    def mx(a):
        # MXU feed dtype (bf16 feeds with f32 accumulation when mxu_dtype is set).
        return a if mxu_dtype is None else a.astype(mxu_dtype)

    def softmax_lastdim(s):
        m = jnp.max(s, axis=-1, keepdims=True)
        e = jnp.exp(s - m)
        # one reciprocal per row on the EUP instead of Bt*L VALU divides.
        inv = pl.reciprocal(jnp.sum(e, axis=-1, keepdims=True), approx=True)
        return e * inv

    def bmv_seq(alpha, seq):
        # (Bt, L) x (Bt, L, D) -> (Bt, D): batched (1,L)@(L,D) matvec on the MXU.
        r = jnp.einsum("bql,bld->bqd", mx(alpha)[:, None, :], mx(seq),
                       preferred_element_type=jnp.float32)
        return r[:, 0, :]

    def bmv_feat(vec, seq):
        # (Bt, D) x (Bt, L, D) -> (Bt, L): feature-dim contraction on the MXU.
        r = jnp.einsum("bqd,bld->bql", mx(vec)[:, None, :], mx(seq),
                       preferred_element_type=jnp.float32)
        return r[:, 0, :]

    # ---- turn-invariant additive softmax-mask biases ----
    x_bias = jnp.where(x_mask_ref[...] > 0, -jnp.inf, 0.0)     # (Bt, L)
    h_bias = jnp.where(h_mask_ref[...] > 0, -jnp.inf, 0.0)     # (Bt, Lh)

    # ---- query_wsum: LinearSelfAttn(h_seq, h_mask) -> h0 (Bt, D) ----
    h_seq = h_seq_ref[...]                                      # (Bt, Lh, D)
    w_sum_b = jnp.broadcast_to(w_sum_ref[...], (Bt, D))
    s_h = bmv_feat(w_sum_b, h_seq) + b_sum_ref[0, 0]            # (Bt, Lh) via MXU
    alpha_h = softmax_lastdim(s_h + h_bias)
    h0 = bmv_seq(alpha_h, h_seq)                                # (Bt, D)

    # ---- FlatSimV2 weights (rows for x, y, x*y, |x-y|); broadcasts hoisted ----
    attn_w = attn_w_ref[...]                                    # (4, D)
    w2 = attn_w[1:2, :]
    w3 = attn_w[2:3, :]
    w1_b = jnp.broadcast_to(attn_w[0:1, :], (Bt, D))
    w4_b = jnp.broadcast_to(attn_w[3:4, :], (Bt, D))

    # turn-invariant term: sum_d x*w1 (+ bias), computed once for all turns (MXU).
    s_x = bmv_feat(w1_b, x_ref[...]) + b_attn_ref[0, 0]         # (Bt, L)

    def attend(h):
        # FlatSimV2 score + masked softmax + MXU-weighted sum -> x_sum (Bt, D).
        xt = x_ref[...]                                         # re-read per turn
        c2 = jnp.sum(h * w2, axis=-1, keepdims=True)            # (Bt, 1) tiny VPU term
        t3 = bmv_feat(h * w3, xt)                               # x.(h*w3) bilinear -> MXU
        diff = jnp.abs(xt - h[:, None, :].astype(xt.dtype))     # only (Bt,L,D) VPU stream left
        t4 = bmv_feat(w4_b, diff)                               # |x-h|.w4 reduce -> MXU
        alpha = softmax_lastdim(s_x + c2 + t3 + t4 + x_bias)    # (Bt, L)
        return bmv_seq(alpha, xt)                               # (Bt, D)

    wih = wih_ref[...]
    whh = whh_ref[...]
    bih = bih_ref[...]
    bhh = bhh_ref[...]

    def gru(xs, h):
        # GRUCell, PyTorch gate order (r, z, n).  At production sizes keep H a multiple
        # of 128 so the gate slices stay lane-aligned (768/1024 are fine).
        gi = jnp.dot(mx(xs), wih, preferred_element_type=jnp.float32) + bih   # (Bt, 3H)
        gh = jnp.dot(mx(h), whh, preferred_element_type=jnp.float32) + bhh    # (Bt, 3H)
        r = jax.nn.sigmoid(gi[:, :H] + gh[:, :H])
        z = jax.nn.sigmoid(gi[:, H:2 * H] + gh[:, H:2 * H])
        n = jnp.tanh(gi[:, 2 * H:] + r * gh[:, 2 * H:])
        return (1.0 - z) * n + z * h

    # turns 0 .. NUM_TURN-2: attention + GRU memory update only.  (Only the last turn's
    # classifier scores are returned, so earlier classifier matmuls are dead work.)
    # fori_loop(unroll=True) gives the scheduler a clean per-turn boundary.
    h0 = lax.fori_loop(0, NUM_TURN - 1, lambda _, h: gru(attend(h), h), h0,
                       unroll=True)

    # final turn: attention + classifier (pre-GRU h0; the final GRU update is dead).
    x_sum = attend(h0)
    w_all = wpxh_ref[...]                                       # (2D, Lp)
    if D % LANE == 0:
        # fused single matmul [x_sum, h0] @ [wpx; wph] (lane-aligned concat).
        feat = jnp.concatenate([x_sum, h0], axis=-1)            # (Bt, 2D)
        scores = jnp.dot(mx(feat), w_all,
                         preferred_element_type=jnp.float32) + bp_ref[...]
    else:
        # tiny-D fallback: avoid a lane-unaligned concat, use two dots.
        scores = (jnp.dot(mx(x_sum), w_all[:D, :], preferred_element_type=jnp.float32)
                  + jnp.dot(mx(h0), w_all[D:, :], preferred_element_type=jnp.float32)
                  + bp_ref[...])
    out_ref[...] = scores.astype(out_ref.dtype)                 # (Bt, Lp) lane-dense store


def san_classifier(x, h_seq, x_mask, h_mask, params, *,
                   block_b=128, stream_vmem_budget=None,
                   input_dtype=None, mxu_dtype=None,
                   single_buffer_weights=True, vmem_limit_bytes=None):
    """SANClassifier forward.  x:(B,L,D)  h_seq:(B,Lh,D)  masks float (1.0 = masked).

    input_dtype / mxu_dtype: pass jnp.bfloat16 on v6e/v7x to halve HBM traffic / VMEM
    tiles and feed the MXU in bf16 (f32 accumulation).  Keep None (f32) on v5e's VPU path.
    """
    B, L, D = x.shape
    Lh = h_seq.shape[1]
    LAB = params["wpx"].shape[1]
    H = params["whh"].shape[0]
    lab_pad = _round_up(LAB, LANE)          # lane-dense output / classifier N dim

    x_mask = x_mask.astype(jnp.float32)
    h_mask = h_mask.astype(jnp.float32)
    if input_dtype is not None:
        x = x.astype(input_dtype)
        h_seq = h_seq.astype(input_dtype)
    in_itemsize = jnp.dtype(x.dtype).itemsize

    # --- streamed-tile VMEM budget (per generation): leave room for weights + scratch ---
    if stream_vmem_budget is None:
        try:
            vmem_cap = pltpu.get_tpu_info().vmem_capacity_bytes
        except Exception:
            vmem_cap = 128 << 20
        stream_vmem_budget = vmem_cap // 5      # ~25 MiB on v5e/v6e, ~13 MiB on v7x

    # --- batch tile: multiple of 8 (sublane), capped by block_b and the streamed-VMEM
    #     budget (double-buffered x/h_seq/masks); force >=2 grid steps when B allows so
    #     dimension_semantics=('parallel',) can shard the batch across v7x's 2 cores. ---
    if B <= 8:
        bt, b_pad = B, B
    else:
        per_row = 2 * ((L + Lh) * D * in_itemsize + (L + Lh) * 4)
        fit = max(1, stream_vmem_budget // per_row)
        bt = max(8, (min(block_b, fit) // 8) * 8)
        bt = min(bt, _round_up((B + 1) // 2, 8))
        b_pad = _round_up(B, bt)

    if b_pad != B:
        pad = b_pad - B
        x = jnp.pad(x, ((0, pad), (0, 0), (0, 0)))
        h_seq = jnp.pad(h_seq, ((0, pad), (0, 0), (0, 0)))
        # pad masks with 0.0 ("valid") so padded rows stay finite (no NaN softmax rows).
        x_mask = jnp.pad(x_mask, ((0, pad), (0, 0)))
        h_mask = jnp.pad(h_mask, ((0, pad), (0, 0)))

    # --- classifier weights: pad label dim to 128 lanes and fuse [wpx; wph];
    #     optionally pre-cast the big matrices to the MXU feed dtype (halves their VMEM) ---
    wpx, wph, bp = params["wpx"], params["wph"], params["bp"]
    if lab_pad != LAB:
        wpx = jnp.pad(wpx, ((0, 0), (0, lab_pad - LAB)))
        wph = jnp.pad(wph, ((0, 0), (0, lab_pad - LAB)))
        bp = jnp.pad(bp, ((0, 0), (0, lab_pad - LAB)))
    wpxh = jnp.concatenate([wpx, wph], axis=0)                  # (2D, lab_pad)
    wih, whh = params["wih"], params["whh"]
    w_itemsize = 4
    if mxu_dtype is not None:
        w_itemsize = jnp.dtype(mxu_dtype).itemsize
        wpxh = wpxh.astype(mxu_dtype)
        wih = wih.astype(mxu_dtype)
        whh = whh.astype(mxu_dtype)

    grid = (b_pad // bt,)

    # --- explicit scoped-VMEM limit sized from what this kernel actually needs ---
    if vmem_limit_bytes is None:
        stream = 2 * bt * ((L + Lh) * D * in_itemsize + (L + Lh) * 4)
        outb = 2 * bt * lab_pad * 4
        wbytes = (wpxh.size + wih.size + whh.size) * w_itemsize
        wbytes += (5 * D + lab_pad + 2 * 3 * H + 2) * 4          # small f32 weights/biases
        wbytes *= 1 if single_buffer_weights else 2
        vmem_limit_bytes = int(max(32 << 20,
                                   min(128 << 20,
                                       1.5 * (stream + outb + wbytes) + (8 << 20))))

    args = (
        x, h_seq, x_mask, h_mask,
        params["w_sum"], params["b_sum"],
        params["attn_w"], params["b_attn"],
        wpxh, bp,
        wih, whh, params["bih"], params["bhh"],
    )

    kernel_fn = functools.partial(san_classifier_kernel, mxu_dtype=mxu_dtype)

    def batch_spec(*tail):                  # tiled along batch
        nd = len(tail)
        return pl.BlockSpec((bt,) + tail, lambda i, _nd=nd: (i,) + (0,) * _nd)

    smem_spec = pl.BlockSpec(memory_space=pltpu.MemorySpace.SMEM)   # (1,1) scalars

    def run(single_buf):
        def const_spec(arr):                # weights: constant block -> VMEM-resident
            kwargs = {}
            if single_buf:
                # block index never changes across grid steps -> single-buffer the VMEM.
                kwargs["pipeline_mode"] = pl.Buffered(1)
            nd = arr.ndim
            return pl.BlockSpec(arr.shape, lambda i, _nd=nd: (0,) * _nd, **kwargs)

        in_specs = [
            batch_spec(L, D), batch_spec(Lh, D), batch_spec(L), batch_spec(Lh),
            const_spec(params["w_sum"]), smem_spec,
            const_spec(params["attn_w"]), smem_spec,
            const_spec(wpxh), const_spec(bp),
            const_spec(wih), const_spec(whh),
            const_spec(params["bih"]), const_spec(params["bhh"]),
        ]
        return pl.pallas_call(
            kernel_fn,
            out_shape=jax.ShapeDtypeStruct((b_pad, lab_pad), jnp.float32),
            grid=grid,
            in_specs=in_specs,
            out_specs=pl.BlockSpec((bt, lab_pad), lambda i: (i, 0)),
            compiler_params=pltpu.CompilerParams(
                dimension_semantics=("parallel",),   # batch axis -> megacore on v7x
                vmem_limit_bytes=vmem_limit_bytes,
            ),
        )(*args)

    if single_buffer_weights and hasattr(pl, "Buffered"):
        try:
            out = run(True)
        except Exception:
            # pipeline_mode=Buffered(1) not plumbed on this jax/libtpu -> default buffering.
            out = run(False)
    else:
        out = run(False)
    return out[:B, :LAB]


def san_reference(x, h_seq, x_mask, h_mask, params):
    """Pure-JAX reference mirroring the PyTorch forward (eval mode)."""
    H = params["whh"].shape[0]

    def masked_softmax(s, m):
        s = jnp.where(m > 0, -jnp.inf, s)
        return jax.nn.softmax(s, axis=-1)

    s_h = jnp.sum(h_seq * params["w_sum"], axis=-1) + params["b_sum"][0, 0]
    a_h = masked_softmax(s_h, h_mask)
    h0 = jnp.sum(a_h[..., None] * h_seq, axis=1)

    aw = params["attn_w"]
    scores = None
    for _ in range(NUM_TURN):
        hb = h0[:, None, :]
        s = jnp.sum(x * aw[0:1] + hb * aw[1:2] + x * hb * aw[2:3]
                    + jnp.abs(x - hb) * aw[3:4], axis=-1) + params["b_attn"][0, 0]
        alpha = masked_softmax(s, x_mask)
        x_sum = jnp.sum(alpha[..., None] * x, axis=1)
        scores = x_sum @ params["wpx"] + h0 @ params["wph"] + params["bp"]
        gi = x_sum @ params["wih"] + params["bih"]
        gh = h0 @ params["whh"] + params["bhh"]
        r = jax.nn.sigmoid(gi[:, :H] + gh[:, :H])
        z = jax.nn.sigmoid(gi[:, H:2 * H] + gh[:, H:2 * H])
        n = jnp.tanh(gi[:, 2 * H:] + r * gh[:, 2 * H:])
        h0 = (1.0 - z) * n + z * h0
    return scores


def _make_params(key, D, H, LAB):
    ks = jax.random.split(key, 11)

    def u(k, shape, fan_in):
        bound = 1.0 / float(fan_in) ** 0.5
        return jax.random.uniform(k, shape, jnp.float32, -bound, bound)

    return dict(
        w_sum=u(ks[0], (1, D), D),
        b_sum=u(ks[1], (1, 1), D),
        attn_w=u(ks[2], (4, D), 4 * D),
        b_attn=u(ks[3], (1, 1), 4 * D),
        wpx=u(ks[4], (D, LAB), 2 * D),
        wph=u(ks[5], (D, LAB), 2 * D),
        bp=u(ks[6], (1, LAB), 2 * D),
        wih=u(ks[7], (D, 3 * H), H),
        whh=u(ks[8], (H, 3 * H), H),
        bih=u(ks[9], (1, 3 * H), H),
        bhh=u(ks[10], (1, 3 * H), H),
    )


def _make_inputs(key, B, L, Lh, D):
    k1, k2, k3, k4 = jax.random.split(key, 4)
    x = jax.random.normal(k1, (B, L, D), jnp.float32)
    h_seq = jax.random.normal(k2, (B, Lh, D), jnp.float32)
    # masks: 1.0 marks padded/masked positions (at least one valid per row)
    x_valid = 1 + (jax.random.uniform(k3, (B, 1)) * L).astype(jnp.int32)
    h_valid = 1 + (jax.random.uniform(k4, (B, 1)) * Lh).astype(jnp.int32)
    x_mask = (jnp.arange(L)[None, :] >= x_valid).astype(jnp.float32)
    h_mask = (jnp.arange(Lh)[None, :] >= h_valid).astype(jnp.float32)
    return x, h_seq, x_mask, h_mask


if __name__ == "__main__":
    D = 32          # x_size == h_size (required by FlatSimV2 assert);  H = D
    LAB = 4         # label_size
    key = jax.random.PRNGKey(0)
    kp, k1, k2 = jax.random.split(key, 3)
    params = _make_params(kp, D, D, LAB)

    # Test 1: tiny batch, single grid step (tile covers the whole batch).
    x, h_seq, x_mask, h_mask = _make_inputs(k1, B=2, L=8, Lh=8, D=D)
    out = jax.block_until_ready(san_classifier(x, h_seq, x_mask, h_mask, params))
    ref = san_reference(x, h_seq, x_mask, h_mask, params)
    assert out.shape == (2, LAB)
    assert jnp.allclose(out, ref, rtol=5e-3, atol=5e-3), (out, ref)

    # Test 2: batch grid with padding (B=10 -> padded to 16, two "parallel" grid steps).
    x, h_seq, x_mask, h_mask = _make_inputs(k2, B=10, L=16, Lh=8, D=D)
    out = jax.block_until_ready(
        san_classifier(x, h_seq, x_mask, h_mask, params, block_b=8))
    ref = san_reference(x, h_seq, x_mask, h_mask, params)
    assert out.shape == (10, LAB)
    assert jnp.allclose(out, ref, rtol=5e-3, atol=5e-3), (out, ref)

    # Test 3: low-precision path (bf16 streamed inputs + bf16 MXU feeds, f32 accumulation).
    # Loose smoke check only: quantization error compounds over the 5 chained GRU turns.
    out_bf16 = jax.block_until_ready(
        san_classifier(x, h_seq, x_mask, h_mask, params, block_b=8,
                       input_dtype=jnp.bfloat16, mxu_dtype=jnp.bfloat16))
    assert out_bf16.shape == (10, LAB)
    assert bool(jnp.all(jnp.isfinite(out_bf16)))
    assert jnp.allclose(out_bf16, ref, rtol=1e-1, atol=1e-1), (out_bf16, ref)

    # TODO(synk): training-mode paths (variational dropout, mem_type=1 turn averaging,
    # dump_state, LSTMCell variant) are intentionally not reproduced (eval forward only).
    print("KERNEL_OK")
</pallas_src>

<mosaic_0001>
module attributes {stable_mosaic.version = 11 : i64} {
  func.func @san_classifier_kernel(%arg0: i32, %arg1: memref<2x8x32xf32, #tpu.memory_space<vmem>>, %arg2: memref<2x8x32xf32, #tpu.memory_space<vmem>>, %arg3: memref<2x8xf32, #tpu.memory_space<vmem>>, %arg4: memref<2x8xf32, #tpu.memory_space<vmem>>, %arg5: memref<1x32xf32, #tpu.memory_space<vmem>>, %arg6: memref<1x1xf32, #tpu.memory_space<smem>>, %arg7: memref<4x32xf32, #tpu.memory_space<vmem>>, %arg8: memref<1x1xf32, #tpu.memory_space<smem>>, %arg9: memref<64x128xf32, #tpu.memory_space<vmem>>, %arg10: memref<1x128xf32, #tpu.memory_space<vmem>>, %arg11: memref<32x96xf32, #tpu.memory_space<vmem>>, %arg12: memref<32x96xf32, #tpu.memory_space<vmem>>, %arg13: memref<1x96xf32, #tpu.memory_space<vmem>>, %arg14: memref<1x96xf32, #tpu.memory_space<vmem>>, %arg15: memref<2x128xf32, #tpu.memory_space<vmem>>) attributes {dimension_semantics = [#tpu.dimension_semantics<parallel>], iteration_bounds = array<i64: 1>, scalar_prefetch = 0 : i64, scratch_operands = 0 : i64, tpu.core_type = #tpu.core_type<tc>, window_params = [{transform_indices = @transform_0, window_bounds = array<i64: 2, 8, 32>}, {transform_indices = @transform_1, window_bounds = array<i64: 2, 8, 32>}, {transform_indices = @transform_2, window_bounds = array<i64: 2, 8>}, {transform_indices = @transform_3, window_bounds = array<i64: 2, 8>}, {pipeline_mode = #tpu.pipeline_mode<synchronous>, transform_indices = @transform_4, window_bounds = array<i64: 1, 32>}, {transform_indices = @transform_5, window_bounds = array<i64: 1, 1>}, {pipeline_mode = #tpu.pipeline_mode<synchronous>, transform_indices = @transform_6, window_bounds = array<i64: 4, 32>}, {transform_indices = @transform_7, window_bounds = array<i64: 1, 1>}, {pipeline_mode = #tpu.pipeline_mode<synchronous>, transform_indices = @transform_8, window_bounds = array<i64: 64, 128>}, {pipeline_mode = #tpu.pipeline_mode<synchronous>, transform_indices = @transform_9, window_bounds = array<i64: 1, 128>}, {pipeline_mode = #tpu.pipeline_mode<synchronous>, transform_indices = @transform_10, window_bounds = array<i64: 32, 96>}, {pipeline_mode = #tpu.pipeline_mode<synchronous>, transform_indices = @transform_11, window_bounds = array<i64: 32, 96>}, {pipeline_mode = #tpu.pipeline_mode<synchronous>, transform_indices = @transform_12, window_bounds = array<i64: 1, 96>}, {pipeline_mode = #tpu.pipeline_mode<synchronous>, transform_indices = @transform_13, window_bounds = array<i64: 1, 96>}, {transform_indices = @transform_14, window_bounds = array<i64: 2, 128>}]} {
    %c0 = arith.constant 0 : index
    %c0_0 = arith.constant 0 : index
    %0 = vector.load %arg3[%c0, %c0_0] : memref<2x8xf32, #tpu.memory_space<vmem>>, vector<2x8xf32>
    %cst = arith.constant 0.000000e+00 : f32
    %1 = vector.broadcast %cst : f32 to vector<2x8xf32>
    %2 = arith.cmpf ogt, %0, %1 : vector<2x8xf32>
    %cst_1 = arith.constant 0xFF800000 : f32
    %cst_2 = arith.constant 0.000000e+00 : f32
    %3 = vector.broadcast %cst_1 : f32 to vector<2x8xf32>
    %4 = vector.broadcast %cst_2 : f32 to vector<2x8xf32>
    %5 = arith.select %2, %3, %4 : vector<2x8xi1>, vector<2x8xf32>
    %c0_3 = arith.constant 0 : index
    %c0_4 = arith.constant 0 : index
    %6 = vector.load %arg4[%c0_3, %c0_4] : memref<2x8xf32, #tpu.memory_space<vmem>>, vector<2x8xf32>
    %cst_5 = arith.constant 0.000000e+00 : f32
    %7 = vector.broadcast %cst_5 : f32 to vector<2x8xf32>
    %8 = arith.cmpf ogt, %6, %7 : vector<2x8xf32>
    %cst_6 = arith.constant 0xFF800000 : f32
    %cst_7 = arith.constant 0.000000e+00 : f32
    %9 = vector.broadcast %cst_6 : f32 to vector<2x8xf32>
    %10 = vector.broadcast %cst_7 : f32 to vector<2x8xf32>
    %11 = arith.select %8, %9, %10 : vector<2x8xi1>, vector<2x8xf32>
    %c0_8 = arith.constant 0 : index
    %c0_9 = arith.constant 0 : index
    %c0_10 = arith.constant 0 : index
    %12 = vector.load %arg2[%c0_8, %c0_9, %c0_10] : memref<2x8x32xf32, #tpu.memory_space<vmem>>, vector<2x8x32xf32>
    %c0_11 = arith.constant 0 : index
    %c0_12 = arith.constant 0 : index
    %13 = vector.load %arg5[%c0_11, %c0_12] : memref<1x32xf32, #tpu.memory_space<vmem>>, vector<1x32xf32>
    %14 = vector.shape_cast %13 : vector<1x32xf32> to vector<1x32xf32>
    %15 = vector.broadcast %14 : vector<1x32xf32> to vector<2x32xf32>
    %16 = vector.shape_cast %15 : vector<2x32xf32> to vector<2x1x32xf32>
    "tpu.trace_start"() <{level = 10 : i32, message = "bqd,bld->bql"}> : () -> ()
    %cst_13 = arith.constant dense<0.000000e+00> : vector<2x1x8xf32>
    %17 = tpu.matmul %16, %12, %cst_13 {dimension_numbers = #tpu.dot_dimension_numbers<[2], [2], [1], [1], [0, 0, 0, 1, 1, 1], [0], [0]>} : vector<2x1x32xf32>, vector<2x8x32xf32>, vector<2x1x8xf32> -> vector<2x1x8xf32>
    "tpu.trace_stop"() : () -> ()
    %18 = vector.shape_cast %17 : vector<2x1x8xf32> to vector<2x8xf32>
    %c0_14 = arith.constant 0 : index
    %c0_15 = arith.constant 0 : index
    %19 = memref.load %arg6[%c0_14, %c0_15] : memref<1x1xf32, #tpu.memory_space<smem>>
    %20 = vector.broadcast %19 : f32 to vector<2x8xf32>
    %21 = arith.addf %18, %20 : vector<2x8xf32>
    %22 = arith.addf %21, %11 : vector<2x8xf32>
    %cst_16 = arith.constant dense<0xFF800000> : vector<2xf32>
    %23 = vector.multi_reduction <maximumf>, %22, %cst_16 [1] : vector<2x8xf32> to vector<2xf32>
    %24 = vector.shape_cast %23 : vector<2xf32> to vector<2x1xf32>
    %25 = vector.broadcast %24 : vector<2x1xf32> to vector<2x8xf32>
    %26 = arith.subf %22, %25 : vector<2x8xf32>
    %27 = math.exp %26 : vector<2x8xf32>
    %cst_17 = arith.constant dense<0.000000e+00> : vector<2xf32>
    %28 = vector.multi_reduction <add>, %27, %cst_17 [1] : vector<2x8xf32> to vector<2xf32>
    %29 = vector.shape_cast %28 : vector<2xf32> to vector<2x1xf32>
    %30 = tpu.reciprocal %29 {approx = true} : vector<2x1xf32> -> vector<2x1xf32>
    %31 = vector.broadcast %30 : vector<2x1xf32> to vector<2x8xf32>
    %32 = arith.mulf %27, %31 : vector<2x8xf32>
    %33 = vector.shape_cast %32 : vector<2x8xf32> to vector<2x1x8xf32>
    "tpu.trace_start"() <{level = 10 : i32, message = "bql,bld->bqd"}> : () -> ()
    %cst_18 = arith.constant dense<0.000000e+00> : vector<2x1x32xf32>
    %34 = tpu.matmul %33, %12, %cst_18 {dimension_numbers = #tpu.dot_dimension_numbers<[2], [1], [1], [2], [0, 0, 0, 1, 1, 2], [0], [0]>} : vector<2x1x8xf32>, vector<2x8x32xf32>, vector<2x1x32xf32> -> vector<2x1x32xf32>
    "tpu.trace_stop"() : () -> ()
    %35 = vector.shape_cast %34 : vector<2x1x32xf32> to vector<2x32xf32>
    %c0_19 = arith.constant 0 : index
    %c0_20 = arith.constant 0 : index
    %36 = vector.load %arg7[%c0_19, %c0_20] : memref<4x32xf32, #tpu.memory_space<vmem>>, vector<4x32xf32>
    %37 = vector.extract_strided_slice %36 {offsets = [1, 0], sizes = [1, 32], strides = [1, 1]} : vector<4x32xf32> to vector<1x32xf32>
    %38 = vector.extract_strided_slice %36 {offsets = [2, 0], sizes = [1, 32], strides = [1, 1]} : vector<4x32xf32> to vector<1x32xf32>
    %39 = vector.extract_strided_slice %36 {offsets = [0, 0], sizes = [1, 32], strides = [1, 1]} : vector<4x32xf32> to vector<1x32xf32>
    %40 = vector.shape_cast %39 : vector<1x32xf32> to vector<1x32xf32>
    %41 = vector.broadcast %40 : vector<1x32xf32> to vector<2x32xf32>
    %42 = vector.extract_strided_slice %36 {offsets = [3, 0], sizes = [1, 32], strides = [1, 1]} : vector<4x32xf32> to vector<1x32xf32>
    %43 = vector.shape_cast %42 : vector<1x32xf32> to vector<1x32xf32>
    %44 = vector.broadcast %43 : vector<1x32xf32> to vector<2x32xf32>
    %c0_21 = arith.constant 0 : index
    %c0_22 = arith.constant 0 : index
    %c0_23 = arith.constant 0 : index
    %45 = vector.load %arg1[%c0_21, %c0_22, %c0_23] : memref<2x8x32xf32, #tpu.memory_space<vmem>>, vector<2x8x32xf32>
    %46 = vector.shape_cast %41 : vector<2x32xf32> to vector<2x1x32xf32>
    "tpu.trace_start"() <{level = 10 : i32, message = "bqd,bld->bql"}> : () -> ()
    %cst_24 = arith.constant dense<0.000000e+00> : vector<2x1x8xf32>
    %47 = tpu.matmul %46, %45, %cst_24 {dimension_numbers = #tpu.dot_dimension_numbers<[2], [2], [1], [1], [0, 0, 0, 1, 1, 1], [0], [0]>} : vector<2x1x32xf32>, vector<2x8x32xf32>, vector<2x1x8xf32> -> vector<2x1x8xf32>
    "tpu.trace_stop"() : () -> ()
    %48 = vector.shape_cast %47 : vector<2x1x8xf32> to vector<2x8xf32>
    %c0_25 = arith.constant 0 : index
    %c0_26 = arith.constant 0 : index
    %49 = memref.load %arg8[%c0_25, %c0_26] : memref<1x1xf32, #tpu.memory_space<smem>>
    %50 = vector.broadcast %49 : f32 to vector<2x8xf32>
    %51 = arith.addf %48, %50 : vector<2x8xf32>
    %c0_27 = arith.constant 0 : index
    %c0_28 = arith.constant 0 : index
    %52 = vector.load %arg11[%c0_27, %c0_28] : memref<32x96xf32, #tpu.memory_space<vmem>>, vector<32x96xf32>
    %c0_29 = arith.constant 0 : index
    %c0_30 = arith.constant 0 : index
    %53 = vector.load %arg12[%c0_29, %c0_30] : memref<32x96xf32, #tpu.memory_space<vmem>>, vector<32x96xf32>
    %c0_31 = arith.constant 0 : index
    %c0_32 = arith.constant 0 : index
    %54 = vector.load %arg13[%c0_31, %c0_32] : memref<1x96xf32, #tpu.memory_space<vmem>>, vector<1x96xf32>
    %c0_33 = arith.constant 0 : index
    %c0_34 = arith.constant 0 : index
    %55 = vector.load %arg14[%c0_33, %c0_34] : memref<1x96xf32, #tpu.memory_space<vmem>>, vector<1x96xf32>
    %c0_i32 = arith.constant 0 : i32
    %c0_35 = arith.constant 0 : index
    %c0_36 = arith.constant 0 : index
    %c0_37 = arith.constant 0 : index
    %56 = vector.load %arg1[%c0_35, %c0_36, %c0_37] : memref<2x8x32xf32, #tpu.memory_space<vmem>>, vector<2x8x32xf32>
    %57 = vector.broadcast %37 : vector<1x32xf32> to vector<2x32xf32>
    %58 = arith.mulf %35, %57 : vector<2x32xf32>
    %cst_38 = arith.constant dense<0.000000e+00> : vector<2xf32>
    %59 = vector.multi_reduction <add>, %58, %cst_38 [1] : vector<2x32xf32> to vector<2xf32>
    %60 = vector.shape_cast %59 : vector<2xf32> to vector<2x1xf32>
    %61 = vector.broadcast %38 : vector<1x32xf32> to vector<2x32xf32>
    %62 = arith.mulf %35, %61 : vector<2x32xf32>
    %63 = vector.shape_cast %62 : vector<2x32xf32> to vector<2x1x32xf32>
    "tpu.trace_start"() <{level = 10 : i32, message = "bqd,bld->bql"}> : () -> ()
    %cst_39 = arith.constant dense<0.000000e+00> : vector<2x1x8xf32>
    %64 = tpu.matmul %63, %56, %cst_39 {dimension_numbers = #tpu.dot_dimension_numbers<[2], [2], [1], [1], [0, 0, 0, 1, 1, 1], [0], [0]>} : vector<2x1x32xf32>, vector<2x8x32xf32>, vector<2x1x8xf32> -> vector<2x1x8xf32>
    "tpu.trace_stop"() : () -> ()
    %65 = vector.shape_cast %64 : vector<2x1x8xf32> to vector<2x8xf32>
    %66 = vector.shape_cast %35 : vector<2x32xf32> to vector<2x1x32xf32>
    %67 = vector.broadcast %66 : vector<2x1x32xf32> to vector<2x8x32xf32>
    %68 = arith.subf %56, %67 : vector<2x8x32xf32>
    %69 = math.absf %68 : vector<2x8x32xf32>
    %70 = vector.shape_cast %44 : vector<2x32xf32> to vector<2x1x32xf32>
    "tpu.trace_start"() <{level = 10 : i32, message = "bqd,bld->bql"}> : () -> ()
    %cst_40 = arith.constant dense<0.000000e+00> : vector<2x1x8xf32>
    %71 = tpu.matmul %70, %69, %cst_40 {dimension_numbers = #tpu.dot_dimension_numbers<[2], [2], [1], [1], [0, 0, 0, 1, 1, 1], [0], [0]>} : vector<2x1x32xf32>, vector<2x8x32xf32>, vector<2x1x8xf32> -> vector<2x1x8xf32>
    "tpu.trace_stop"() : () -> ()
    %72 = vector.shape_cast %71 : vector<2x1x8xf32> to vector<2x8xf32>
    %73 = vector.broadcast %60 : vector<2x1xf32> to vector<2x8xf32>
    %74 = arith.addf %51, %73 : vector<2x8xf32>
    %75 = arith.addf %74, %65 : vector<2x8xf32>
    %76 = arith.addf %75, %72 : vector<2x8xf32>
    %77 = arith.addf %76, %5 : vector<2x8xf32>
    %cst_41 = arith.constant dense<0xFF800000> : vector<2xf32>
    %78 = vector.multi_reduction <maximumf>, %77, %cst_41 [1] : vector<2x8xf32> to vector<2xf32>
    %79 = vector.shape_cast %78 : vector<2xf32> to vector<2x1xf32>
    %80 = vector.broadcast %79 : vector<2x1xf32> to vector<2x8xf32>
    %81 = arith.subf %77, %80 : vector<2x8xf32>
    %82 = math.exp %81 : vector<2x8xf32>
    %cst_42 = arith.constant dense<0.000000e+00> : vector<2xf32>
    %83 = vector.multi_reduction <add>, %82, %cst_42 [1] : vector<2x8xf32> to vector<2xf32>
    %84 = vector.shape_cast %83 : vector<2xf32> to vector<2x1xf32>
    %85 = tpu.reciprocal %84 {approx = true} : vector<2x1xf32> -> vector<2x1xf32>
    %86 = vector.broadcast %85 : vector<2x1xf32> to vector<2x8xf32>
    %87 = arith.mulf %82, %86 : vector<2x8xf32>
    %88 = vector.shape_cast %87 : vector<2x8xf32> to vector<2x1x8xf32>
    "tpu.trace_start"() <{level = 10 : i32, message = "bql,bld->bqd"}> : () -> ()
    %cst_43 = arith.constant dense<0.000000e+00> : vector<2x1x32xf32>
    %89 = tpu.matmul %88, %56, %cst_43 {dimension_numbers = #tpu.dot_dimension_numbers<[2], [1], [1], [2], [0, 0, 0, 1, 1, 2], [0], [0]>} : vector<2x1x8xf32>, vector<2x8x32xf32>, vector<2x1x32xf32> -> vector<2x1x32xf32>
    "tpu.trace_stop"() : () -> ()
    %90 = vector.shape_cast %89 : vector<2x1x32xf32> to vector<2x32xf32>
    %cst_44 = arith.constant dense<0.000000e+00> : vector<2x96xf32>
    %91 = tpu.matmul %90, %52, %cst_44 {dimension_numbers = #tpu.dot_dimension_numbers<[1], [0], [0], [1], [0, 0, 1, 1], [], []>} : vector<2x32xf32>, vector<32x96xf32>, vector<2x96xf32> -> vector<2x96xf32>
    %92 = vector.broadcast %54 : vector<1x96xf32> to vector<2x96xf32>
    %93 = arith.addf %91, %92 : vector<2x96xf32>
    %cst_45 = arith.constant dense<0.000000e+00> : vector<2x96xf32>
    %94 = tpu.matmul %35, %53, %cst_45 {dimension_numbers = #tpu.dot_dimension_numbers<[1], [0], [0], [1], [0, 0, 1, 1], [], []>} : vector<2x32xf32>, vector<32x96xf32>, vector<2x96xf32> -> vector<2x96xf32>
    %95 = vector.broadcast %55 : vector<1x96xf32> to vector<2x96xf32>
    %96 = arith.addf %94, %95 : vector<2x96xf32>
    %97 = vector.extract_strided_slice %93 {offsets = [0, 0], sizes = [2, 32], strides = [1, 1]} : vector<2x96xf32> to vector<2x32xf32>
    %98 = vector.extract_strided_slice %96 {offsets = [0, 0], sizes = [2, 32], strides = [1, 1]} : vector<2x96xf32> to vector<2x32xf32>
    %99 = arith.addf %97, %98 : vector<2x32xf32>
    %100 = arith.negf %99 : vector<2x32xf32>
    %101 = math.exp %100 : vector<2x32xf32>
    %cst_46 = arith.constant 1.000000e+00 : f32
    %102 = vector.broadcast %cst_46 : f32 to vector<2x32xf32>
    %103 = arith.addf %102, %101 : vector<2x32xf32>
    %104 = arith.divf %102, %103 : vector<2x32xf32>
    %105 = vector.extract_strided_slice %93 {offsets = [0, 32], sizes = [2, 32], strides = [1, 1]} : vector<2x96xf32> to vector<2x32xf32>
    %106 = vector.extract_strided_slice %96 {offsets = [0, 32], sizes = [2, 32], strides = [1, 1]} : vector<2x96xf32> to vector<2x32xf32>
    %107 = arith.addf %105, %106 : vector<2x32xf32>
    %108 = arith.negf %107 : vector<2x32xf32>
    %109 = math.exp %108 : vector<2x32xf32>
    %cst_47 = arith.constant 1.000000e+00 : f32
    %110 = vector.broadcast %cst_47 : f32 to vector<2x32xf32>
    %111 = arith.addf %110, %109 : vector<2x32xf32>
    %112 = arith.divf %110, %111 : vector<2x32xf32>
    %113 = vector.extract_strided_slice %93 {offsets = [0, 64], sizes = [2, 32], strides = [1, 1]} : vector<2x96xf32> to vector<2x32xf32>
    %114 = vector.extract_strided_slice %96 {offsets = [0, 64], sizes = [2, 32], strides = [1, 1]} : vector<2x96xf32> to vector<2x32xf32>
    %115 = arith.mulf %104, %114 : vector<2x32xf32>
    %116 = arith.addf %113, %115 : vector<2x32xf32>
    %117 = math.tanh %116 : vector<2x32xf32>
    %cst_48 = arith.constant 1.000000e+00 : f32
    %118 = vector.broadcast %cst_48 : f32 to vector<2x32xf32>
    %119 = arith.subf %118, %112 : vector<2x32xf32>
    %120 = arith.mulf %119, %117 : vector<2x32xf32>
    %121 = arith.mulf %112, %35 : vector<2x32xf32>
    %122 = arith.addf %120, %121 : vector<2x32xf32>
    %c1_i32 = arith.constant 1 : i32
    %c0_49 = arith.constant 0 : index
    %c0_50 = arith.constant 0 : index
    %c0_51 = arith.constant 0 : index
    %123 = vector.load %arg1[%c0_49, %c0_50, %c0_51] : memref<2x8x32xf32, #tpu.memory_space<vmem>>, vector<2x8x32xf32>
    %124 = vector.broadcast %37 : vector<1x32xf32> to vector<2x32xf32>
    %125 = arith.mulf %122, %124 : vector<2x32xf32>
    %cst_52 = arith.constant dense<0.000000e+00> : vector<2xf32>
    %126 = vector.multi_reduction <add>, %125, %cst_52 [1] : vector<2x32xf32> to vector<2xf32>
    %127 = vector.shape_cast %126 : vector<2xf32> to vector<2x1xf32>
    %128 = vector.broadcast %38 : vector<1x32xf32> to vector<2x32xf32>
    %129 = arith.mulf %122, %128 : vector<2x32xf32>
    %130 = vector.shape_cast %129 : vector<2x32xf32> to vector<2x1x32xf32>
    "tpu.trace_start"() <{level = 10 : i32, message = "bqd,bld->bql"}> : () -> ()
    %cst_53 = arith.constant dense<0.000000e+00> : vector<2x1x8xf32>
    %131 = tpu.matmul %130, %123, %cst_53 {dimension_numbers = #tpu.dot_dimension_numbers<[2], [2], [1], [1], [0, 0, 0, 1, 1, 1], [0], [0]>} : vector<2x1x32xf32>, vector<2x8x32xf32>, vector<2x1x8xf32> -> vector<2x1x8xf32>
    "tpu.trace_stop"() : () -> ()
    %132 = vector.shape_cast %131 : vector<2x1x8xf32> to vector<2x8xf32>
    %133 = vector.shape_cast %122 : vector<2x32xf32> to vector<2x1x32xf32>
    %134 = vector.broadcast %133 : vector<2x1x32xf32> to vector<2x8x32xf32>
    %135 = arith.subf %123, %134 : vector<2x8x32xf32>
    %136 = math.absf %135 : vector<2x8x32xf32>
    %137 = vector.shape_cast %44 : vector<2x32xf32> to vector<2x1x32xf32>
    "tpu.trace_start"() <{level = 10 : i32, message = "bqd,bld->bql"}> : () -> ()
    %cst_54 = arith.constant dense<0.000000e+00> : vector<2x1x8xf32>
    %138 = tpu.matmul %137, %136, %cst_54 {dimension_numbers = #tpu.dot_dimension_numbers<[2], [2], [1], [1], [0, 0, 0, 1, 1, 1], [0], [0]>} : vector<2x1x32xf32>, vector<2x8x32xf32>, vector<2x1x8xf32> -> vector<2x1x8xf32>
    "tpu.trace_stop"() : () -> ()
    %139 = vector.shape_cast %138 : vector<2x1x8xf32> to vector<2x8xf32>
    %140 = vector.broadcast %127 : vector<2x1xf32> to vector<2x8xf32>
    %141 = arith.addf %51, %140 : vector<2x8xf32>
    %142 = arith.addf %141, %132 : vector<2x8xf32>
    %143 = arith.addf %142, %139 : vector<2x8xf32>
    %144 = arith.addf %143, %5 : vector<2x8xf32>
    %cst_55 = arith.constant dense<0xFF800000> : vector<2xf32>
    %145 = vector.multi_reduction <maximumf>, %144, %cst_55 [1] : vector<2x8xf32> to vector<2xf32>
    %146 = vector.shape_cast %145 : vector<2xf32> to vector<2x1xf32>
    %147 = vector.broadcast %146 : vector<2x1xf32> to vector<2x8xf32>
    %148 = arith.subf %144, %147 : vector<2x8xf32>
    %149 = math.exp %148 : vector<2x8xf32>
    %cst_56 = arith.constant dense<0.000000e+00> : vector<2xf32>
    %150 = vector.multi_reduction <add>, %149, %cst_56 [1] : vector<2x8xf32> to vector<2xf32>
    %151 = vector.shape_cast %150 : vector<2xf32> to vector<2x1xf32>
    %152 = tpu.reciprocal %151 {approx = true} : vector<2x1xf32> -> vector<2x1xf32>
    %153 = vector.broadcast %152 : vector<2x1xf32> to vector<2x8xf32>
    %154 = arith.mulf %149, %153 : vector<2x8xf32>
    %155 = vector.shape_cast %154 : vector<2x8xf32> to vector<2x1x8xf32>
    "tpu.trace_start"() <{level = 10 : i32, message = "bql,bld->bqd"}> : () -> ()
    %cst_57 = arith.constant dense<0.000000e+00> : vector<2x1x32xf32>
    %156 = tpu.matmul %155, %123, %cst_57 {dimension_numbers = #tpu.dot_dimension_numbers<[2], [1], [1], [2], [0, 0, 0, 1, 1, 2], [0], [0]>} : vector<2x1x8xf32>, vector<2x8x32xf32>, vector<2x1x32xf32> -> vector<2x1x32xf32>
    "tpu.trace_stop"() : () -> ()
    %157 = vector.shape_cast %156 : vector<2x1x32xf32> to vector<2x32xf32>
    %cst_58 = arith.constant dense<0.000000e+00> : vector<2x96xf32>
    %158 = tpu.matmul %157, %52, %cst_58 {dimension_numbers = #tpu.dot_dimension_numbers<[1], [0], [0], [1], [0, 0, 1, 1], [], []>} : vector<2x32xf32>, vector<32x96xf32>, vector<2x96xf32> -> vector<2x96xf32>
    %159 = vector.broadcast %54 : vector<1x96xf32> to vector<2x96xf32>
    %160 = arith.addf %158, %159 : vector<2x96xf32>
    %cst_59 = arith.constant dense<0.000000e+00> : vector<2x96xf32>
    %161 = tpu.matmul %122, %53, %cst_59 {dimension_numbers = #tpu.dot_dimension_numbers<[1], [0], [0], [1], [0, 0, 1, 1], [], []>} : vector<2x32xf32>, vector<32x96xf32>, vector<2x96xf32> -> vector<2x96xf32>
    %162 = vector.broadcast %55 : vector<1x96xf32> to vector<2x96xf32>
    %163 = arith.addf %161, %162 : vector<2x96xf32>
    %164 = vector.extract_strided_slice %160 {offsets = [0, 0], sizes = [2, 32], strides = [1, 1]} : vector<2x96xf32> to vector<2x32xf32>
    %165 = vector.extract_strided_slice %163 {offsets = [0, 0], sizes = [2, 32], strides = [1, 1]} : vector<2x96xf32> to vector<2x32xf32>
    %166 = arith.addf %164, %165 : vector<2x32xf32>
    %167 = arith.negf %166 : vector<2x32xf32>
    %168 = math.exp %167 : vector<2x32xf32>
    %cst_60 = arith.constant 1.000000e+00 : f32
    %169 = vector.broadcast %cst_60 : f32 to vector<2x32xf32>
    %170 = arith.addf %169, %168 : vector<2x32xf32>
    %171 = arith.divf %169, %170 : vector<2x32xf32>
    %172 = vector.extract_strided_slice %160 {offsets = [0, 32], sizes = [2, 32], strides = [1, 1]} : vector<2x96xf32> to vector<2x32xf32>
    %173 = vector.extract_strided_slice %163 {offsets = [0, 32], sizes = [2, 32], strides = [1, 1]} : vector<2x96xf32> to vector<2x32xf32>
    %174 = arith.addf %172, %173 : vector<2x32xf32>
    %175 = arith.negf %174 : vector<2x32xf32>
    %176 = math.exp %175 : vector<2x32xf32>
    %cst_61 = arith.constant 1.000000e+00 : f32
    %177 = vector.broadcast %cst_61 : f32 to vector<2x32xf32>
    %178 = arith.addf %177, %176 : vector<2x32xf32>
    %179 = arith.divf %177, %178 : vector<2x32xf32>
    %180 = vector.extract_strided_slice %160 {offsets = [0, 64], sizes = [2, 32], strides = [1, 1]} : vector<2x96xf32> to vector<2x32xf32>
    %181 = vector.extract_strided_slice %163 {offsets = [0, 64], sizes = [2, 32], strides = [1, 1]} : vector<2x96xf32> to vector<2x32xf32>
    %182 = arith.mulf %171, %181 : vector<2x32xf32>
    %183 = arith.addf %180, %182 : vector<2x32xf32>
    %184 = math.tanh %183 : vector<2x32xf32>
    %cst_62 = arith.constant 1.000000e+00 : f32
    %185 = vector.broadcast %cst_62 : f32 to vector<2x32xf32>
    %186 = arith.subf %185, %179 : vector<2x32xf32>
    %187 = arith.mulf %186, %184 : vector<2x32xf32>
    %188 = arith.mulf %179, %122 : vector<2x32xf32>
    %189 = arith.addf %187, %188 : vector<2x32xf32>
    %c2_i32 = arith.constant 2 : i32
    %c0_63 = arith.constant 0 : index
    %c0_64 = arith.constant 0 : index
    %c0_65 = arith.constant 0 : index
    %190 = vector.load %arg1[%c0_63, %c0_64, %c0_65] : memref<2x8x32xf32, #tpu.memory_space<vmem>>, vector<2x8x32xf32>
    %191 = vector.broadcast %37 : vector<1x32xf32> to vector<2x32xf32>
    %192 = arith.mulf %189, %191 : vector<2x32xf32>
    %cst_66 = arith.constant dense<0.000000e+00> : vector<2xf32>
    %193 = vector.multi_reduction <add>, %192, %cst_66 [1] : vector<2x32xf32> to vector<2xf32>
    %194 = vector.shape_cast %193 : vector<2xf32> to vector<2x1xf32>
    %195 = vector.broadcast %38 : vector<1x32xf32> to vector<2x32xf32>
    %196 = arith.mulf %189, %195 : vector<2x32xf32>
    %197 = vector.shape_cast %196 : vector<2x32xf32> to vector<2x1x32xf32>
    "tpu.trace_start"() <{level = 10 : i32, message = "bqd,bld->bql"}> : () -> ()
    %cst_67 = arith.constant dense<0.000000e+00> : vector<2x1x8xf32>
    %198 = tpu.matmul %197, %190, %cst_67 {dimension_numbers = #tpu.dot_dimension_numbers<[2], [2], [1], [1], [0, 0, 0, 1, 1, 1], [0], [0]>} : vector<2x1x32xf32>, vector<2x8x32xf32>, vector<2x1x8xf32> -> vector<2x1x8xf32>
    "tpu.trace_stop"() : () -> ()
    %199 = vector.shape_cast %198 : vector<2x1x8xf32> to vector<2x8xf32>
    %200 = vector.shape_cast %189 : vector<2x32xf32> to vector<2x1x32xf32>
    %201 = vector.broadcast %200 : vector<2x1x32xf32> to vector<2x8x32xf32>
    %202 = arith.subf %190, %201 : vector<2x8x32xf32>
    %203 = math.absf %202 : vector<2x8x32xf32>
    %204 = vector.shape_cast %44 : vector<2x32xf32> to vector<2x1x32xf32>
    "tpu.trace_start"() <{level = 10 : i32, message = "bqd,bld->bql"}> : () -> ()
    %cst_68 = arith.constant dense<0.000000e+00> : vector<2x1x8xf32>
    %205 = tpu.matmul %204, %203, %cst_68 {dimension_numbers = #tpu.dot_dimension_numbers<[2], [2], [1], [1], [0, 0, 0, 1, 1, 1], [0], [0]>} : vector<2x1x32xf32>, vector<2x8x32xf32>, vector<2x1x8xf32> -> vector<2x1x8xf32>
    "tpu.trace_stop"() : () -> ()
    %206 = vector.shape_cast %205 : vector<2x1x8xf32> to vector<2x8xf32>
    %207 = vector.broadcast %194 : vector<2x1xf32> to vector<2x8xf32>
    %208 = arith.addf %51, %207 : vector<2x8xf32>
    %209 = arith.addf %208, %199 : vector<2x8xf32>
    %210 = arith.addf %209, %206 : vector<2x8xf32>
    %211 = arith.addf %210, %5 : vector<2x8xf32>
    %cst_69 = arith.constant dense<0xFF800000> : vector<2xf32>
    %212 = vector.multi_reduction <maximumf>, %211, %cst_69 [1] : vector<2x8xf32> to vector<2xf32>
    %213 = vector.shape_cast %212 : vector<2xf32> to vector<2x1xf32>
    %214 = vector.broadcast %213 : vector<2x1xf32> to vector<2x8xf32>
    %215 = arith.subf %211, %214 : vector<2x8xf32>
    %216 = math.exp %215 : vector<2x8xf32>
    %cst_70 = arith.constant dense<0.000000e+00> : vector<2xf32>
    %217 = vector.multi_reduction <add>, %216, %cst_70 [1] : vector<2x8xf32> to vector<2xf32>
    %218 = vector.shape_cast %217 : vector<2xf32> to vector<2x1xf32>
    %219 = tpu.reciprocal %218 {approx = true} : vector<2x1xf32> -> vector<2x1xf32>
    %220 = vector.broadcast %219 : vector<2x1xf32> to vector<2x8xf32>
    %221 = arith.mulf %216, %220 : vector<2x8xf32>
    %222 = vector.shape_cast %221 : vector<2x8xf32> to vector<2x1x8xf32>
    "tpu.trace_start"() <{level = 10 : i32, message = "bql,bld->bqd"}> : () -> ()
    %cst_71 = arith.constant dense<0.000000e+00> : vector<2x1x32xf32>
    %223 = tpu.matmul %222, %190, %cst_71 {dimension_numbers = #tpu.dot_dimension_numbers<[2], [1], [1], [2], [0, 0, 0, 1, 1, 2], [0], [0]>} : vector<2x1x8xf32>, vector<2x8x32xf32>, vector<2x1x32xf32> -> vector<2x1x32xf32>
    "tpu.trace_stop"() : () -> ()
    %224 = vector.shape_cast %223 : vector<2x1x32xf32> to vector<2x32xf32>
    %cst_72 = arith.constant dense<0.000000e+00> : vector<2x96xf32>
    %225 = tpu.matmul %224, %52, %cst_72 {dimension_numbers = #tpu.dot_dimension_numbers<[1], [0], [0], [1], [0, 0, 1, 1], [], []>} : vector<2x32xf32>, vector<32x96xf32>, vector<2x96xf32> -> vector<2x96xf32>
    %226 = vector.broadcast %54 : vector<1x96xf32> to vector<2x96xf32>
    %227 = arith.addf %225, %226 : vector<2x96xf32>
    %cst_73 = arith.constant dense<0.000000e+00> : vector<2x96xf32>
    %228 = tpu.matmul %189, %53, %cst_73 {dimension_numbers = #tpu.dot_dimension_numbers<[1], [0], [0], [1], [0, 0, 1, 1], [], []>} : vector<2x32xf32>, vector<32x96xf32>, vector<2x96xf32> -> vector<2x96xf32>
    %229 = vector.broadcast %55 : vector<1x96xf32> to vector<2x96xf32>
    %230 = arith.addf %228, %229 : vector<2x96xf32>
    %231 = vector.extract_strided_slice %227 {offsets = [0, 0], sizes = [2, 32], strides = [1, 1]} : vector<2x96xf32> to vector<2x32xf32>
    %232 = vector.extract_strided_slice %230 {offsets = [0, 0], sizes = [2, 32], strides = [1, 1]} : vector<2x96xf32> to vector<2x32xf32>
    %233 = arith.addf %231, %232 : vector<2x32xf32>
    %234 = arith.negf %233 : vector<2x32xf32>
    %235 = math.exp %234 : vector<2x32xf32>
    %cst_74 = arith.constant 1.000000e+00 : f32
    %236 = vector.broadcast %cst_74 : f32 to vector<2x32xf32>
    %237 = arith.addf %236, %235 : vector<2x32xf32>
    %238 = arith.divf %236, %237 : vector<2x32xf32>
    %239 = vector.extract_strided_slice %227 {offsets = [0, 32], sizes = [2, 32], strides = [1, 1]} : vector<2x96xf32> to vector<2x32xf32>
    %240 = vector.extract_strided_slice %230 {offsets = [0, 32], sizes = [2, 32], strides = [1, 1]} : vector<2x96xf32> to vector<2x32xf32>
    %241 = arith.addf %239, %240 : vector<2x32xf32>
    %242 = arith.negf %241 : vector<2x32xf32>
    %243 = math.exp %242 : vector<2x32xf32>
    %cst_75 = arith.constant 1.000000e+00 : f32
    %244 = vector.broadcast %cst_75 : f32 to vector<2x32xf32>
    %245 = arith.addf %244, %243 : vector<2x32xf32>
    %246 = arith.divf %244, %245 : vector<2x32xf32>
    %247 = vector.extract_strided_slice %227 {offsets = [0, 64], sizes = [2, 32], strides = [1, 1]} : vector<2x96xf32> to vector<2x32xf32>
    %248 = vector.extract_strided_slice %230 {offsets = [0, 64], sizes = [2, 32], strides = [1, 1]} : vector<2x96xf32> to vector<2x32xf32>
    %249 = arith.mulf %238, %248 : vector<2x32xf32>
    %250 = arith.addf %247, %249 : vector<2x32xf32>
    %251 = math.tanh %250 : vector<2x32xf32>
    %cst_76 = arith.constant 1.000000e+00 : f32
    %252 = vector.broadcast %cst_76 : f32 to vector<2x32xf32>
    %253 = arith.subf %252, %246 : vector<2x32xf32>
    %254 = arith.mulf %253, %251 : vector<2x32xf32>
    %255 = arith.mulf %246, %189 : vector<2x32xf32>
    %256 = arith.addf %254, %255 : vector<2x32xf32>
    %c3_i32 = arith.constant 3 : i32
    %c0_77 = arith.constant 0 : index
    %c0_78 = arith.constant 0 : index
    %c0_79 = arith.constant 0 : index
    %257 = vector.load %arg1[%c0_77, %c0_78, %c0_79] : memref<2x8x32xf32, #tpu.memory_space<vmem>>, vector<2x8x32xf32>
    %258 = vector.broadcast %37 : vector<1x32xf32> to vector<2x32xf32>
    %259 = arith.mulf %256, %258 : vector<2x32xf32>
    %cst_80 = arith.constant dense<0.000000e+00> : vector<2xf32>
    %260 = vector.multi_reduction <add>, %259, %cst_80 [1] : vector<2x32xf32> to vector<2xf32>
    %261 = vector.shape_cast %260 : vector<2xf32> to vector<2x1xf32>
    %262 = vector.broadcast %38 : vector<1x32xf32> to vector<2x32xf32>
    %263 = arith.mulf %256, %262 : vector<2x32xf32>
    %264 = vector.shape_cast %263 : vector<2x32xf32> to vector<2x1x32xf32>
    "tpu.trace_start"() <{level = 10 : i32, message = "bqd,bld->bql"}> : () -> ()
    %cst_81 = arith.constant dense<0.000000e+00> : vector<2x1x8xf32>
    %265 = tpu.matmul %264, %257, %cst_81 {dimension_numbers = #tpu.dot_dimension_numbers<[2], [2], [1], [1], [0, 0, 0, 1, 1, 1], [0], [0]>} : vector<2x1x32xf32>, vector<2x8x32xf32>, vector<2x1x8xf32> -> vector<2x1x8xf32>
    "tpu.trace_stop"() : () -> ()
    %266 = vector.shape_cast %265 : vector<2x1x8xf32> to vector<2x8xf32>
    %267 = vector.shape_cast %256 : vector<2x32xf32> to vector<2x1x32xf32>
    %268 = vector.broadcast %267 : vector<2x1x32xf32> to vector<2x8x32xf32>
    %269 = arith.subf %257, %268 : vector<2x8x32xf32>
    %270 = math.absf %269 : vector<2x8x32xf32>
    %271 = vector.shape_cast %44 : vector<2x32xf32> to vector<2x1x32xf32>
    "tpu.trace_start"() <{level = 10 : i32, message = "bqd,bld->bql"}> : () -> ()
    %cst_82 = arith.constant dense<0.000000e+00> : vector<2x1x8xf32>
    %272 = tpu.matmul %271, %270, %cst_82 {dimension_numbers = #tpu.dot_dimension_numbers<[2], [2], [1], [1], [0, 0, 0, 1, 1, 1], [0], [0]>} : vector<2x1x32xf32>, vector<2x8x32xf32>, vector<2x1x8xf32> -> vector<2x1x8xf32>
    "tpu.trace_stop"() : () -> ()
    %273 = vector.shape_cast %272 : vector<2x1x8xf32> to vector<2x8xf32>
    %274 = vector.broadcast %261 : vector<2x1xf32> to vector<2x8xf32>
    %275 = arith.addf %51, %274 : vector<2x8xf32>
    %276 = arith.addf %275, %266 : vector<2x8xf32>
    %277 = arith.addf %276, %273 : vector<2x8xf32>
    %278 = arith.addf %277, %5 : vector<2x8xf32>
    %cst_83 = arith.constant dense<0xFF800000> : vector<2xf32>
    %279 = vector.multi_reduction <maximumf>, %278, %cst_83 [1] : vector<2x8xf32> to vector<2xf32>
    %280 = vector.shape_cast %279 : vector<2xf32> to vector<2x1xf32>
    %281 = vector.broadcast %280 : vector<2x1xf32> to vector<2x8xf32>
    %282 = arith.subf %278, %281 : vector<2x8xf32>
    %283 = math.exp %282 : vector<2x8xf32>
    %cst_84 = arith.constant dense<0.000000e+00> : vector<2xf32>
    %284 = vector.multi_reduction <add>, %283, %cst_84 [1] : vector<2x8xf32> to vector<2xf32>
    %285 = vector.shape_cast %284 : vector<2xf32> to vector<2x1xf32>
    %286 = tpu.reciprocal %285 {approx = true} : vector<2x1xf32> -> vector<2x1xf32>
    %287 = vector.broadcast %286 : vector<2x1xf32> to vector<2x8xf32>
    %288 = arith.mulf %283, %287 : vector<2x8xf32>
    %289 = vector.shape_cast %288 : vector<2x8xf32> to vector<2x1x8xf32>
    "tpu.trace_start"() <{level = 10 : i32, message = "bql,bld->bqd"}> : () -> ()
    %cst_85 = arith.constant dense<0.000000e+00> : vector<2x1x32xf32>
    %290 = tpu.matmul %289, %257, %cst_85 {dimension_numbers = #tpu.dot_dimension_numbers<[2], [1], [1], [2], [0, 0, 0, 1, 1, 2], [0], [0]>} : vector<2x1x8xf32>, vector<2x8x32xf32>, vector<2x1x32xf32> -> vector<2x1x32xf32>
    "tpu.trace_stop"() : () -> ()
    %291 = vector.shape_cast %290 : vector<2x1x32xf32> to vector<2x32xf32>
    %cst_86 = arith.constant dense<0.000000e+00> : vector<2x96xf32>
    %292 = tpu.matmul %291, %52, %cst_86 {dimension_numbers = #tpu.dot_dimension_numbers<[1], [0], [0], [1], [0, 0, 1, 1], [], []>} : vector<2x32xf32>, vector<32x96xf32>, vector<2x96xf32> -> vector<2x96xf32>
    %293 = vector.broadcast %54 : vector<1x96xf32> to vector<2x96xf32>
    %294 = arith.addf %292, %293 : vector<2x96xf32>
    %cst_87 = arith.constant dense<0.000000e+00> : vector<2x96xf32>
    %295 = tpu.matmul %256, %53, %cst_87 {dimension_numbers = #tpu.dot_dimension_numbers<[1], [0], [0], [1], [0, 0, 1, 1], [], []>} : vector<2x32xf32>, vector<32x96xf32>, vector<2x96xf32> -> vector<2x96xf32>
    %296 = vector.broadcast %55 : vector<1x96xf32> to vector<2x96xf32>
    %297 = arith.addf %295, %296 : vector<2x96xf32>
    %298 = vector.extract_strided_slice %294 {offsets = [0, 0], sizes = [2, 32], strides = [1, 1]} : vector<2x96xf32> to vector<2x32xf32>
    %299 = vector.extract_strided_slice %297 {offsets = [0, 0], sizes = [2, 32], strides = [1, 1]} : vector<2x96xf32> to vector<2x32xf32>
    %300 = arith.addf %298, %299 : vector<2x32xf32>
    %301 = arith.negf %300 : vector<2x32xf32>
    %302 = math.exp %301 : vector<2x32xf32>
    %cst_88 = arith.constant 1.000000e+00 : f32
    %303 = vector.broadcast %cst_88 : f32 to vector<2x32xf32>
    %304 = arith.addf %303, %302 : vector<2x32xf32>
    %305 = arith.divf %303, %304 : vector<2x32xf32>
    %306 = vector.extract_strided_slice %294 {offsets = [0, 32], sizes = [2, 32], strides = [1, 1]} : vector<2x96xf32> to vector<2x32xf32>
    %307 = vector.extract_strided_slice %297 {offsets = [0, 32], sizes = [2, 32], strides = [1, 1]} : vector<2x96xf32> to vector<2x32xf32>
    %308 = arith.addf %306, %307 : vector<2x32xf32>
    %309 = arith.negf %308 : vector<2x32xf32>
    %310 = math.exp %309 : vector<2x32xf32>
    %cst_89 = arith.constant 1.000000e+00 : f32
    %311 = vector.broadcast %cst_89 : f32 to vector<2x32xf32>
    %312 = arith.addf %311, %310 : vector<2x32xf32>
    %313 = arith.divf %311, %312 : vector<2x32xf32>
    %314 = vector.extract_strided_slice %294 {offsets = [0, 64], sizes = [2, 32], strides = [1, 1]} : vector<2x96xf32> to vector<2x32xf32>
    %315 = vector.extract_strided_slice %297 {offsets = [0, 64], sizes = [2, 32], strides = [1, 1]} : vector<2x96xf32> to vector<2x32xf32>
    %316 = arith.mulf %305, %315 : vector<2x32xf32>
    %317 = arith.addf %314, %316 : vector<2x32xf32>
    %318 = math.tanh %317 : vector<2x32xf32>
    %cst_90 = arith.constant 1.000000e+00 : f32
    %319 = vector.broadcast %cst_90 : f32 to vector<2x32xf32>
    %320 = arith.subf %319, %313 : vector<2x32xf32>
    %321 = arith.mulf %320, %318 : vector<2x32xf32>
    %322 = arith.mulf %313, %256 : vector<2x32xf32>
    %323 = arith.addf %321, %322 : vector<2x32xf32>
    %c0_91 = arith.constant 0 : index
    %c0_92 = arith.constant 0 : index
    %c0_93 = arith.constant 0 : index
    %324 = vector.load %arg1[%c0_91, %c0_92, %c0_93] : memref<2x8x32xf32, #tpu.memory_space<vmem>>, vector<2x8x32xf32>
    %325 = vector.broadcast %37 : vector<1x32xf32> to vector<2x32xf32>
    %326 = arith.mulf %323, %325 : vector<2x32xf32>
    %cst_94 = arith.constant dense<0.000000e+00> : vector<2xf32>
    %327 = vector.multi_reduction <add>, %326, %cst_94 [1] : vector<2x32xf32> to vector<2xf32>
    %328 = vector.shape_cast %327 : vector<2xf32> to vector<2x1xf32>
    %329 = vector.broadcast %38 : vector<1x32xf32> to vector<2x32xf32>
    %330 = arith.mulf %323, %329 : vector<2x32xf32>
    %331 = vector.shape_cast %330 : vector<2x32xf32> to vector<2x1x32xf32>
    "tpu.trace_start"() <{level = 10 : i32, message = "bqd,bld->bql"}> : () -> ()
    %cst_95 = arith.constant dense<0.000000e+00> : vector<2x1x8xf32>
    %332 = tpu.matmul %331, %324, %cst_95 {dimension_numbers = #tpu.dot_dimension_numbers<[2], [2], [1], [1], [0, 0, 0, 1, 1, 1], [0], [0]>} : vector<2x1x32xf32>, vector<2x8x32xf32>, vector<2x1x8xf32> -> vector<2x1x8xf32>
    "tpu.trace_stop"() : () -> ()
    %333 = vector.shape_cast %332 : vector<2x1x8xf32> to vector<2x8xf32>
    %334 = vector.shape_cast %323 : vector<2x32xf32> to vector<2x1x32xf32>
    %335 = vector.broadcast %334 : vector<2x1x32xf32> to vector<2x8x32xf32>
    %336 = arith.subf %324, %335 : vector<2x8x32xf32>
    %337 = math.absf %336 : vector<2x8x32xf32>
    %338 = vector.shape_cast %44 : vector<2x32xf32> to vector<2x1x32xf32>
    "tpu.trace_start"() <{level = 10 : i32, message = "bqd,bld->bql"}> : () -> ()
    %cst_96 = arith.constant dense<0.000000e+00> : vector<2x1x8xf32>
    %339 = tpu.matmul %338, %337, %cst_96 {dimension_numbers = #tpu.dot_dimension_numbers<[2], [2], [1], [1], [0, 0, 0, 1, 1, 1], [0], [0]>} : vector<2x1x32xf32>, vector<2x8x32xf32>, vector<2x1x8xf32> -> vector<2x1x8xf32>
    "tpu.trace_stop"() : () -> ()
    %340 = vector.shape_cast %339 : vector<2x1x8xf32> to vector<2x8xf32>
    %341 = vector.broadcast %328 : vector<2x1xf32> to vector<2x8xf32>
    %342 = arith.addf %51, %341 : vector<2x8xf32>
    %343 = arith.addf %342, %333 : vector<2x8xf32>
    %344 = arith.addf %343, %340 : vector<2x8xf32>
    %345 = arith.addf %344, %5 : vector<2x8xf32>
    %cst_97 = arith.constant dense<0xFF800000> : vector<2xf32>
    %346 = vector.multi_reduction <maximumf>, %345, %cst_97 [1] : vector<2x8xf32> to vector<2xf32>
    %347 = vector.shape_cast %346 : vector<2xf32> to vector<2x1xf32>
    %348 = vector.broadcast %347 : vector<2x1xf32> to vector<2x8xf32>
    %349 = arith.subf %345, %348 : vector<2x8xf32>
    %350 = math.exp %349 : vector<2x8xf32>
    %cst_98 = arith.constant dense<0.000000e+00> : vector<2xf32>
    %351 = vector.multi_reduction <add>, %350, %cst_98 [1] : vector<2x8xf32> to vector<2xf32>
    %352 = vector.shape_cast %351 : vector<2xf32> to vector<2x1xf32>
    %353 = tpu.reciprocal %352 {approx = true} : vector<2x1xf32> -> vector<2x1xf32>
    %354 = vector.broadcast %353 : vector<2x1xf32> to vector<2x8xf32>
    %355 = arith.mulf %350, %354 : vector<2x8xf32>
    %356 = vector.shape_cast %355 : vector<2x8xf32> to vector<2x1x8xf32>
    "tpu.trace_start"() <{level = 10 : i32, message = "bql,bld->bqd"}> : () -> ()
    %cst_99 = arith.constant dense<0.000000e+00> : vector<2x1x32xf32>
    %357 = tpu.matmul %356, %324, %cst_99 {dimension_numbers = #tpu.dot_dimension_numbers<[2], [1], [1], [2], [0, 0, 0, 1, 1, 2], [0], [0]>} : vector<2x1x8xf32>, vector<2x8x32xf32>, vector<2x1x32xf32> -> vector<2x1x32xf32>
    "tpu.trace_stop"() : () -> ()
    %358 = vector.shape_cast %357 : vector<2x1x32xf32> to vector<2x32xf32>
    %c0_100 = arith.constant 0 : index
    %c0_101 = arith.constant 0 : index
    %359 = vector.load %arg9[%c0_100, %c0_101] : memref<64x128xf32, #tpu.memory_space<vmem>>, vector<64x128xf32>
    %360 = vector.extract_strided_slice %359 {offsets = [0, 0], sizes = [32, 128], strides = [1, 1]} : vector<64x128xf32> to vector<32x128xf32>
    %cst_102 = arith.constant dense<0.000000e+00> : vector<2x128xf32>
    %361 = tpu.matmul %358, %360, %cst_102 {dimension_numbers = #tpu.dot_dimension_numbers<[1], [0], [0], [1], [0, 0, 1, 1], [], []>} : vector<2x32xf32>, vector<32x128xf32>, vector<2x128xf32> -> vector<2x128xf32>
    %362 = vector.extract_strided_slice %359 {offsets = [32, 0], sizes = [32, 128], strides = [1, 1]} : vector<64x128xf32> to vector<32x128xf32>
    %cst_103 = arith.constant dense<0.000000e+00> : vector<2x128xf32>
    %363 = tpu.matmul %323, %362, %cst_103 {dimension_numbers = #tpu.dot_dimension_numbers<[1], [0], [0], [1], [0, 0, 1, 1], [], []>} : vector<2x32xf32>, vector<32x128xf32>, vector<2x128xf32> -> vector<2x128xf32>
    %364 = arith.addf %361, %363 : vector<2x128xf32>
    %c0_104 = arith.constant 0 : index
    %c0_105 = arith.constant 0 : index
    %365 = vector.load %arg10[%c0_104, %c0_105] : memref<1x128xf32, #tpu.memory_space<vmem>>, vector<1x128xf32>
    %366 = vector.broadcast %365 : vector<1x128xf32> to vector<2x128xf32>
    %367 = arith.addf %364, %366 : vector<2x128xf32>
    %c0_106 = arith.constant 0 : index
    %c0_107 = arith.constant 0 : index
    %368 = vector.load %arg15[%c0_106, %c0_107] : memref<2x128xf32, #tpu.memory_space<vmem>>, vector<2x128xf32>
    tpu.vector_store %arg15[%c0_106, %c0_107], %367 {strides = array<i32>} : memref<2x128xf32, #tpu.memory_space<vmem>>, vector<2x128xf32>,
    return
  }
  func.func @transform_0(%arg0: i32) -> (i32, i32, i32) {
    %c0_i32 = arith.constant 0 : i32
    %c0_i32_0 = arith.constant 0 : i32
    %c0_i32_1 = arith.constant 0 : i32
    return %arg0, %c0_i32, %c0_i32_0 : i32, i32, i32
  }
  func.func @transform_1(%arg0: i32) -> (i32, i32, i32) {
    %c0_i32 = arith.constant 0 : i32
    %c0_i32_0 = arith.constant 0 : i32
    %c0_i32_1 = arith.constant 0 : i32
    return %arg0, %c0_i32, %c0_i32_0 : i32, i32, i32
  }
  func.func @transform_2(%arg0: i32) -> (i32, i32) {
    %c0_i32 = arith.constant 0 : i32
    %c0_i32_0 = arith.constant 0 : i32
    return %arg0, %c0_i32 : i32, i32
  }
  func.func @transform_3(%arg0: i32) -> (i32, i32) {
    %c0_i32 = arith.constant 0 : i32
    %c0_i32_0 = arith.constant 0 : i32
    return %arg0, %c0_i32 : i32, i32
  }
  func.func @transform_4(%arg0: i32) -> (i32, i32) {
    %c0_i32 = arith.constant 0 : i32
    %c0_i32_0 = arith.constant 0 : i32
    %c0_i32_1 = arith.constant 0 : i32
    return %c0_i32, %c0_i32_0 : i32, i32
  }
  func.func @transform_5(%arg0: i32) -> (i32, i32) {
    %c0_i32 = arith.constant 0 : i32
    %c0_i32_0 = arith.constant 0 : i32
    %c0_i32_1 = arith.constant 0 : i32
    return %c0_i32, %c0_i32_0 : i32, i32
  }
  func.func @transform_6(%arg0: i32) -> (i32, i32) {
    %c0_i32 = arith.constant 0 : i32
    %c0_i32_0 = arith.constant 0 : i32
    %c0_i32_1 = arith.constant 0 : i32
    return %c0_i32, %c0_i32_0 : i32, i32
  }
  func.func @transform_7(%arg0: i32) -> (i32, i32) {
    %c0_i32 = arith.constant 0 : i32
    %c0_i32_0 = arith.constant 0 : i32
    %c0_i32_1 = arith.constant 0 : i32
    return %c0_i32, %c0_i32_0 : i32, i32
  }
  func.func @transform_8(%arg0: i32) -> (i32, i32) {
    %c0_i32 = arith.constant 0 : i32
    %c0_i32_0 = arith.constant 0 : i32
    %c0_i32_1 = arith.constant 0 : i32
    return %c0_i32, %c0_i32_0 : i32, i32
  }
  func.func @transform_9(%arg0: i32) -> (i32, i32) {
    %c0_i32 = arith.constant 0 : i32
    %c0_i32_0 = arith.constant 0 : i32
    %c0_i32_1 = arith.constant 0 : i32
    return %c0_i32, %c0_i32_0 : i32, i32
  }
  func.func @transform_10(%arg0: i32) -> (i32, i32) {
    %c0_i32 = arith.constant 0 : i32
    %c0_i32_0 = arith.constant 0 : i32
    %c0_i32_1 = arith.constant 0 : i32
    return %c0_i32, %c0_i32_0 : i32, i32
  }
  func.func @transform_11(%arg0: i32) -> (i32, i32) {
    %c0_i32 = arith.constant 0 : i32
    %c0_i32_0 = arith.constant 0 : i32
    %c0_i32_1 = arith.constant 0 : i32
    return %c0_i32, %c0_i32_0 : i32, i32
  }
  func.func @transform_12(%arg0: i32) -> (i32, i32) {
    %c0_i32 = arith.constant 0 : i32
    %c0_i32_0 = arith.constant 0 : i32
    %c0_i32_1 = arith.constant 0 : i32
    return %c0_i32, %c0_i32_0 : i32, i32
  }
  func.func @transform_13(%arg0: i32) -> (i32, i32) {
    %c0_i32 = arith.constant 0 : i32
    %c0_i32_0 = arith.constant 0 : i32
    %c0_i32_1 = arith.constant 0 : i32
    return %c0_i32, %c0_i32_0 : i32, i32
  }
  func.func @transform_14(%arg0: i32) -> (i32, i32) {
    %c0_i32 = arith.constant 0 : i32
    %c0_i32_0 = arith.constant 0 : i32
    return %arg0, %c0_i32 : i32, i32
  }
}

module attributes {stable_mosaic.version = 11 : i64} {
  func.func @san_classifier_kernel(%arg0: i32, %arg1: memref<2x8x32xf32, #tpu.memory_space<vmem>>, %arg2: memref<2x8x32xf32, #tpu.memory_space<vmem>>, %arg3: memref<2x8xf32, #tpu.memory_space<vmem>>, %arg4: memref<2x8xf32, #tpu.memory_space<vmem>>, %arg5: memref<1x32xf32, #tpu.memory_space<vmem>>, %arg6: memref<1x1xf32, #tpu.memory_space<smem>>, %arg7: memref<4x32xf32, #tpu.memory_space<vmem>>, %arg8: memref<1x1xf32, #tpu.memory_space<smem>>, %arg9: memref<64x128xf32, #tpu.memory_space<vmem>>, %arg10: memref<1x128xf32, #tpu.memory_space<vmem>>, %arg11: memref<32x96xf32, #tpu.memory_space<vmem>>, %arg12: memref<32x96xf32, #tpu.memory_space<vmem>>, %arg13: memref<1x96xf32, #tpu.memory_space<vmem>>, %arg14: memref<1x96xf32, #tpu.memory_space<vmem>>, %arg15: memref<2x128xf32, #tpu.memory_space<vmem>>) attributes {dimension_semantics = [#tpu.dimension_semantics<parallel>], iteration_bounds = array<i64: 1>, scalar_prefetch = 0 : i64, scratch_operands = 0 : i64, tpu.core_type = #tpu.core_type<tc>, window_params = [{transform_indices = @transform_0, window_bounds = array<i64: 2, 8, 32>}, {transform_indices = @transform_1, window_bounds = array<i64: 2, 8, 32>}, {transform_indices = @transform_2, window_bounds = array<i64: 2, 8>}, {transform_indices = @transform_3, window_bounds = array<i64: 2, 8>}, {pipeline_mode = #tpu.pipeline_mode<synchronous>, transform_indices = @transform_4, window_bounds = array<i64: 1, 32>}, {transform_indices = @transform_5, window_bounds = array<i64: 1, 1>}, {pipeline_mode = #tpu.pipeline_mode<synchronous>, transform_indices = @transform_6, window_bounds = array<i64: 4, 32>}, {transform_indices = @transform_7, window_bounds = array<i64: 1, 1>}, {pipeline_mode = #tpu.pipeline_mode<synchronous>, transform_indices = @transform_8, window_bounds = array<i64: 64, 128>}, {pipeline_mode = #tpu.pipeline_mode<synchronous>, transform_indices = @transform_9, window_bounds = array<i64: 1, 128>}, {pipeline_mode = #tpu.pipeline_mode<synchronous>, transform_indices = @transform_10, window_bounds = array<i64: 32, 96>}, {pipeline_mode = #tpu.pipeline_mode<synchronous>, transform_indices = @transform_11, window_bounds = array<i64: 32, 96>}, {pipeline_mode = #tpu.pipeline_mode<synchronous>, transform_indices = @transform_12, window_bounds = array<i64: 1, 96>}, {pipeline_mode = #tpu.pipeline_mode<synchronous>, transform_indices = @transform_13, window_bounds = array<i64: 1, 96>}, {transform_indices = @transform_14, window_bounds = array<i64: 2, 128>}]} {
    %c0 = arith.constant 0 : index
    %c0_0 = arith.constant 0 : index
    %0 = vector.load %arg3[%c0, %c0_0] : memref<2x8xf32, #tpu.memory_space<vmem>>, vector<2x8xf32>
    %cst = arith.constant 0.000000e+00 : f32
    %1 = vector.broadcast %cst : f32 to vector<2x8xf32>
    %2 = arith.cmpf ogt, %0, %1 : vector<2x8xf32>
    %cst_1 = arith.constant 0xFF800000 : f32
    %cst_2 = arith.constant 0.000000e+00 : f32
    %3 = vector.broadcast %cst_1 : f32 to vector<2x8xf32>
    %4 = vector.broadcast %cst_2 : f32 to vector<2x8xf32>
    %5 = arith.select %2, %3, %4 : vector<2x8xi1>, vector<2x8xf32>
    %c0_3 = arith.constant 0 : index
    %c0_4 = arith.constant 0 : index
    %6 = vector.load %arg4[%c0_3, %c0_4] : memref<2x8xf32, #tpu.memory_space<vmem>>, vector<2x8xf32>
    %cst_5 = arith.constant 0.000000e+00 : f32
    %7 = vector.broadcast %cst_5 : f32 to vector<2x8xf32>
    %8 = arith.cmpf ogt, %6, %7 : vector<2x8xf32>
    %cst_6 = arith.constant 0xFF800000 : f32
    %cst_7 = arith.constant 0.000000e+00 : f32
    %9 = vector.broadcast %cst_6 : f32 to vector<2x8xf32>
    %10 = vector.broadcast %cst_7 : f32 to vector<2x8xf32>
    %11 = arith.select %8, %9, %10 : vector<2x8xi1>, vector<2x8xf32>
    %c0_8 = arith.constant 0 : index
    %c0_9 = arith.constant 0 : index
    %c0_10 = arith.constant 0 : index
    %12 = vector.load %arg2[%c0_8, %c0_9, %c0_10] : memref<2x8x32xf32, #tpu.memory_space<vmem>>, vector<2x8x32xf32>
    %c0_11 = arith.constant 0 : index
    %c0_12 = arith.constant 0 : index
    %13 = vector.load %arg5[%c0_11, %c0_12] : memref<1x32xf32, #tpu.memory_space<vmem>>, vector<1x32xf32>
    %14 = vector.shape_cast %13 : vector<1x32xf32> to vector<1x32xf32>
    %15 = vector.broadcast %14 : vector<1x32xf32> to vector<2x32xf32>
    %16 = vector.shape_cast %15 : vector<2x32xf32> to vector<2x1x32xf32>
    "tpu.trace_start"() <{level = 10 : i32, message = "bqd,bld->bql"}> : () -> ()
    %cst_13 = arith.constant dense<0.000000e+00> : vector<2x1x8xf32>
    %17 = tpu.matmul %16, %12, %cst_13 {dimension_numbers = #tpu.dot_dimension_numbers<[2], [2], [1], [1], [0, 0, 0, 1, 1, 1], [0], [0]>} : vector<2x1x32xf32>, vector<2x8x32xf32>, vector<2x1x8xf32> -> vector<2x1x8xf32>
    "tpu.trace_stop"() : () -> ()
    %18 = vector.shape_cast %17 : vector<2x1x8xf32> to vector<2x8xf32>
    %c0_14 = arith.constant 0 : index
    %c0_15 = arith.constant 0 : index
    %19 = memref.load %arg6[%c0_14, %c0_15] : memref<1x1xf32, #tpu.memory_space<smem>>
    %20 = vector.broadcast %19 : f32 to vector<2x8xf32>
    %21 = arith.addf %18, %20 : vector<2x8xf32>
    %22 = arith.addf %21, %11 : vector<2x8xf32>
    %cst_16 = arith.constant dense<0xFF800000> : vector<2xf32>
    %23 = vector.multi_reduction <maximumf>, %22, %cst_16 [1] : vector<2x8xf32> to vector<2xf32>
    %24 = vector.shape_cast %23 : vector<2xf32> to vector<2x1xf32>
    %25 = vector.broadcast %24 : vector<2x1xf32> to vector<2x8xf32>
    %26 = arith.subf %22, %25 : vector<2x8xf32>
    %27 = math.exp %26 : vector<2x8xf32>
    %cst_17 = arith.constant dense<0.000000e+00> : vector<2xf32>
    %28 = vector.multi_reduction <add>, %27, %cst_17 [1] : vector<2x8xf32> to vector<2xf32>
    %29 = vector.shape_cast %28 : vector<2xf32> to vector<2x1xf32>
    %30 = tpu.reciprocal %29 {approx = true} : vector<2x1xf32> -> vector<2x1xf32>
    %31 = vector.broadcast %30 : vector<2x1xf32> to vector<2x8xf32>
    %32 = arith.mulf %27, %31 : vector<2x8xf32>
    %33 = vector.shape_cast %32 : vector<2x8xf32> to vector<2x1x8xf32>
    "tpu.trace_start"() <{level = 10 : i32, message = "bql,bld->bqd"}> : () -> ()
    %cst_18 = arith.constant dense<0.000000e+00> : vector<2x1x32xf32>
    %34 = tpu.matmul %33, %12, %cst_18 {dimension_numbers = #tpu.dot_dimension_numbers<[2], [1], [1], [2], [0, 0, 0, 1, 1, 2], [0], [0]>} : vector<2x1x8xf32>, vector<2x8x32xf32>, vector<2x1x32xf32> -> vector<2x1x32xf32>
    "tpu.trace_stop"() : () -> ()
    %35 = vector.shape_cast %34 : vector<2x1x32xf32> to vector<2x32xf32>
    %c0_19 = arith.constant 0 : index
    %c0_20 = arith.constant 0 : index
    %36 = vector.load %arg7[%c0_19, %c0_20] : memref<4x32xf32, #tpu.memory_space<vmem>>, vector<4x32xf32>
    %37 = vector.extract_strided_slice %36 {offsets = [1, 0], sizes = [1, 32], strides = [1, 1]} : vector<4x32xf32> to vector<1x32xf32>
    %38 = vector.extract_strided_slice %36 {offsets = [2, 0], sizes = [1, 32], strides = [1, 1]} : vector<4x32xf32> to vector<1x32xf32>
    %39 = vector.extract_strided_slice %36 {offsets = [0, 0], sizes = [1, 32], strides = [1, 1]} : vector<4x32xf32> to vector<1x32xf32>
    %40 = vector.shape_cast %39 : vector<1x32xf32> to vector<1x32xf32>
    %41 = vector.broadcast %40 : vector<1x32xf32> to vector<2x32xf32>
    %42 = vector.extract_strided_slice %36 {offsets = [3, 0], sizes = [1, 32], strides = [1, 1]} : vector<4x32xf32> to vector<1x32xf32>
    %43 = vector.shape_cast %42 : vector<1x32xf32> to vector<1x32xf32>
    %44 = vector.broadcast %43 : vector<1x32xf32> to vector<2x32xf32>
    %c0_21 = arith.constant 0 : index
    %c0_22 = arith.constant 0 : index
    %c0_23 = arith.constant 0 : index
    %45 = vector.load %arg1[%c0_21, %c0_22, %c0_23] : memref<2x8x32xf32, #tpu.memory_space<vmem>>, vector<2x8x32xf32>
    %46 = vector.shape_cast %41 : vector<2x32xf32> to vector<2x1x32xf32>
    "tpu.trace_start"() <{level = 10 : i32, message = "bqd,bld->bql"}> : () -> ()
    %cst_24 = arith.constant dense<0.000000e+00> : vector<2x1x8xf32>
    %47 = tpu.matmul %46, %45, %cst_24 {dimension_numbers = #tpu.dot_dimension_numbers<[2], [2], [1], [1], [0, 0, 0, 1, 1, 1], [0], [0]>} : vector<2x1x32xf32>, vector<2x8x32xf32>, vector<2x1x8xf32> -> vector<2x1x8xf32>
    "tpu.trace_stop"() : () -> ()
    %48 = vector.shape_cast %47 : vector<2x1x8xf32> to vector<2x8xf32>
    %c0_25 = arith.constant 0 : index
    %c0_26 = arith.constant 0 : index
    %49 = memref.load %arg8[%c0_25, %c0_26] : memref<1x1xf32, #tpu.memory_space<smem>>
    %50 = vector.broadcast %49 : f32 to vector<2x8xf32>
    %51 = arith.addf %48, %50 : vector<2x8xf32>
    %c0_27 = arith.constant 0 : index
    %c0_28 = arith.constant 0 : index
    %52 = vector.load %arg11[%c0_27, %c0_28] : memref<32x96xf32, #tpu.memory_space<vmem>>, vector<32x96xf32>
    %c0_29 = arith.constant 0 : index
    %c0_30 = arith.constant 0 : index
    %53 = vector.load %arg12[%c0_29, %c0_30] : memref<32x96xf32, #tpu.memory_space<vmem>>, vector<32x96xf32>
    %c0_31 = arith.constant 0 : index
    %c0_32 = arith.constant 0 : index
    %54 = vector.load %arg13[%c0_31, %c0_32] : memref<1x96xf32, #tpu.memory_space<vmem>>, vector<1x96xf32>
    %c0_33 = arith.constant 0 : index
    %c0_34 = arith.constant 0 : index
    %55 = vector.load %arg14[%c0_33, %c0_34] : memref<1x96xf32, #tpu.memory_space<vmem>>, vector<1x96xf32>
    %c0_i32 = arith.constant 0 : i32
    %c0_35 = arith.constant 0 : index
    %c0_36 = arith.constant 0 : index
    %c0_37 = arith.constant 0 : index
    %56 = vector.load %arg1[%c0_35, %c0_36, %c0_37] : memref<2x8x32xf32, #tpu.memory_space<vmem>>, vector<2x8x32xf32>
    %57 = vector.broadcast %37 : vector<1x32xf32> to vector<2x32xf32>
    %58 = arith.mulf %35, %57 : vector<2x32xf32>
    %cst_38 = arith.constant dense<0.000000e+00> : vector<2xf32>
    %59 = vector.multi_reduction <add>, %58, %cst_38 [1] : vector<2x32xf32> to vector<2xf32>
    %60 = vector.shape_cast %59 : vector<2xf32> to vector<2x1xf32>
    %61 = vector.broadcast %38 : vector<1x32xf32> to vector<2x32xf32>
    %62 = arith.mulf %35, %61 : vector<2x32xf32>
    %63 = vector.shape_cast %62 : vector<2x32xf32> to vector<2x1x32xf32>
    "tpu.trace_start"() <{level = 10 : i32, message = "bqd,bld->bql"}> : () -> ()
    %cst_39 = arith.constant dense<0.000000e+00> : vector<2x1x8xf32>
    %64 = tpu.matmul %63, %56, %cst_39 {dimension_numbers = #tpu.dot_dimension_numbers<[2], [2], [1], [1], [0, 0, 0, 1, 1, 1], [0], [0]>} : vector<2x1x32xf32>, vector<2x8x32xf32>, vector<2x1x8xf32> -> vector<2x1x8xf32>
    "tpu.trace_stop"() : () -> ()
    %65 = vector.shape_cast %64 : vector<2x1x8xf32> to vector<2x8xf32>
    %66 = vector.shape_cast %35 : vector<2x32xf32> to vector<2x1x32xf32>
    %67 = vector.broadcast %66 : vector<2x1x32xf32> to vector<2x8x32xf32>
    %68 = arith.subf %56, %67 : vector<2x8x32xf32>
    %69 = math.absf %68 : vector<2x8x32xf32>
    %70 = vector.shape_cast %44 : vector<2x32xf32> to vector<2x1x32xf32>
    "tpu.trace_start"() <{level = 10 : i32, message = "bqd,bld->bql"}> : () -> ()
    %cst_40 = arith.constant dense<0.000000e+00> : vector<2x1x8xf32>
    %71 = tpu.matmul %70, %69, %cst_40 {dimension_numbers = #tpu.dot_dimension_numbers<[2], [2], [1], [1], [0, 0, 0, 1, 1, 1], [0], [0]>} : vector<2x1x32xf32>, vector<2x8x32xf32>, vector<2x1x8xf32> -> vector<2x1x8xf32>
    "tpu.trace_stop"() : () -> ()
    %72 = vector.shape_cast %71 : vector<2x1x8xf32> to vector<2x8xf32>
    %73 = vector.broadcast %60 : vector<2x1xf32> to vector<2x8xf32>
    %74 = arith.addf %51, %73 : vector<2x8xf32>
    %75 = arith.addf %74, %65 : vector<2x8xf32>
    %76 = arith.addf %75, %72 : vector<2x8xf32>
    %77 = arith.addf %76, %5 : vector<2x8xf32>
    %cst_41 = arith.constant dense<0xFF800000> : vector<2xf32>
    %78 = vector.multi_reduction <maximumf>, %77, %cst_41 [1] : vector<2x8xf32> to vector<2xf32>
    %79 = vector.shape_cast %78 : vector<2xf32> to vector<2x1xf32>
    %80 = vector.broadcast %79 : vector<2x1xf32> to vector<2x8xf32>
    %81 = arith.subf %77, %80 : vector<2x8xf32>
    %82 = math.exp %81 : vector<2x8xf32>
    %cst_42 = arith.constant dense<0.000000e+00> : vector<2xf32>
    %83 = vector.multi_reduction <add>, %82, %cst_42 [1] : vector<2x8xf32> to vector<2xf32>
    %84 = vector.shape_cast %83 : vector<2xf32> to vector<2x1xf32>
    %85 = tpu.reciprocal %84 {approx = true} : vector<2x1xf32> -> vector<2x1xf32>
    %86 = vector.broadcast %85 : vector<2x1xf32> to vector<2x8xf32>
    %87 = arith.mulf %82, %86 : vector<2x8xf32>
    %88 = vector.shape_cast %87 : vector<2x8xf32> to vector<2x1x8xf32>
    "tpu.trace_start"() <{level = 10 : i32, message = "bql,bld->bqd"}> : () -> ()
    %cst_43 = arith.constant dense<0.000000e+00> : vector<2x1x32xf32>
    %89 = tpu.matmul %88, %56, %cst_43 {dimension_numbers = #tpu.dot_dimension_numbers<[2], [1], [1], [2], [0, 0, 0, 1, 1, 2], [0], [0]>} : vector<2x1x8xf32>, vector<2x8x32xf32>, vector<2x1x32xf32> -> vector<2x1x32xf32>
    "tpu.trace_stop"() : () -> ()
    %90 = vector.shape_cast %89 : vector<2x1x32xf32> to vector<2x32xf32>
    %cst_44 = arith.constant dense<0.000000e+00> : vector<2x96xf32>
    %91 = tpu.matmul %90, %52, %cst_44 {dimension_numbers = #tpu.dot_dimension_numbers<[1], [0], [0], [1], [0, 0, 1, 1], [], []>} : vector<2x32xf32>, vector<32x96xf32>, vector<2x96xf32> -> vector<2x96xf32>
    %92 = vector.broadcast %54 : vector<1x96xf32> to vector<2x96xf32>
    %93 = arith.addf %91, %92 : vector<2x96xf32>
    %cst_45 = arith.constant dense<0.000000e+00> : vector<2x96xf32>
    %94 = tpu.matmul %35, %53, %cst_45 {dimension_numbers = #tpu.dot_dimension_numbers<[1], [0], [0], [1], [0, 0, 1, 1], [], []>} : vector<2x32xf32>, vector<32x96xf32>, vector<2x96xf32> -> vector<2x96xf32>
    %95 = vector.broadcast %55 : vector<1x96xf32> to vector<2x96xf32>
    %96 = arith.addf %94, %95 : vector<2x96xf32>
    %97 = vector.extract_strided_slice %93 {offsets = [0, 0], sizes = [2, 32], strides = [1, 1]} : vector<2x96xf32> to vector<2x32xf32>
    %98 = vector.extract_strided_slice %96 {offsets = [0, 0], sizes = [2, 32], strides = [1, 1]} : vector<2x96xf32> to vector<2x32xf32>
    %99 = arith.addf %97, %98 : vector<2x32xf32>
    %100 = arith.negf %99 : vector<2x32xf32>
    %101 = math.exp %100 : vector<2x32xf32>
    %cst_46 = arith.constant 1.000000e+00 : f32
    %102 = vector.broadcast %cst_46 : f32 to vector<2x32xf32>
    %103 = arith.addf %102, %101 : vector<2x32xf32>
    %104 = arith.divf %102, %103 : vector<2x32xf32>
    %105 = vector.extract_strided_slice %93 {offsets = [0, 32], sizes = [2, 32], strides = [1, 1]} : vector<2x96xf32> to vector<2x32xf32>
    %106 = vector.extract_strided_slice %96 {offsets = [0, 32], sizes = [2, 32], strides = [1, 1]} : vector<2x96xf32> to vector<2x32xf32>
    %107 = arith.addf %105, %106 : vector<2x32xf32>
    %108 = arith.negf %107 : vector<2x32xf32>
    %109 = math.exp %108 : vector<2x32xf32>
    %cst_47 = arith.constant 1.000000e+00 : f32
    %110 = vector.broadcast %cst_47 : f32 to vector<2x32xf32>
    %111 = arith.addf %110, %109 : vector<2x32xf32>
    %112 = arith.divf %110, %111 : vector<2x32xf32>
    %113 = vector.extract_strided_slice %93 {offsets = [0, 64], sizes = [2, 32], strides = [1, 1]} : vector<2x96xf32> to vector<2x32xf32>
    %114 = vector.extract_strided_slice %96 {offsets = [0, 64], sizes = [2, 32], strides = [1, 1]} : vector<2x96xf32> to vector<2x32xf32>
    %115 = arith.mulf %104, %114 : vector<2x32xf32>
    %116 = arith.addf %113, %115 : vector<2x32xf32>
    %117 = math.tanh %116 : vector<2x32xf32>
    %cst_48 = arith.constant 1.000000e+00 : f32
    %118 = vector.broadcast %cst_48 : f32 to vector<2x32xf32>
    %119 = arith.subf %118, %112 : vector<2x32xf32>
    %120 = arith.mulf %119, %117 : vector<2x32xf32>
    %121 = arith.mulf %112, %35 : vector<2x32xf32>
    %122 = arith.addf %120, %121 : vector<2x32xf32>
    %c1_i32 = arith.constant 1 : i32
    %c0_49 = arith.constant 0 : index
    %c0_50 = arith.constant 0 : index
    %c0_51 = arith.constant 0 : index
    %123 = vector.load %arg1[%c0_49, %c0_50, %c0_51] : memref<2x8x32xf32, #tpu.memory_space<vmem>>, vector<2x8x32xf32>
    %124 = vector.broadcast %37 : vector<1x32xf32> to vector<2x32xf32>
    %125 = arith.mulf %122, %124 : vector<2x32xf32>
    %cst_52 = arith.constant dense<0.000000e+00> : vector<2xf32>
    %126 = vector.multi_reduction <add>, %125, %cst_52 [1] : vector<2x32xf32> to vector<2xf32>
    %127 = vector.shape_cast %126 : vector<2xf32> to vector<2x1xf32>
    %128 = vector.broadcast %38 : vector<1x32xf32> to vector<2x32xf32>
    %129 = arith.mulf %122, %128 : vector<2x32xf32>
    %130 = vector.shape_cast %129 : vector<2x32xf32> to vector<2x1x32xf32>
    "tpu.trace_start"() <{level = 10 : i32, message = "bqd,bld->bql"}> : () -> ()
    %cst_53 = arith.constant dense<0.000000e+00> : vector<2x1x8xf32>
    %131 = tpu.matmul %130, %123, %cst_53 {dimension_numbers = #tpu.dot_dimension_numbers<[2], [2], [1], [1], [0, 0, 0, 1, 1, 1], [0], [0]>} : vector<2x1x32xf32>, vector<2x8x32xf32>, vector<2x1x8xf32> -> vector<2x1x8xf32>
    "tpu.trace_stop"() : () -> ()
    %132 = vector.shape_cast %131 : vector<2x1x8xf32> to vector<2x8xf32>
    %133 = vector.shape_cast %122 : vector<2x32xf32> to vector<2x1x32xf32>
    %134 = vector.broadcast %133 : vector<2x1x32xf32> to vector<2x8x32xf32>
    %135 = arith.subf %123, %134 : vector<2x8x32xf32>
    %136 = math.absf %135 : vector<2x8x32xf32>
    %137 = vector.shape_cast %44 : vector<2x32xf32> to vector<2x1x32xf32>
    "tpu.trace_start"() <{level = 10 : i32, message = "bqd,bld->bql"}> : () -> ()
    %cst_54 = arith.constant dense<0.000000e+00> : vector<2x1x8xf32>
    %138 = tpu.matmul %137, %136, %cst_54 {dimension_numbers = #tpu.dot_dimension_numbers<[2], [2], [1], [1], [0, 0, 0, 1, 1, 1], [0], [0]>} : vector<2x1x32xf32>, vector<2x8x32xf32>, vector<2x1x8xf32> -> vector<2x1x8xf32>
    "tpu.trace_stop"() : () -> ()
    %139 = vector.shape_cast %138 : vector<2x1x8xf32> to vector<2x8xf32>
    %140 = vector.broadcast %127 : vector<2x1xf32> to vector<2x8xf32>
    %141 = arith.addf %51, %140 : vector<2x8xf32>
    %142 = arith.addf %141, %132 : vector<2x8xf32>
    %143 = arith.addf %142, %139 : vector<2x8xf32>
    %144 = arith.addf %143, %5 : vector<2x8xf32>
    %cst_55 = arith.constant dense<0xFF800000> : vector<2xf32>
    %145 = vector.multi_reduction <maximumf>, %144, %cst_55 [1] : vector<2x8xf32> to vector<2xf32>
    %146 = vector.shape_cast %145 : vector<2xf32> to vector<2x1xf32>
    %147 = vector.broadcast %146 : vector<2x1xf32> to vector<2x8xf32>
    %148 = arith.subf %144, %147 : vector<2x8xf32>
    %149 = math.exp %148 : vector<2x8xf32>
    %cst_56 = arith.constant dense<0.000000e+00> : vector<2xf32>
    %150 = vector.multi_reduction <add>, %149, %cst_56 [1] : vector<2x8xf32> to vector<2xf32>
    %151 = vector.shape_cast %150 : vector<2xf32> to vector<2x1xf32>
    %152 = tpu.reciprocal %151 {approx = true} : vector<2x1xf32> -> vector<2x1xf32>
    %153 = vector.broadcast %152 : vector<2x1xf32> to vector<2x8xf32>
    %154 = arith.mulf %149, %153 : vector<2x8xf32>
    %155 = vector.shape_cast %154 : vector<2x8xf32> to vector<2x1x8xf32>
    "tpu.trace_start"() <{level = 10 : i32, message = "bql,bld->bqd"}> : () -> ()
    %cst_57 = arith.constant dense<0.000000e+00> : vector<2x1x32xf32>
    %156 = tpu.matmul %155, %123, %cst_57 {dimension_numbers = #tpu.dot_dimension_numbers<[2], [1], [1], [2], [0, 0, 0, 1, 1, 2], [0], [0]>} : vector<2x1x8xf32>, vector<2x8x32xf32>, vector<2x1x32xf32> -> vector<2x1x32xf32>
    "tpu.trace_stop"() : () -> ()
    %157 = vector.shape_cast %156 : vector<2x1x32xf32> to vector<2x32xf32>
    %cst_58 = arith.constant dense<0.000000e+00> : vector<2x96xf32>
    %158 = tpu.matmul %157, %52, %cst_58 {dimension_numbers = #tpu.dot_dimension_numbers<[1], [0], [0], [1], [0, 0, 1, 1], [], []>} : vector<2x32xf32>, vector<32x96xf32>, vector<2x96xf32> -> vector<2x96xf32>
    %159 = vector.broadcast %54 : vector<1x96xf32> to vector<2x96xf32>
    %160 = arith.addf %158, %159 : vector<2x96xf32>
    %cst_59 = arith.constant dense<0.000000e+00> : vector<2x96xf32>
    %161 = tpu.matmul %122, %53, %cst_59 {dimension_numbers = #tpu.dot_dimension_numbers<[1], [0], [0], [1], [0, 0, 1, 1], [], []>} : vector<2x32xf32>, vector<32x96xf32>, vector<2x96xf32> -> vector<2x96xf32>
    %162 = vector.broadcast %55 : vector<1x96xf32> to vector<2x96xf32>
    %163 = arith.addf %161, %162 : vector<2x96xf32>
    %164 = vector.extract_strided_slice %160 {offsets = [0, 0], sizes = [2, 32], strides = [1, 1]} : vector<2x96xf32> to vector<2x32xf32>
    %165 = vector.extract_strided_slice %163 {offsets = [0, 0], sizes = [2, 32], strides = [1, 1]} : vector<2x96xf32> to vector<2x32xf32>
    %166 = arith.addf %164, %165 : vector<2x32xf32>
    %167 = arith.negf %166 : vector<2x32xf32>
    %168 = math.exp %167 : vector<2x32xf32>
    %cst_60 = arith.constant 1.000000e+00 : f32
    %169 = vector.broadcast %cst_60 : f32 to vector<2x32xf32>
    %170 = arith.addf %169, %168 : vector<2x32xf32>
    %171 = arith.divf %169, %170 : vector<2x32xf32>
    %172 = vector.extract_strided_slice %160 {offsets = [0, 32], sizes = [2, 32], strides = [1, 1]} : vector<2x96xf32> to vector<2x32xf32>
    %173 = vector.extract_strided_slice %163 {offsets = [0, 32], sizes = [2, 32], strides = [1, 1]} : vector<2x96xf32> to vector<2x32xf32>
    %174 = arith.addf %172, %173 : vector<2x32xf32>
    %175 = arith.negf %174 : vector<2x32xf32>
    %176 = math.exp %175 : vector<2x32xf32>
    %cst_61 = arith.constant 1.000000e+00 : f32
    %177 = vector.broadcast %cst_61 : f32 to vector<2x32xf32>
    %178 = arith.addf %177, %176 : vector<2x32xf32>
    %179 = arith.divf %177, %178 : vector<2x32xf32>
    %180 = vector.extract_strided_slice %160 {offsets = [0, 64], sizes = [2, 32], strides = [1, 1]} : vector<2x96xf32> to vector<2x32xf32>
    %181 = vector.extract_strided_slice %163 {offsets = [0, 64], sizes = [2, 32], strides = [1, 1]} : vector<2x96xf32> to vector<2x32xf32>
    %182 = arith.mulf %171, %181 : vector<2x32xf32>
    %183 = arith.addf %180, %182 : vector<2x32xf32>
    %184 = math.tanh %183 : vector<2x32xf32>
    %cst_62 = arith.constant 1.000000e+00 : f32
    %185 = vector.broadcast %cst_62 : f32 to vector<2x32xf32>
    %186 = arith.subf %185, %179 : vector<2x32xf32>
    %187 = arith.mulf %186, %184 : vector<2x32xf32>
    %188 = arith.mulf %179, %122 : vector<2x32xf32>
    %189 = arith.addf %187, %188 : vector<2x32xf32>
    %c2_i32 = arith.constant 2 : i32
    %c0_63 = arith.constant 0 : index
    %c0_64 = arith.constant 0 : index
    %c0_65 = arith.constant 0 : index
    %190 = vector.load %arg1[%c0_63, %c0_64, %c0_65] : memref<2x8x32xf32, #tpu.memory_space<vmem>>, vector<2x8x32xf32>
    %191 = vector.broadcast %37 : vector<1x32xf32> to vector<2x32xf32>
    %192 = arith.mulf %189, %191 : vector<2x32xf32>
    %cst_66 = arith.constant dense<0.000000e+00> : vector<2xf32>
    %193 = vector.multi_reduction <add>, %192, %cst_66 [1] : vector<2x32xf32> to vector<2xf32>
    %194 = vector.shape_cast %193 : vector<2xf32> to vector<2x1xf32>
    %195 = vector.broadcast %38 : vector<1x32xf32> to vector<2x32xf32>
    %196 = arith.mulf %189, %195 : vector<2x32xf32>
    %197 = vector.shape_cast %196 : vector<2x32xf32> to vector<2x1x32xf32>
    "tpu.trace_start"() <{level = 10 : i32, message = "bqd,bld->bql"}> : () -> ()
    %cst_67 = arith.constant dense<0.000000e+00> : vector<2x1x8xf32>
    %198 = tpu.matmul %197, %190, %cst_67 {dimension_numbers = #tpu.dot_dimension_numbers<[2], [2], [1], [1], [0, 0, 0, 1, 1, 1], [0], [0]>} : vector<2x1x32xf32>, vector<2x8x32xf32>, vector<2x1x8xf32> -> vector<2x1x8xf32>
    "tpu.trace_stop"() : () -> ()
    %199 = vector.shape_cast %198 : vector<2x1x8xf32> to vector<2x8xf32>
    %200 = vector.shape_cast %189 : vector<2x32xf32> to vector<2x1x32xf32>
    %201 = vector.broadcast %200 : vector<2x1x32xf32> to vector<2x8x32xf32>
    %202 = arith.subf %190, %201 : vector<2x8x32xf32>
    %203 = math.absf %202 : vector<2x8x32xf32>
    %204 = vector.shape_cast %44 : vector<2x32xf32> to vector<2x1x32xf32>
    "tpu.trace_start"() <{level = 10 : i32, message = "bqd,bld->bql"}> : () -> ()
    %cst_68 = arith.constant dense<0.000000e+00> : vector<2x1x8xf32>
    %205 = tpu.matmul %204, %203, %cst_68 {dimension_numbers = #tpu.dot_dimension_numbers<[2], [2], [1], [1], [0, 0, 0, 1, 1, 1], [0], [0]>} : vector<2x1x32xf32>, vector<2x8x32xf32>, vector<2x1x8xf32> -> vector<2x1x8xf32>
    "tpu.trace_stop"() : () -> ()
    %206 = vector.shape_cast %205 : vector<2x1x8xf32> to vector<2x8xf32>
    %207 = vector.broadcast %194 : vector<2x1xf32> to vector<2x8xf32>
    %208 = arith.addf %51, %207 : vector<2x8xf32>
    %209 = arith.addf %208, %199 : vector<2x8xf32>
    %210 = arith.addf %209, %206 : vector<2x8xf32>
    %211 = arith.addf %210, %5 : vector<2x8xf32>
    %cst_69 = arith.constant dense<0xFF800000> : vector<2xf32>
    %212 = vector.multi_reduction <maximumf>, %211, %cst_69 [1] : vector<2x8xf32> to vector<2xf32>
    %213 = vector.shape_cast %212 : vector<2xf32> to vector<2x1xf32>
    %214 = vector.broadcast %213 : vector<2x1xf32> to vector<2x8xf32>
    %215 = arith.subf %211, %214 : vector<2x8xf32>
    %216 = math.exp %215 : vector<2x8xf32>
    %cst_70 = arith.constant dense<0.000000e+00> : vector<2xf32>
    %217 = vector.multi_reduction <add>, %216, %cst_70 [1] : vector<2x8xf32> to vector<2xf32>
    %218 = vector.shape_cast %217 : vector<2xf32> to vector<2x1xf32>
    %219 = tpu.reciprocal %218 {approx = true} : vector<2x1xf32> -> vector<2x1xf32>
    %220 = vector.broadcast %219 : vector<2x1xf32> to vector<2x8xf32>
    %221 = arith.mulf %216, %220 : vector<2x8xf32>
    %222 = vector.shape_cast %221 : vector<2x8xf32> to vector<2x1x8xf32>
    "tpu.trace_start"() <{level = 10 : i32, message = "bql,bld->bqd"}> : () -> ()
    %cst_71 = arith.constant dense<0.000000e+00> : vector<2x1x32xf32>
    %223 = tpu.matmul %222, %190, %cst_71 {dimension_numbers = #tpu.dot_dimension_numbers<[2], [1], [1], [2], [0, 0, 0, 1, 1, 2], [0], [0]>} : vector<2x1x8xf32>, vector<2x8x32xf32>, vector<2x1x32xf32> -> vector<2x1x32xf32>
    "tpu.trace_stop"() : () -> ()
    %224 = vector.shape_cast %223 : vector<2x1x32xf32> to vector<2x32xf32>
    %cst_72 = arith.constant dense<0.000000e+00> : vector<2x96xf32>
    %225 = tpu.matmul %224, %52, %cst_72 {dimension_numbers = #tpu.dot_dimension_numbers<[1], [0], [0], [1], [0, 0, 1, 1], [], []>} : vector<2x32xf32>, vector<32x96xf32>, vector<2x96xf32> -> vector<2x96xf32>
    %226 = vector.broadcast %54 : vector<1x96xf32> to vector<2x96xf32>
    %227 = arith.addf %225, %226 : vector<2x96xf32>
    %cst_73 = arith.constant dense<0.000000e+00> : vector<2x96xf32>
    %228 = tpu.matmul %189, %53, %cst_73 {dimension_numbers = #tpu.dot_dimension_numbers<[1], [0], [0], [1], [0, 0, 1, 1], [], []>} : vector<2x32xf32>, vector<32x96xf32>, vector<2x96xf32> -> vector<2x96xf32>
    %229 = vector.broadcast %55 : vector<1x96xf32> to vector<2x96xf32>
    %230 = arith.addf %228, %229 : vector<2x96xf32>
    %231 = vector.extract_strided_slice %227 {offsets = [0, 0], sizes = [2, 32], strides = [1, 1]} : vector<2x96xf32> to vector<2x32xf32>
    %232 = vector.extract_strided_slice %230 {offsets = [0, 0], sizes = [2, 32], strides = [1, 1]} : vector<2x96xf32> to vector<2x32xf32>
    %233 = arith.addf %231, %232 : vector<2x32xf32>
    %234 = arith.negf %233 : vector<2x32xf32>
    %235 = math.exp %234 : vector<2x32xf32>
    %cst_74 = arith.constant 1.000000e+00 : f32
    %236 = vector.broadcast %cst_74 : f32 to vector<2x32xf32>
    %237 = arith.addf %236, %235 : vector<2x32xf32>
    %238 = arith.divf %236, %237 : vector<2x32xf32>
    %239 = vector.extract_strided_slice %227 {offsets = [0, 32], sizes = [2, 32], strides = [1, 1]} : vector<2x96xf32> to vector<2x32xf32>
    %240 = vector.extract_strided_slice %230 {offsets = [0, 32], sizes = [2, 32], strides = [1, 1]} : vector<2x96xf32> to vector<2x32xf32>
    %241 = arith.addf %239, %240 : vector<2x32xf32>
    %242 = arith.negf %241 : vector<2x32xf32>
    %243 = math.exp %242 : vector<2x32xf32>
    %cst_75 = arith.constant 1.000000e+00 : f32
    %244 = vector.broadcast %cst_75 : f32 to vector<2x32xf32>
    %245 = arith.addf %244, %243 : vector<2x32xf32>
    %246 = arith.divf %244, %245 : vector<2x32xf32>
    %247 = vector.extract_strided_slice %227 {offsets = [0, 64], sizes = [2, 32], strides = [1, 1]} : vector<2x96xf32> to vector<2x32xf32>
    %248 = vector.extract_strided_slice %230 {offsets = [0, 64], sizes = [2, 32], strides = [1, 1]} : vector<2x96xf32> to vector<2x32xf32>
    %249 = arith.mulf %238, %248 : vector<2x32xf32>
    %250 = arith.addf %247, %249 : vector<2x32xf32>
    %251 = math.tanh %250 : vector<2x32xf32>
    %cst_76 = arith.constant 1.000000e+00 : f32
    %252 = vector.broadcast %cst_76 : f32 to vector<2x32xf32>
    %253 = arith.subf %252, %246 : vector<2x32xf32>
    %254 = arith.mulf %253, %251 : vector<2x32xf32>
    %255 = arith.mulf %246, %189 : vector<2x32xf32>
    %256 = arith.addf %254, %255 : vector<2x32xf32>
    %c3_i32 = arith.constant 3 : i32
    %c0_77 = arith.constant 0 : index
    %c0_78 = arith.constant 0 : index
    %c0_79 = arith.constant 0 : index
    %257 = vector.load %arg1[%c0_77, %c0_78, %c0_79] : memref<2x8x32xf32, #tpu.memory_space<vmem>>, vector<2x8x32xf32>
    %258 = vector.broadcast %37 : vector<1x32xf32> to vector<2x32xf32>
    %259 = arith.mulf %256, %258 : vector<2x32xf32>
    %cst_80 = arith.constant dense<0.000000e+00> : vector<2xf32>
    %260 = vector.multi_reduction <add>, %259, %cst_80 [1] : vector<2x32xf32> to vector<2xf32>
    %261 = vector.shape_cast %260 : vector<2xf32> to vector<2x1xf32>
    %262 = vector.broadcast %38 : vector<1x32xf32> to vector<2x32xf32>
    %263 = arith.mulf %256, %262 : vector<2x32xf32>
    %264 = vector.shape_cast %263 : vector<2x32xf32> to vector<2x1x32xf32>
    "tpu.trace_start"() <{level = 10 : i32, message = "bqd,bld->bql"}> : () -> ()
    %cst_81 = arith.constant dense<0.000000e+00> : vector<2x1x8xf32>
    %265 = tpu.matmul %264, %257, %cst_81 {dimension_numbers = #tpu.dot_dimension_numbers<[2], [2], [1], [1], [0, 0, 0, 1, 1, 1], [0], [0]>} : vector<2x1x32xf32>, vector<2x8x32xf32>, vector<2x1x8xf32> -> vector<2x1x8xf32>
    "tpu.trace_stop"() : () -> ()
    %266 = vector.shape_cast %265 : vector<2x1x8xf32> to vector<2x8xf32>
    %267 = vector.shape_cast %256 : vector<2x32xf32> to vector<2x1x32xf32>
    %268 = vector.broadcast %267 : vector<2x1x32xf32> to vector<2x8x32xf32>
    %269 = arith.subf %257, %268 : vector<2x8x32xf32>
    %270 = math.absf %269 : vector<2x8x32xf32>
    %271 = vector.shape_cast %44 : vector<2x32xf32> to vector<2x1x32xf32>
    "tpu.trace_start"() <{level = 10 : i32, message = "bqd,bld->bql"}> : () -> ()
    %cst_82 = arith.constant dense<0.000000e+00> : vector<2x1x8xf32>
    %272 = tpu.matmul %271, %270, %cst_82 {dimension_numbers = #tpu.dot_dimension_numbers<[2], [2], [1], [1], [0, 0, 0, 1, 1, 1], [0], [0]>} : vector<2x1x32xf32>, vector<2x8x32xf32>, vector<2x1x8xf32> -> vector<2x1x8xf32>
    "tpu.trace_stop"() : () -> ()
    %273 = vector.shape_cast %272 : vector<2x1x8xf32> to vector<2x8xf32>
    %274 = vector.broadcast %261 : vector<2x1xf32> to vector<2x8xf32>
    %275 = arith.addf %51, %274 : vector<2x8xf32>
    %276 = arith.addf %275, %266 : vector<2x8xf32>
    %277 = arith.addf %276, %273 : vector<2x8xf32>
    %278 = arith.addf %277, %5 : vector<2x8xf32>
    %cst_83 = arith.constant dense<0xFF800000> : vector<2xf32>
    %279 = vector.multi_reduction <maximumf>, %278, %cst_83 [1] : vector<2x8xf32> to vector<2xf32>
    %280 = vector.shape_cast %279 : vector<2xf32> to vector<2x1xf32>
    %281 = vector.broadcast %280 : vector<2x1xf32> to vector<2x8xf32>
    %282 = arith.subf %278, %281 : vector<2x8xf32>
    %283 = math.exp %282 : vector<2x8xf32>
    %cst_84 = arith.constant dense<0.000000e+00> : vector<2xf32>
    %284 = vector.multi_reduction <add>, %283, %cst_84 [1] : vector<2x8xf32> to vector<2xf32>
    %285 = vector.shape_cast %284 : vector<2xf32> to vector<2x1xf32>
    %286 = tpu.reciprocal %285 {approx = true} : vector<2x1xf32> -> vector<2x1xf32>
    %287 = vector.broadcast %286 : vector<2x1xf32> to vector<2x8xf32>
    %288 = arith.mulf %283, %287 : vector<2x8xf32>
    %289 = vector.shape_cast %288 : vector<2x8xf32> to vector<2x1x8xf32>
    "tpu.trace_start"() <{level = 10 : i32, message = "bql,bld->bqd"}> : () -> ()
    %cst_85 = arith.constant dense<0.000000e+00> : vector<2x1x32xf32>
    %290 = tpu.matmul %289, %257, %cst_85 {dimension_numbers = #tpu.dot_dimension_numbers<[2], [1], [1], [2], [0, 0, 0, 1, 1, 2], [0], [0]>} : vector<2x1x8xf32>, vector<2x8x32xf32>, vector<2x1x32xf32> -> vector<2x1x32xf32>
    "tpu.trace_stop"() : () -> ()
    %291 = vector.shape_cast %290 : vector<2x1x32xf32> to vector<2x32xf32>
    %cst_86 = arith.constant dense<0.000000e+00> : vector<2x96xf32>
    %292 = tpu.matmul %291, %52, %cst_86 {dimension_numbers = #tpu.dot_dimension_numbers<[1], [0], [0], [1], [0, 0, 1, 1], [], []>} : vector<2x32xf32>, vector<32x96xf32>, vector<2x96xf32> -> vector<2x96xf32>
    %293 = vector.broadcast %54 : vector<1x96xf32> to vector<2x96xf32>
    %294 = arith.addf %292, %293 : vector<2x96xf32>
    %cst_87 = arith.constant dense<0.000000e+00> : vector<2x96xf32>
    %295 = tpu.matmul %256, %53, %cst_87 {dimension_numbers = #tpu.dot_dimension_numbers<[1], [0], [0], [1], [0, 0, 1, 1], [], []>} : vector<2x32xf32>, vector<32x96xf32>, vector<2x96xf32> -> vector<2x96xf32>
    %296 = vector.broadcast %55 : vector<1x96xf32> to vector<2x96xf32>
    %297 = arith.addf %295, %296 : vector<2x96xf32>
    %298 = vector.extract_strided_slice %294 {offsets = [0, 0], sizes = [2, 32], strides = [1, 1]} : vector<2x96xf32> to vector<2x32xf32>
    %299 = vector.extract_strided_slice %297 {offsets = [0, 0], sizes = [2, 32], strides = [1, 1]} : vector<2x96xf32> to vector<2x32xf32>
    %300 = arith.addf %298, %299 : vector<2x32xf32>
    %301 = arith.negf %300 : vector<2x32xf32>
    %302 = math.exp %301 : vector<2x32xf32>
    %cst_88 = arith.constant 1.000000e+00 : f32
    %303 = vector.broadcast %cst_88 : f32 to vector<2x32xf32>
    %304 = arith.addf %303, %302 : vector<2x32xf32>
    %305 = arith.divf %303, %304 : vector<2x32xf32>
    %306 = vector.extract_strided_slice %294 {offsets = [0, 32], sizes = [2, 32], strides = [1, 1]} : vector<2x96xf32> to vector<2x32xf32>
    %307 = vector.extract_strided_slice %297 {offsets = [0, 32], sizes = [2, 32], strides = [1, 1]} : vector<2x96xf32> to vector<2x32xf32>
    %308 = arith.addf %306, %307 : vector<2x32xf32>
    %309 = arith.negf %308 : vector<2x32xf32>
    %310 = math.exp %309 : vector<2x32xf32>
    %cst_89 = arith.constant 1.000000e+00 : f32
    %311 = vector.broadcast %cst_89 : f32 to vector<2x32xf32>
    %312 = arith.addf %311, %310 : vector<2x32xf32>
    %313 = arith.divf %311, %312 : vector<2x32xf32>
    %314 = vector.extract_strided_slice %294 {offsets = [0, 64], sizes = [2, 32], strides = [1, 1]} : vector<2x96xf32> to vector<2x32xf32>
    %315 = vector.extract_strided_slice %297 {offsets = [0, 64], sizes = [2, 32], strides = [1, 1]} : vector<2x96xf32> to vector<2x32xf32>
    %316 = arith.mulf %305, %315 : vector<2x32xf32>
    %317 = arith.addf %314, %316 : vector<2x32xf32>
    %318 = math.tanh %317 : vector<2x32xf32>
    %cst_90 = arith.constant 1.000000e+00 : f32
    %319 = vector.broadcast %cst_90 : f32 to vector<2x32xf32>
    %320 = arith.subf %319, %313 : vector<2x32xf32>
    %321 = arith.mulf %320, %318 : vector<2x32xf32>
    %322 = arith.mulf %313, %256 : vector<2x32xf32>
    %323 = arith.addf %321, %322 : vector<2x32xf32>
    %c0_91 = arith.constant 0 : index
    %c0_92 = arith.constant 0 : index
    %c0_93 = arith.constant 0 : index
    %324 = vector.load %arg1[%c0_91, %c0_92, %c0_93] : memref<2x8x32xf32, #tpu.memory_space<vmem>>, vector<2x8x32xf32>
    %325 = vector.broadcast %37 : vector<1x32xf32> to vector<2x32xf32>
    %326 = arith.mulf %323, %325 : vector<2x32xf32>
    %cst_94 = arith.constant dense<0.000000e+00> : vector<2xf32>
    %327 = vector.multi_reduction <add>, %326, %cst_94 [1] : vector<2x32xf32> to vector<2xf32>
    %328 = vector.shape_cast %327 : vector<2xf32> to vector<2x1xf32>
    %329 = vector.broadcast %38 : vector<1x32xf32> to vector<2x32xf32>
    %330 = arith.mulf %323, %329 : vector<2x32xf32>
    %331 = vector.shape_cast %330 : vector<2x32xf32> to vector<2x1x32xf32>
    "tpu.trace_start"() <{level = 10 : i32, message = "bqd,bld->bql"}> : () -> ()
    %cst_95 = arith.constant dense<0.000000e+00> : vector<2x1x8xf32>
    %332 = tpu.matmul %331, %324, %cst_95 {dimension_numbers = #tpu.dot_dimension_numbers<[2], [2], [1], [1], [0, 0, 0, 1, 1, 1], [0], [0]>} : vector<2x1x32xf32>, vector<2x8x32xf32>, vector<2x1x8xf32> -> vector<2x1x8xf32>
    "tpu.trace_stop"() : () -> ()
    %333 = vector.shape_cast %332 : vector<2x1x8xf32> to vector<2x8xf32>
    %334 = vector.shape_cast %323 : vector<2x32xf32> to vector<2x1x32xf32>
    %335 = vector.broadcast %334 : vector<2x1x32xf32> to vector<2x8x32xf32>
    %336 = arith.subf %324, %335 : vector<2x8x32xf32>
    %337 = math.absf %336 : vector<2x8x32xf32>
    %338 = vector.shape_cast %44 : vector<2x32xf32> to vector<2x1x32xf32>
    "tpu.trace_start"() <{level = 10 : i32, message = "bqd,bld->bql"}> : () -> ()
    %cst_96 = arith.constant dense<0.000000e+00> : vector<2x1x8xf32>
    %339 = tpu.matmul %338, %337, %cst_96 {dimension_numbers = #tpu.dot_dimension_numbers<[2], [2], [1], [1], [0, 0, 0, 1, 1, 1], [0], [0]>} : vector<2x1x32xf32>, vector<2x8x32xf32>, vector<2x1x8xf32> -> vector<2x1x8xf32>
    "tpu.trace_stop"() : () -> ()
    %340 = vector.shape_cast %339 : vector<2x1x8xf32> to vector<2x8xf32>
    %341 = vector.broadcast %328 : vector<2x1xf32> to vector<2x8xf32>
    %342 = arith.addf %51, %341 : vector<2x8xf32>
    %343 = arith.addf %342, %333 : vector<2x8xf32>
    %344 = arith.addf %343, %340 : vector<2x8xf32>
    %345 = arith.addf %344, %5 : vector<2x8xf32>
    %cst_97 = arith.constant dense<0xFF800000> : vector<2xf32>
    %346 = vector.multi_reduction <maximumf>, %345, %cst_97 [1] : vector<2x8xf32> to vector<2xf32>
    %347 = vector.shape_cast %346 : vector<2xf32> to vector<2x1xf32>
    %348 = vector.broadcast %347 : vector<2x1xf32> to vector<2x8xf32>
    %349 = arith.subf %345, %348 : vector<2x8xf32>
    %350 = math.exp %349 : vector<2x8xf32>
    %cst_98 = arith.constant dense<0.000000e+00> : vector<2xf32>
    %351 = vector.multi_reduction <add>, %350, %cst_98 [1] : vector<2x8xf32> to vector<2xf32>
    %352 = vector.shape_cast %351 : vector<2xf32> to vector<2x1xf32>
    %353 = tpu.reciprocal %352 {approx = true} : vector<2x1xf32> -> vector<2x1xf32>
    %354 = vector.broadcast %353 : vector<2x1xf32> to vector<2x8xf32>
    %355 = arith.mulf %350, %354 : vector<2x8xf32>
    %356 = vector.shape_cast %355 : vector<2x8xf32> to vector<2x1x8xf32>
    "tpu.trace_start"() <{level = 10 : i32, message = "bql,bld->bqd"}> : () -> ()
    %cst_99 = arith.constant dense<0.000000e+00> : vector<2x1x32xf32>
    %357 = tpu.matmul %356, %324, %cst_99 {dimension_numbers = #tpu.dot_dimension_numbers<[2], [1], [1], [2], [0, 0, 0, 1, 1, 2], [0], [0]>} : vector<2x1x8xf32>, vector<2x8x32xf32>, vector<2x1x32xf32> -> vector<2x1x32xf32>
    "tpu.trace_stop"() : () -> ()
    %358 = vector.shape_cast %357 : vector<2x1x32xf32> to vector<2x32xf32>
    %c0_100 = arith.constant 0 : index
    %c0_101 = arith.constant 0 : index
    %359 = vector.load %arg9[%c0_100, %c0_101] : memref<64x128xf32, #tpu.memory_space<vmem>>, vector<64x128xf32>
    %360 = vector.extract_strided_slice %359 {offsets = [0, 0], sizes = [32, 128], strides = [1, 1]} : vector<64x128xf32> to vector<32x128xf32>
    %cst_102 = arith.constant dense<0.000000e+00> : vector<2x128xf32>
    %361 = tpu.matmul %358, %360, %cst_102 {dimension_numbers = #tpu.dot_dimension_numbers<[1], [0], [0], [1], [0, 0, 1, 1], [], []>} : vector<2x32xf32>, vector<32x128xf32>, vector<2x128xf32> -> vector<2x128xf32>
    %362 = vector.extract_strided_slice %359 {offsets = [32, 0], sizes = [32, 128], strides = [1, 1]} : vector<64x128xf32> to vector<32x128xf32>
    %cst_103 = arith.constant dense<0.000000e+00> : vector<2x128xf32>
    %363 = tpu.matmul %323, %362, %cst_103 {dimension_numbers = #tpu.dot_dimension_numbers<[1], [0], [0], [1], [0, 0, 1, 1], [], []>} : vector<2x32xf32>, vector<32x128xf32>, vector<2x128xf32> -> vector<2x128xf32>
    %364 = arith.addf %361, %363 : vector<2x128xf32>
    %c0_104 = arith.constant 0 : index
    %c0_105 = arith.constant 0 : index
    %365 = vector.load %arg10[%c0_104, %c0_105] : memref<1x128xf32, #tpu.memory_space<vmem>>, vector<1x128xf32>
    %366 = vector.broadcast %365 : vector<1x128xf32> to vector<2x128xf32>
    %367 = arith.addf %364, %366 : vector<2x128xf32>
    %c0_106 = arith.constant 0 : index
    %c0_107 = arith.constant 0 : index
    %368 = vector.load %arg15[%c0_106, %c0_107] : memref<2x128xf32, #tpu.memory_space<vmem>>, vector<2x128xf32>
    tpu.vector_store %arg15[%c0_106, %c0_107], %367 {strides = array<i32>} : memref<2x128xf32, #tpu.memory_space<vmem>>, vector<2x128xf32>,
    return
  }
  func.func @transform_0(%arg0: i32) -> (i32, i32, i32) {
    %c0_i32 = arith.constant 0 : i32
    %c0_i32_0 = arith.constant 0 : i32
    %c0_i32_1 = arith.constant 0 : i32
    return %arg0, %c0_i32, %c0_i32_0 : i32, i32, i32
  }
  func.func @transform_1(%arg0: i32) -> (i32, i32, i32) {
    %c0_i32 = arith.constant 0 : i32
    %c0_i32_0 = arith.constant 0 : i32
    %c0_i32_1 = arith.constant 0 : i32
    return %arg0, %c0_i32, %c0_i32_0 : i32, i32, i32
  }
  func.func @transform_2(%arg0: i32) -> (i32, i32) {
    %c0_i32 = arith.constant 0 : i32
    %c0_i32_0 = arith.constant 0 : i32
    return %arg0, %c0_i32 : i32, i32
  }
  func.func @transform_3(%arg0: i32) -> (i32, i32) {
    %c0_i32 = arith.constant 0 : i32
    %c0_i32_0 = arith.constant 0 : i32
    return %arg0, %c0_i32 : i32, i32
  }
  func.func @transform_4(%arg0: i32) -> (i32, i32) {
    %c0_i32 = arith.constant 0 : i32
    %c0_i32_0 = arith.constant 0 : i32
    %c0_i32_1 = arith.constant 0 : i32
    return %c0_i32, %c0_i32_0 : i32, i32
  }
  func.func @transform_5(%arg0: i32) -> (i32, i32) {
    %c0_i32 = arith.constant 0 : i32
    %c0_i32_0 = arith.constant 0 : i32
    %c0_i32_1 = arith.constant 0 : i32
    return %c0_i32, %c0_i32_0 : i32, i32
  }
  func.func @transform_6(%arg0: i32) -> (i32, i32) {
    %c0_i32 = arith.constant 0 : i32
    %c0_i32_0 = arith.constant 0 : i32
    %c0_i32_1 = arith.constant 0 : i32
    return %c0_i32, %c0_i32_0 : i32, i32
  }
  func.func @transform_7(%arg0: i32) -> (i32, i32) {
    %c0_i32 = arith.constant 0 : i32
    %c0_i32_0 = arith.constant 0 : i32
    %c0_i32_1 = arith.constant 0 : i32
    return %c0_i32, %c0_i32_0 : i32, i32
  }
  func.func @transform_8(%arg0: i32) -> (i32, i32) {
    %c0_i32 = arith.constant 0 : i32
    %c0_i32_0 = arith.constant 0 : i32
    %c0_i32_1 = arith.constant 0 : i32
    return %c0_i32, %c0_i32_0 : i32, i32
  }
  func.func @transform_9(%arg0: i32) -> (i32, i32) {
    %c0_i32 = arith.constant 0 : i32
    %c0_i32_0 = arith.constant 0 : i32
    %c0_i32_1 = arith.constant 0 : i32
    return %c0_i32, %c0_i32_0 : i32, i32
  }
  func.func @transform_10(%arg0: i32) -> (i32, i32) {
    %c0_i32 = arith.constant 0 : i32
    %c0_i32_0 = arith.constant 0 : i32
    %c0_i32_1 = arith.constant 0 : i32
    return %c0_i32, %c0_i32_0 : i32, i32
  }
  func.func @transform_11(%arg0: i32) -> (i32, i32) {
    %c0_i32 = arith.constant 0 : i32
    %c0_i32_0 = arith.constant 0 : i32
    %c0_i32_1 = arith.constant 0 : i32
    return %c0_i32, %c0_i32_0 : i32, i32
  }
  func.func @transform_12(%arg0: i32) -> (i32, i32) {
    %c0_i32 = arith.constant 0 : i32
    %c0_i32_0 = arith.constant 0 : i32
    %c0_i32_1 = arith.constant 0 : i32
    return %c0_i32, %c0_i32_0 : i32, i32
  }
  func.func @transform_13(%arg0: i32) -> (i32, i32) {
    %c0_i32 = arith.constant 0 : i32
    %c0_i32_0 = arith.constant 0 : i32
    %c0_i32_1 = arith.constant 0 : i32
    return %c0_i32, %c0_i32_0 : i32, i32
  }
  func.func @transform_14(%arg0: i32) -> (i32, i32) {
    %c0_i32 = arith.constant 0 : i32
    %c0_i32_0 = arith.constant 0 : i32
    return %arg0, %c0_i32 : i32, i32
  }
}

</mosaic_0001>

<bundles_post_ra>
// kernel: tpu_custom_call.1
= control target key start
LH: loop header
LB: loop body
LE: loop exit
PB: predicated region body
PF: predicated region fallthrough
CT: control target
= control target key end

     0   :  { %21 = vsyncpa [#allocation5], 0  ;;  %s5989_s0 = inlined_call_operand.hbm [shape: f32[2,8,32], index: 0, kind: input, shape index: {}]   ;;  %s5990_s1 = inlined_call_operand.hbm [shape: f32[2,8,32], index: 1, kind: input, shape index: {}]   ;;  %s5991_s2 = inlined_call_operand.hbm [shape: f32[2,8], index: 2, kind: input, shape index: {}]   ;;  %s5992_s3 = inlined_call_operand.hbm [shape: f32[2,8], index: 3, kind: input, shape index: {}]   ;;  %s5993_s4 = inlined_call_operand.vmem [shape: f32[1,32], index: 4, kind: input, shape index: {}]   ;;  %s5994_s5 = inlined_call_operand.<no memory space> [shape: f32[1,1], index: 5, kind: input, shape index: {}]   ;;  %s5995_s6 = inlined_call_operand.vmem [shape: f32[4,32], index: 6, kind: input, shape index: {}]   ;;  %s5996_s7 = inlined_call_operand.<no memory space> [shape: f32[1,1], index: 7, kind: input, shape index: {}]   ;;  %s5997_s8 = inlined_call_operand.hbm [shape: f32[64,128], index: 8, kind: input, shape index: {}]   ;;  %s5998_s9 = inlined_call_operand.hbm [shape: f32[1,128], index: 9, kind: input, shape index: {}]   ;;  %s5999_s10 = inlined_call_operand.vmem [shape: f32[32,96], index: 10, kind: input, shape index: {}]   ;;  %s6000_s11 = inlined_call_operand.hbm [shape: f32[32,96], index: 11, kind: input, shape index: {}]   ;;  %s6001_s12 = inlined_call_operand.vmem [shape: f32[1,96], index: 12, kind: input, shape index: {}]   ;;  %s6002_s13 = inlined_call_operand.vmem [shape: f32[1,96], index: 13, kind: input, shape index: {}]   ;;  %s6003_s14 = inlined_call_operand.hbm [shape: f32[2,128], index: 14, kind: output, shape index: {}]  }
   0x1   :  { %22 = vsyncpa [#allocation8], 0 }
   0x2   :  { %23 = vsyncpa [#allocation11], 0 }
   0x3   :  { %24 = vsyncpa [#allocation14], 0 }
   0x4   :  { %25 = vsyncpa [#allocation6], 0  ;;  %s5240_s29 = smov [#allocation7]   ;;  %s5241_s15 = smov [#allocation10]  }
   0x5   :  { %s43_s30 = sshll.u32 %s5240_s29, 4  ;;  %s66_s16 = sshll.u32 %s5241_s15, 4  ;;  %s44_s30 = int_to_ptr.vmem [resolvable:$true] %s43_s30  ;;  %s67_s16 = int_to_ptr.vmem [resolvable:$true] %s66_s16 }
   0x6   :  { %s5054_s19 = scalar_lea.hbm %s5990_s1, 256 }
   0x7   :  { %p5055_p0 = scmp.ne.s32.totalorder %s5990_s1, %s5054_s19  ;;  %p5058_p1 = scmp.lt.u32.totalorder %s5054_s19, %s5990_s1 }
   0x9   :  { %p5060_p2 = pnand %p5058_p1, %p5055_p0 }
   0xb   :  { %5063 = shalt.err (!%p5060_p2)
}
   0xc   :  { %s5064_s24 = scalar_lea.vmem %s44_s30, 256  ;;  %p5069_p4 = scmp.lt.s32.totalorder %s44_s30, %s44_s30 }
   0xd   :  { %p5065_p3 = scmp.ne.s32.totalorder %s44_s30, %s5064_s24  ;;  %p5070_p5 = scmp.lt.s32.totalorder %s5064_s24, %s5064_s24 }
   0xf   :  { %p5071_p6 = por %p5070_p5, %p5069_p4 }
  0x11   :  { %p5072_p7 = pnand %p5071_p6, %p5065_p3 }
  0x13   :  { %5075 = shalt.err (!%p5072_p7)
}
  0x14   :  { %s5242_s25 = smov 128   ;;  %s5243_s26 = smov 8  }
  0x15   :  { %49 = dma.hbm_to_vmem [thread:$0]  %s5990_s1, 256, %s44_s30, [#allocation8], %s5242_s25, %s5242_s25, %s5243_s26  }
  0x16   :  { %s5076_s17 = scalar_lea.hbm %s5992_s3, 32 }
  0x17   :  { %p5077_p8 = scmp.ne.s32.totalorder %s5992_s3, %s5076_s17  ;;  %p5080_p9 = scmp.lt.u32.totalorder %s5076_s17, %s5992_s3 }
  0x19   :  { %p5082_p10 = pnand %p5080_p9, %p5077_p8 }
  0x1b   :  { %5085 = shalt.err (!%p5082_p10)
}
  0x1c   :  { %s5086_s22 = scalar_lea.vmem %s67_s16, 32  ;;  %p5091_p12 = scmp.lt.s32.totalorder %s67_s16, %s67_s16 }
  0x1d   :  { %p5087_p11 = scmp.ne.s32.totalorder %s67_s16, %s5086_s22  ;;  %p5092_p13 = scmp.lt.s32.totalorder %s5086_s22, %s5086_s22 }
  0x1f   :  { %p5093_p0 = por %p5092_p13, %p5091_p12 }
  0x21   :  { %p5094_p1 = pnand %p5093_p0, %p5087_p11 }
  0x23   :  { %5097 = shalt.err (!%p5094_p1)
}
  0x24   :  { %69 = dma.hbm_to_vmem [thread:$0]  %s5992_s3, 32, %s67_s16, [#allocation11]  }
  0x25   :  { %s5244_s23 = smov [#allocation13]   ;;  %s5245_s27 = smov [#allocation4]  }
  0x26   :  { %s96_s24 = sshll.u32 %s5244_s23, 4  ;;  %s31_s28 = sshll.u32 %s5245_s27, 4  ;;  %s97_s24 = int_to_ptr.vmem [resolvable:$true] %s96_s24  ;;  %s5359_s28 = int_to_ptr.vmem [resolvable:$true] %s31_s28 }
  0x27   :  { %s5098_s17 = scalar_lea.hbm %s5998_s9, 16 }
  0x28   :  { %p5099_p2 = scmp.ne.s32.totalorder %s5998_s9, %s5098_s17  ;;  %p5102_p3 = scmp.lt.u32.totalorder %s5098_s17, %s5998_s9 }
  0x2a   :  { %p5104_p4 = pnand %p5102_p3, %p5099_p2 }
  0x2c   :  { %5107 = shalt.err (!%p5104_p4)
}
  0x2d   :  { %s5108_s3 = scalar_lea.vmem %s97_s24, 16  ;;  %s5112_s16 = scalar_lea.vmem %s97_s24, 32 }
  0x2e   :  { %p5109_p5 = scmp.ne.s32.totalorder %s97_s24, %s5108_s3  ;;  %p5113_p6 = scmp.lt.s32.totalorder %s97_s24, %s97_s24 }
  0x2f   :  { %p5114_p7 = scmp.lt.s32.totalorder %s5112_s16, %s5108_s3 }
  0x31   :  { %p5115_p8 = por %p5114_p7, %p5113_p6 }
  0x33   :  { %p5116_p9 = pnand %p5115_p8, %p5109_p5 }
  0x35   :  { %5119 = shalt.err (!%p5116_p9)
}
  0x36   :  { %99 = dma.hbm_to_vmem [thread:$0]  %s5998_s9, 16, %s97_s24, [#allocation14]  }
  0x37   :  { %s5120_s27 = scalar_lea.hbm %s5989_s0, 256 }
  0x38   :  { %p5121_p10 = scmp.ne.s32.totalorder %s5989_s0, %s5120_s27  ;;  %p5124_p11 = scmp.lt.u32.totalorder %s5120_s27, %s5989_s0 }
  0x3a   :  { %p5126_p12 = pnand %p5124_p11, %p5121_p10 }
  0x3c   :  { %5129 = shalt.err (!%p5126_p12)
}
  0x3d   :  { %s5130_s19 = scalar_lea.vmem %s5359_s28, 256  ;;  %p5135_p0 = scmp.lt.s32.totalorder %s5359_s28, %s5359_s28 }
  0x3e   :  { %p5131_p13 = scmp.ne.s32.totalorder %s5359_s28, %s5130_s19  ;;  %p5136_p1 = scmp.lt.s32.totalorder %s5130_s19, %s5130_s19 }
  0x40   :  { %p5137_p2 = por %p5136_p1, %p5135_p0 }
  0x42   :  { %p5138_p3 = pnand %p5137_p2, %p5131_p13 }
  0x44   :  { %5141 = shalt.err (!%p5138_p3)
}
  0x45   :  { %37 = dma.hbm_to_vmem [thread:$0]  %s5989_s0, 256, %s5359_s28, [#allocation5], %s5242_s25, %s5242_s25, %s5243_s26  }
  0x46   :  { %s5246_s20 = smov [#allocation9]   ;;  %s5247_s3 = smov [#allocation12]  }
  0x47   :  { %s56_s21 = sshll.u32 %s5246_s20, 4  ;;  %s83_s16 = sshll.u32 %s5247_s3, 4  ;;  %s57_s21 = int_to_ptr.vmem [resolvable:$true] %s56_s21  ;;  %s5393_s16 = int_to_ptr.vmem [resolvable:$true] %s83_s16 }
  0x48   :  { %s5142_s30 = scalar_lea.hbm %s5991_s2, 32 }
  0x49   :  { %p5143_p4 = scmp.ne.s32.totalorder %s5991_s2, %s5142_s30  ;;  %p5146_p5 = scmp.lt.u32.totalorder %s5142_s30, %s5991_s2 }
  0x4b   :  { %p5148_p6 = pnand %p5146_p5, %p5143_p4 }
  0x4d   :  { %5151 = shalt.err (!%p5148_p6)
}
  0x4e   :  { %s5152_s0 = scalar_lea.vmem %s57_s21, 32  ;;  %p5157_p8 = scmp.lt.s32.totalorder %s57_s21, %s57_s21 }
  0x4f   :  { %p5153_p7 = scmp.ne.s32.totalorder %s57_s21, %s5152_s0  ;;  %p5158_p9 = scmp.lt.s32.totalorder %s5152_s0, %s5152_s0 }
  0x51   :  { %p5159_p10 = por %p5158_p9, %p5157_p8 }
  0x53   :  { %p5160_p11 = pnand %p5159_p10, %p5153_p7 }
  0x55   :  { %5163 = shalt.err (!%p5160_p11)
}
  0x56   :  { %59 = dma.hbm_to_vmem [thread:$0]  %s5991_s2, 32, %s57_s21, [#allocation8]  }
  0x57   :  { %s5164_s9 = scalar_lea.hbm %s5997_s8, 1024 }
  0x58   :  { %p5165_p12 = scmp.ne.s32.totalorder %s5997_s8, %s5164_s9  ;;  %p5168_p13 = scmp.lt.u32.totalorder %s5164_s9, %s5997_s8 }
  0x5a   :  { %p5170_p0 = pnand %p5168_p13, %p5165_p12 }
  0x5c   :  { %5173 = shalt.err (!%p5170_p0)
}
  0x5d   :  { %s5174_s1 = scalar_lea.vmem %s5393_s16, 1024  ;;  %p5179_p2 = scmp.lt.s32.totalorder %s5393_s16, %s5393_s16 }
  0x5e   :  { %p5175_p1 = scmp.ne.s32.totalorder %s5393_s16, %s5174_s1  ;;  %p5180_p3 = scmp.lt.s32.totalorder %s5174_s1, %s5174_s1 }
  0x60   :  { %p5181_p4 = por %p5180_p3, %p5179_p2 }
  0x62   :  { %p5182_p5 = pnand %p5181_p4, %p5175_p1 }
  0x64   :  { %5185 = shalt.err (!%p5182_p5)
}
  0x65   :  { %89 = dma.hbm_to_vmem [thread:$0]  %s5997_s8, 1024, %s5393_s16, [#allocation11], %s5242_s25, %s5242_s25, %s5243_s26  }
  0x66   :  { %s5248_s30 = smov [#allocation15]   ;;  %s5186_s15 = scalar_lea.hbm %s6000_s11, 512 }
  0x67   :  { %s107_s23 = sshll.u32 %s5248_s30, 4  ;;  %p5187_p6 = scmp.ne.s32.totalorder %s6000_s11, %s5186_s15  ;;  %s108_s23 = int_to_ptr.vmem [resolvable:$true] %s107_s23 }
  0x68   :  { %p5190_p7 = scmp.lt.u32.totalorder %s5186_s15, %s6000_s11 }
  0x6a   :  { %p5192_p8 = pnand %p5190_p7, %p5187_p6 }
  0x6c   :  { %5195 = shalt.err (!%p5192_p8)
}
  0x6d   :  { %s5196_s19 = scalar_lea.vmem %s108_s23, 512  ;;  %p5201_p10 = scmp.lt.s32.totalorder %s108_s23, %s108_s23 }
  0x6e   :  { %p5197_p9 = scmp.ne.s32.totalorder %s108_s23, %s5196_s19  ;;  %p5202_p11 = scmp.lt.s32.totalorder %s5196_s19, %s5196_s19 }
  0x70   :  { %p5203_p12 = por %p5202_p11, %p5201_p10 }
  0x72   :  { %p5204_p13 = pnand %p5203_p12, %p5197_p9 }
  0x74   :  { %5207 = shalt.err (!%p5204_p13)
}
  0x75   :  { %113 = dma.hbm_to_vmem [thread:$0]  %s6000_s11, 512, %s108_s23, [#allocation14], %s5242_s25, %s5242_s25, %s5243_s26  }
  0x76   :  { %5230 = dma.done.wait [#allocation5], 256  }
  0x77   :  { %5231 = vsyncadd [#allocation5], 4294967040 }
  0x78   :  { %5232 = dma.done.wait [#allocation8], 288  }
  0x79   :  { %5233 = vsyncadd [#allocation8], 4294967008 }
  0x7a   :  { %5234 = dma.done.wait [#allocation11], 1056  }
  0x7b   :  { %5235 = vsyncadd [#allocation11], 4294966240 }
  0x7c   :  { %5236 = dma.done.wait [#allocation14], 528  }
  0x7d   :  { %5237 = vsyncadd [#allocation14], 4294966768  ;;  %v156_v0 = vlaneseq  ;;  %v5249_v1 = vmov 0.0   ;;  %vm5250_vm0 = vmmov 0   ;;  %v5251_v2 = vmov 1966171168  }
  0x7e   :  { %4630 = vmatprep.subr.mxu1 %v5249_v1  ;;  %4625 = vmatprep.subr.mxu0 %v5249_v1  ;;  %v154_v3 = vunpack.c.l.s4 %v5251_v2  ;;  %vm175_vm1 = vcmask 261120   ;;  %v146_v7 = vld [vmem:[#allocation7 + $0x8] sm:$0xff]  ;;  %v145_v8 = vld [vmem:[#allocation7] sm:$0xff]  ;;  %v4425_v9 = vld [vmem:[%s5993_s4] ss:$0 sm:$0xff]  ;;  %v327_v16 = vstv %s5994_s5  ;;  %vm339_vm3 = vcmask 1041409  }
  0x7f   :  { %4632 = vmatprep.mubr.msk.f32.mxu1 %vm5250_vm0, %v5249_v1  ;;  %4627 = vmatprep.mubr.msk.f32.mxu0 %vm5250_vm0, %v5249_v1  ;;  %v5448_v4 = vshrl.u32 %v156_v0, 7  ;;  %v142_v14 = vld [vmem:[#allocation10] sm:$0x3]  ;;  %vm342_vm4 = vcmask 58368   ;;  %vm371_vm5 = vcmask 64512   ;;  %v5482_v46 = vld [vmem:[#allocation4 + $0x8] sm:$0xff] }
  0x80   :  { %v155_v5 = vunpack.c.0.s8 %v154_v3  ;;  %4631 = vmatpush3.xpose.msk.msra.mxu1 %vm175_vm1, %v146_v7  ;;  %4626 = vmatpush3.xpose.msk.msra.mxu0 %vm175_vm1, %v145_v8  ;;  %vm143_vm2 = vcmp.gt.f32.partialorder %v142_v14, 0.0  ;;  %v5479_v44 = vld [vmem:[#allocation4] sm:$0xff]  ;;  %vm697_vm6 = vcmask 254976   ;;  %s5253_s27 = smov 64   ;;  %s5256_s0 = smov [#allocation16]  }
  0x81   :  { %4635 = vmatprep.subr.mxu0 %v5249_v1  ;;  %4640 = vmatprep.subr.mxu1 %v5249_v1  ;;  %v144_v15 = vsel %vm143_vm2, -inf, %v5249_v1  ;;  %v518_v47 = vld [vmem:[%s5995_s6] sm:$0xf]  ;;  %v703_v48 = vsub.s32 2, %v5448_v4  ;;  %v5514_v50 = vsub.s32 0, %v5448_v4  ;;  %v688_v51 = vsub.s32 1, %v5448_v4 }
  0x82   :  { %v5451_v6 = vsub.s32 %v155_v5, %v5448_v4  ;;  %v331_v18 = vrot.slane %v144_v15, 1  ;;  %s4413_s28 = sshll.u32 %s5256_s0, 4  ;;  %s4414_s28 = int_to_ptr.vmem [resolvable:$true] %s4413_s28 }
  0x83   :  { %v5511_v49 = vrot.slane %v518_v47, %v703_v48  ;;  %v5519_v57 = vrot.slane %v518_v47, %v688_v51  ;;  %s5208_s17 = scalar_lea.vmem %s4414_s28, 32  ;;  %p5213_p1 = scmp.lt.s32.totalorder %s4414_s28, %s4414_s28 }
  0x84   :  { %v159_v10 = vrot.slane %v4425_v9, %v5451_v6  ;;  %p5209_p0 = scmp.ne.s32.totalorder %s4414_s28, %s5208_s17  ;;  %p5214_p2 = scmp.lt.s32.totalorder %s5208_s17, %s5208_s17 }
  0x86   :  { %v160_v11 = vcombine.high %v159_v10, %v159_v10  ;;  %v167_v12 = vrot.slane %v159_v10, %v5451_v6  ;;  %p5215_p3 = por %p5214_p2, %p5213_p1 }
  0x88   :  { %v174_v13 = vrot.slane %v160_v11, %v5451_v6  ;;  %4628 = vmatmul.mubr.msk.f32.vlgmr.msra.gmra.mrb[0].mxu0 %vm175_vm1, %v167_v12  ;;  %p5216_p4 = pnand %p5215_p3, %p5209_p0 }
  0x89   :  { %4636 = vmatpush3.msra.mxu0 %v145_v8  ;;  %4637 = vmatprep.mubr.msk.f32.mxu0 %vm5250_vm0, %v5249_v1 }
  0x8a   :  { %4633 = vmatmul.mubr.msk.f32.vlgmr.msra.gmra.mrb[0].mxu1 %vm175_vm1, %v174_v13  ;;  %4645 = vmatprep.subr.mxu0 %v5249_v1 }
  0x8b   :  { %4641 = vmatpush3.msra.mxu1 %v146_v7  ;;  %4642 = vmatprep.mubr.msk.f32.mxu1 %vm5250_vm0, %v5249_v1  ;;  %v5533_v7 = vrot.slane %v518_v47, 3 }
  0x8c   :  { %4650 = vmatprep.subr.mxu1 %v5249_v1 }
 0x15b   :  { %v247_v17 = vpop.f32.mrb[0].mxu0 }
 0x15c   :  { %v328_v19 = vadd.f32 %v327_v16, %v247_v17  ;;  %v4629_v20 = vpop.f32.mrb[1].mxu0  ;;  %v139_v17 = vld [vmem:[#allocation9] sm:$0x3] }
 0x15d   :  { %v322_v21 = vpop.f32.mrb[0].mxu1  ;;  %vm140_vm7 = vcmp.gt.f32.partialorder %v139_v17, 0.0 }
 0x15e   :  { %v329_v22 = vadd.f32 %v327_v16, %v322_v21  ;;  %v4634_v23 = vpop.f32.mrb[1].mxu1  ;;  %v334_v25 = vadd.f32 %v328_v19, %v144_v15  ;;  %v671_v15 = vstv %s5996_s7 }
 0x160   :  { %v335_v24 = vadd.f32 %v331_v18, %v329_v22 }
 0x162   :  { %v338_v26 = vrot.slane %v335_v24, 7 }
 0x164   :  { %v340_v27 = vsel %vm339_vm3, %v338_v26, %v334_v25  ;;  %v5563_v26 = vsel %vm140_vm7, -inf, %v5249_v1 }
 0x165   :  { %v343_v28 = vsel %vm342_vm4, %v340_v27, -inf }
 0x166   :  { %344 = vmax.xlane.f32.xlu0 %v343_v28 }
 0x1f3   :  { %v345_v29 = vpop.xlane.xlu0 %344 }
 0x1f4   :  { %v347_v30 = vrot.slane %v345_v29, 1  ;;  %v350_v31 = vsub.f32 %v334_v25, %v345_v29 }
 0x1f6   :  { %v351_v32 = vsub.f32 %v335_v24, %v347_v30  ;;  %v352_v33 = vmul.f32 1.442695, %v350_v31 }
 0x1f8   :  { %v354_v34 = vmul.f32 1.442695, %v351_v32  ;;  %v5567_v32 = vrot.slane %v5563_v26, 1 }
 0x1fa   :  { %4992 = vpow2.f32 %v354_v34 }
 0x1fb   :  { %4994 = vpow2.f32 %v352_v33 }
 0x204   :  { %v4993_v35 = vpop.eup %4992 }
 0x205   :  { %v358_v36 = vrot.slane %v4993_v35, 7  ;;  %v4995_v37 = vpop.eup %4994 }
 0x207   :  { %v359_v38 = vsel %vm339_vm3, %v358_v36, %v4995_v37 }
 0x208   :  { %v361_v39 = vsel %vm342_vm4, %v359_v38, 0.0 }
 0x209   :  { %362 = vadd.xlane.f32.xlu0 %v361_v39 }
 0x296   :  { %v363_v40 = vpop.xlane.xlu0 %362 }
 0x297   :  { %4996 = vrcp.f32 %v363_v40 }
 0x2a1   :  { %v4997_v41 = vpop.eup %4996 }
 0x2a2   :  { %v366_v42 = vrot.slane %v4997_v41, 1  ;;  %v369_v43 = vmul.f32 %v4997_v41, %v4995_v37 }
 0x2a4   :  { %4638 = vmatmul.mubr.msk.f32.vlgmr.msra.gmra.mrb[2].mxu0 %vm371_vm5, %v369_v43  ;;  %v370_v45 = vmul.f32 %v4993_v35, %v366_v42 }
 0x2a5   :  { %4646 = vmatpush3.xpose.msk.msra.mxu0 %vm175_vm1, %v5479_v44  ;;  %4647 = vmatprep.mubr.msk.f32.mxu0 %vm5250_vm0, %v5249_v1 }
 0x2a6   :  { %4643 = vmatmul.mubr.msk.f32.vlgmr.msra.gmra.mrb[2].mxu1 %vm371_vm5, %v370_v45  ;;  %4655 = vmatprep.subr.mxu0 %v5249_v1 }
 0x2a7   :  { %4651 = vmatpush3.xpose.msk.msra.mxu1 %vm175_vm1, %v5482_v46  ;;  %4652 = vmatprep.mubr.msk.f32.mxu1 %vm5250_vm0, %v5249_v1 }
 0x2a8   :  { %4648 = vmatmul.mubr.msk.f32.vlgmr.msra.gmra.mrb[4].mxu0 %vm175_vm1, %v518_v47  ;;  %4660 = vmatprep.subr.mxu1 %v5249_v1 }
 0x2a9   :  { %4656 = vmatpush3.xpose.msk.msra.mxu0 %vm175_vm1, %v5479_v44  ;;  %4657 = vmatprep.mubr.msk.f32.mxu0 %vm5250_vm0, %v5249_v1 }
 0x2aa   :  { %4653 = vmatmul.mubr.msk.f32.vlgmr.msra.gmra.mrb[4].mxu1 %vm175_vm1, %v518_v47  ;;  %4665 = vmatprep.subr.mxu0 %v5249_v1 }
 0x2ab   :  { %4661 = vmatpush3.xpose.msk.msra.mxu1 %vm175_vm1, %v5482_v46  ;;  %4662 = vmatprep.mubr.msk.f32.mxu1 %vm5250_vm0, %v5249_v1 }
 0x2ac   :  { %4670 = vmatprep.subr.mxu1 %v5249_v1 }
 0x377   :  { %v441_v52 = vpop.f32.mrb[2].mxu0 }
 0x378   :  { %v705_v53 = vmul.f32 %v5511_v49, %v441_v52  ;;  %v862_v54 = vrot.slane %v441_v52, %v5514_v50  ;;  %v4639_v55 = vpop.f32.mrb[3].mxu0  ;;  %v690_v8 = vmul.f32 %v5519_v57, %v441_v52 }
 0x379   :  { %v514_v56 = vpop.f32.mrb[2].mxu1 }
 0x37a   :  { %v867_v58 = vsub.f32 %v5479_v44, %v862_v54  ;;  %v706_v59 = vmul.f32 %v5511_v49, %v514_v56  ;;  %v866_v60 = vrot.slane %v514_v56, %v5514_v50  ;;  %v1305_v61 = vrot.slane %v514_v56, 7  ;;  %v4644_v62 = vpop.f32.mrb[3].mxu1  ;;  %4658 = vmatmul.mubr.msk.f32.vlgmr.msra.gmra.mrb[6].mxu0 %vm175_vm1, %v705_v53 }
 0x37b   :  { %4667 = vmatprep.mubr.msk.f32.mxu0 %vm5250_vm0, %v5249_v1  ;;  %v691_v63 = vmul.f32 %v5519_v57, %v514_v56  ;;  %v593_v0 = vpop.f32.mrb[4].mxu0  ;;  %v678_v62 = vld [vmem:[#allocation15] sm:$0xff] }
 0x37c   :  { %v869_v2 = vand.u32 2147483647, %v867_v58  ;;  %v868_v3 = vsub.f32 %v5482_v46, %v866_v60  ;;  %4663 = vmatmul.mubr.msk.f32.vlgmr.msra.gmra.mrb[6].mxu1 %vm175_vm1, %v706_v59  ;;  %v4649_v4 = vpop.f32.mrb[5].mxu0  ;;  %v5531_v5 = vsel %vm339_vm3, %v1305_v61, %v441_v52  ;;  %v5557_v18 = vadd.f32 %v671_v15, %v593_v0  ;;  %v674_v60 = vld [vmem:[%s5999_s10] sm:$0xff]  ;;  %v675_v61 = vld [vmem:[%s5999_s10 + $0x8] sm:$0xff] }
 0x37d   :  { %v694_v9 = vrot.slane %v691_v63, 7  ;;  %4672 = vmatprep.mubr.msk.f32.mxu1 %vm5250_vm0, %v5249_v1  ;;  %v666_v13 = vpop.f32.mrb[4].mxu1  ;;  %v5252_v58 = vmov 0.0|0.0   ;;  %v679_v63 = vld [vmem:[#allocation15 + $0x8] sm:$0xff] }
 0x37e   :  { %v870_v10 = vand.u32 2147483647, %v868_v3  ;;  %4666 = vmatpush3.xpose.msk.msra.mxu0 %vm175_vm1, %v869_v2  ;;  %v4654_v14 = vpop.f32.mrb[5].mxu1  ;;  %v5559_v22 = vadd.f32 %v671_v15, %v666_v13  ;;  %v5583_v2 = vpack.c.bf16 %v675_v61, %v674_v60  ;;  %v676_v13 = vld [vmem:[%s5999_s10 + $0x10] sm:$0xff] }
 0x37f   :  { %v695_v11 = vsel %vm339_vm3, %v694_v9, %v690_v8  ;;  %4675 = vmatprep.subr.mxu0 %v5249_v1  ;;  %v5585_v8 = vpack.c.bf16 %v679_v63, %v678_v62  ;;  %v677_v14 = vld [vmem:[%s5999_s10 + $0x18] sm:$0xff] }
 0x380   :  { %4671 = vmatpush3.xpose.msk.msra.mxu1 %vm175_vm1, %v870_v10  ;;  %v698_v12 = vsel %vm697_vm6, %v695_v11, 0.0  ;;  %v680_v10 = vld [vmem:[#allocation15 + $0x10] sm:$0xff]  ;;  %v681_v11 = vld [vmem:[#allocation15 + $0x18] sm:$0xff]  ;;  %v5614_v15 = vpack.c.bf16 %v677_v14, %v676_v13 }
 0x381   :  { %699 = vadd.xlane.f32.xlu1 %v698_v12  ;;  %4668 = vmatmul.mubr.msk.f32.vlgmr.msra.gmra.mrb[8].mxu0 %vm175_vm1, %v5533_v7  ;;  %v5594_v12 = vpack.c.bf16 %v681_v11, %v680_v10 }
 0x382   :  { %4680 = vmatprep.subr.mxu1 %v5249_v1  ;;  %4676 = vmatpush3.msra.mxu0 %v5479_v44 }
 0x383   :  { %4673 = vmatmul.mubr.msk.f32.vlgmr.msra.gmra.mrb[8].mxu1 %vm175_vm1, %v5533_v7  ;;  %4677 = vmatprep.mubr.msk.f32.mxu0 %vm5250_vm0, %v5249_v1 }
 0x384   :  { %4681 = vmatpush3.msra.mxu1 %v5482_v46  ;;  %4682 = vmatprep.mubr.msk.f32.mxu1 %vm5250_vm0, %v5249_v1 }
 0x385   :  { %4921 = vmatprep.subr.bf16.mxu1 %v5252_v58  ;;  %4915 = vmatprep.subr.bf16.mxu0 %v5252_v58 }
 0x40e   :  { %v700_v16 = vpop.xlane.xlu1 %699 }
 0x40f   :  { %v1021_v21 = vrot.slane %v700_v16, 1  ;;  %v1024_v25 = vadd.f32 %v700_v16, %v5557_v18 }
 0x411   :  { %v1025_v28 = vadd.f32 %v1021_v21, %v5559_v22 }
 0x44d   :  { %v779_v19 = vpop.f32.mrb[6].mxu0 }
 0x44e   :  { %v4659_v20 = vpop.f32.mrb[7].mxu0  ;;  %v1026_v27 = vadd.f32 %v1024_v25, %v779_v19 }
 0x44f   :  { %v855_v23 = vpop.f32.mrb[6].mxu1 }
 0x450   :  { %v4664_v24 = vpop.f32.mrb[7].mxu1  ;;  %v1027_v30 = vadd.f32 %v1025_v28, %v855_v23 }
 0x451   :  { %v5627_v24 = vld [vmem:[%s6002_s13] ss:$0 sm:$0xff]  ;;  %s5255_s13 = smov 32  }
 0x454   :  { %v943_v29 = vpop.f32.mrb[8].mxu0 }
 0x455   :  { %v1028_v31 = vadd.f32 %v1026_v27, %v943_v29  ;;  %v4669_v33 = vpop.f32.mrb[9].mxu0  ;;  %v5635_v29 = vld [vmem:[%s6001_s12] ss:$0 sm:$0xff]  ;;  %s5254_s12 = smov 96  }
 0x456   :  { %v1016_v34 = vpop.f32.mrb[8].mxu1 }
 0x457   :  { %v1029_v35 = vadd.f32 %v1027_v30, %v1016_v34  ;;  %v4674_v36 = vpop.f32.mrb[9].mxu1  ;;  %v1034_v38 = vadd.f32 %v1028_v31, %v5563_v26 }
 0x459   :  { %v1035_v37 = vadd.f32 %v5567_v32, %v1029_v35 }
 0x45b   :  { %v1038_v39 = vrot.slane %v1035_v37, 7 }
 0x45d   :  { %v1039_v40 = vsel %vm339_vm3, %v1038_v39, %v1034_v38 }
 0x45e   :  { %v1041_v41 = vsel %vm342_vm4, %v1039_v40, -inf }
 0x45f   :  { %1042 = vmax.xlane.f32.xlu1 %v1041_v41 }
 0x4ec   :  { %v1043_v42 = vpop.xlane.xlu1 %1042 }
 0x4ed   :  { %v1045_v43 = vrot.slane %v1043_v42, 1  ;;  %v1048_v45 = vsub.f32 %v1034_v38, %v1043_v42 }
 0x4ef   :  { %v1049_v47 = vsub.f32 %v1035_v37, %v1045_v43  ;;  %v1050_v48 = vmul.f32 1.442695, %v1048_v45 }
 0x4f1   :  { %v1052_v51 = vmul.f32 1.442695, %v1049_v47 }
 0x4f3   :  { %4998 = vpow2.f32 %v1052_v51 }
 0x4f4   :  { %5000 = vpow2.f32 %v1050_v48 }
 0x4fd   :  { %v4999_v52 = vpop.eup %4998 }
 0x4fe   :  { %v1056_v53 = vrot.slane %v4999_v52, 7  ;;  %v5001_v54 = vpop.eup %5000 }
 0x500   :  { %v1057_v55 = vsel %vm339_vm3, %v1056_v53, %v5001_v54 }
 0x501   :  { %v1059_v56 = vsel %vm342_vm4, %v1057_v55, 0.0 }
 0x502   :  { %1060 = vadd.xlane.f32.xlu0 %v1059_v56 }
 0x58f   :  { %v1061_v59 = vpop.xlane.xlu0 %1060 }
 0x590   :  { %5002 = vrcp.f32 %v1061_v59 }
 0x59a   :  { %v5003_v0 = vpop.eup %5002 }
 0x59b   :  { %v1064_v3 = vrot.slane %v5003_v0, 1  ;;  %v1067_v4 = vmul.f32 %v5003_v0, %v5001_v54 }
 0x59d   :  { %4678 = vmatmul.mubr.msk.f32.vlgmr.msra.gmra.mrb[10].mxu0 %vm371_vm5, %v1067_v4  ;;  %v1068_v9 = vmul.f32 %v4999_v52, %v1064_v3 }
 0x59e   :  { %4917 = vmatpush3.bf16.msra.mxu0 %v5583_v2  ;;  %4693 = vmatprep.mubr.msk.f32.mxu0 %vm5250_vm0, %v5249_v1 }
 0x59f   :  { %4683 = vmatmul.mubr.msk.f32.vlgmr.msra.gmra.mrb[10].mxu1 %vm371_vm5, %v1068_v9  ;;  %4918 = vmatprep.subr.bf16.mxu0 %v5252_v58 }
 0x5a0   :  { %4923 = vmatpush3.bf16.msra.mxu1 %v5585_v8  ;;  %4704 = vmatprep.mubr.msk.f32.mxu1 %vm5250_vm0, %v5249_v1 }
 0x5a1   :  { %4924 = vmatprep.subr.bf16.mxu1 %v5252_v58 }
 0x5a2   :  { %4920 = vmatpush3.bf16.msra.mxu0 %v5614_v15 }
 0x5a3   :  { %4707 = vmatprep.subr.mxu0 %v5249_v1 }
 0x5a4   :  { %4926 = vmatpush3.bf16.msra.mxu1 %v5594_v12 }
 0x5a5   :  { %4712 = vmatprep.subr.mxu1 %v5249_v1 }
 0x5a7   :  { %4705 = vmatmul.mubr.msk.f32.vlgmr.msra.gmra.mrb[12].mxu1 %vm175_vm1, %v5531_v5 }
 0x5a8   :  { %4714 = vmatprep.mubr.msk.f32.mxu1 %vm5250_vm0, %v5249_v1 }
 0x5ad   :  { %4713 = vmatpush3.xpose.msk.msra.mxu1 %vm175_vm1, %v5482_v46 }
 0x5ae   :  { %4722 = vmatprep.subr.mxu1 %v5249_v1 }
 0x670   :  { %v1138_v16 = vpop.f32.mrb[10].mxu0 }
 0x671   :  { %v4679_v17 = vpop.f32.mrb[11].mxu0 }
 0x672   :  { %v1211_v19 = vpop.f32.mrb[10].mxu1 }
 0x673   :  { %v1223_v20 = vrot.slane %v1211_v19, 7  ;;  %v4684_v21 = vpop.f32.mrb[11].mxu1 }
 0x675   :  { %v1224_v23 = vsel %vm339_vm3, %v1223_v20, %v1138_v16 }
 0x676   :  { %4694 = vmatmul.mubr.msk.f32.vlgmr.msra.gmra.mrb[12].mxu0 %vm175_vm1, %v1224_v23 }
 0x677   :  { %4708 = vmatpush3.xpose.msk.msra.mxu0 %vm175_vm1, %v5479_v44  ;;  %4709 = vmatprep.mubr.msk.f32.mxu0 %vm5250_vm0, %v5249_v1 }
 0x678   :  { %4717 = vmatprep.subr.mxu0 %v5249_v1 }
 0x67a   :  { %v1375_v25 = vpop.f32.mrb[12].mxu1 }
 0x67b   :  { %v1376_v27 = vadd.f32 %v5627_v24, %v1375_v25  ;;  %v4706_v28 = vpop.f32.mrb[13].mxu1 }
 0x67d   :  { %1387 = vrot.lane.b32.xlu1 %v1376_v27, %s5253_s27 }
 0x6ef   :  { %v1388_v39 = vpop.permute.xlu1 %1387 }
 0x749   :  { %v1293_v30 = vpop.f32.mrb[12].mxu0 }
 0x74a   :  { %v1294_v31 = vadd.f32 %v5635_v29, %v1293_v30  ;;  %v4695_v33 = vpop.f32.mrb[13].mxu0 }
 0x74c   :  { %v1379_v34 = vadd.f32 %v1376_v27, %v1294_v31 }
 0x74e   :  { %v4450_v35 = vmul.f32 -1.442695, %v1379_v34 }
 0x750   :  { %5004 = vpow2.f32 %v4450_v35 }
 0x75a   :  { %v5005_v36 = vpop.eup %5004 }
 0x75b   :  { %v1383_v37 = vadd.f32 1.0, %v5005_v36 }
 0x75d   :  { %5006 = vrcp.f32 %v1383_v37 }
 0x767   :  { %v5007_v38 = vpop.eup %5006 }
 0x768   :  { %v1390_v40 = vmul.f32 %v5007_v38, %v1388_v39  ;;  %v1397_v47 = vsub.f32 1.0, %v5007_v38 }
 0x76a   :  { %1392 = vrot.lane.b32.xlu0 %v1390_v40, %s5253_s27 }
 0x7dc   :  { %v1393_v41 = vpop.permute.xlu0 %1392 }
 0x7dd   :  { %v1395_v42 = vadd.f32 %v1393_v41, %v1294_v31 }
 0x7df   :  { %5008 = vtanh.f32 %v1395_v42 }
 0x7e9   :  { %v5009_v43 = vpop.eup %5008 }
 0x7ea   :  { %1399 = vrot.lane.b32.xlu1 %v5009_v43, %s5254_s12 }
 0x7ee   :  { %1403 = vrot.lane.b32.xlu1 %v5531_v5, %s5255_s13 }
 0x7f2   :  { %1423 = vrot.lane.b32.xlu1 %v5511_v49, %s5255_s13 }
 0x85c   :  { %v1400_v45 = vpop.permute.xlu1 %1399 }
 0x85d   :  { %v1402_v51 = vmul.f32 %v1400_v45, %v1397_v47 }
 0x860   :  { %v1404_v48 = vpop.permute.xlu1 %1403 }
 0x861   :  { %v1406_v52 = vmul.f32 %v5007_v38, %v1404_v48 }
 0x863   :  { %v5642_v53 = vadd.f32 %v1406_v52, %v1402_v51 }
 0x864   :  { %v5644_v54 = vpop.permute.xlu1 %1423 }
 0x865   :  { %v1426_v55 = vmul.f32 %v5644_v54, %v5642_v53  ;;  %v1619_v56 = vrot.slane %v5642_v53, %v5451_v6 }
 0x867   :  { %v1434_v59 = vrot.slane %v1426_v55, %v5451_v6  ;;  %v1627_v5 = vrot.slane %v1619_v56, %v5451_v6  ;;  %v1620_v49 = vcombine.high %v1619_v56, %v1619_v56 }
 0x869   :  { %v1638_v60 = vrot.slane %v1627_v5, %v5514_v50  ;;  %v1634_v61 = vrot.slane %v1620_v49, %v5451_v6  ;;  %v1442_v62 = vrot.slane %v1434_v59, %v5451_v6  ;;  %v1435_v63 = vcombine.high %v1434_v59, %v1434_v59 }
 0x86b   :  { %1643 = vrot.lane.b32.xlu1 %v1638_v60, %s5254_s12  ;;  %v1642_v0 = vrot.slane %v1634_v61, %v5514_v50  ;;  %v1449_v3 = vrot.slane %v1435_v63, %v5451_v6  ;;  %v1453_v4 = vrot.slane %v1442_v62, %v5514_v50 }
 0x86d   :  { %1645 = vrot.lane.b32.xlu0 %v1642_v0, %s5254_s12  ;;  %v1534_v9 = vrot.slane %v1449_v3, %v5514_v50 }
 0x86f   :  { %1454 = vrot.lane.b32.xlu1 %v1453_v4, %s5254_s12 }
 0x871   :  { %1535 = vrot.lane.b32.xlu0 %v1534_v9, %s5254_s12 }
 0x875   :  { %1411 = vrot.lane.b32.xlu0 %v5519_v57, %s5255_s13 }
 0x8dd   :  { %v1644_v10 = vpop.permute.xlu1 %1643 }
 0x8de   :  { %v1649_v11 = vsub.f32 %v5479_v44, %v1644_v10 }
 0x8df   :  { %v1646_v13 = vpop.permute.xlu0 %1645 }
 0x8e0   :  { %v1651_v14 = vand.u32 2147483647, %v1649_v11  ;;  %v1650_v16 = vsub.f32 %v5482_v46, %v1646_v13 }
 0x8e1   :  { %v1455_v17 = vpop.permute.xlu1 %1454 }
 0x8e2   :  { %v1652_v19 = vand.u32 2147483647, %v1650_v16  ;;  %4710 = vmatmul.mubr.msk.f32.vlgmr.msra.gmra.mrb[14].mxu0 %vm175_vm1, %v1455_v17 }
 0x8e3   :  { %4718 = vmatpush3.xpose.msk.msra.mxu0 %vm175_vm1, %v1651_v14  ;;  %v1536_v20 = vpop.permute.xlu0 %1535  ;;  %4719 = vmatprep.mubr.msk.f32.mxu0 %vm5250_vm0, %v5249_v1 }
 0x8e4   :  { %4715 = vmatmul.mubr.msk.f32.vlgmr.msra.gmra.mrb[14].mxu1 %vm175_vm1, %v1536_v20  ;;  %4727 = vmatprep.subr.mxu0 %v5249_v1 }
 0x8e5   :  { %4723 = vmatpush3.xpose.msk.msra.mxu1 %vm175_vm1, %v1652_v19  ;;  %4724 = vmatprep.mubr.msk.f32.mxu1 %vm5250_vm0, %v5249_v1 }
 0x8e6   :  { %4720 = vmatmul.mubr.msk.f32.vlgmr.msra.gmra.mrb[16].mxu0 %vm175_vm1, %v5533_v7  ;;  %4732 = vmatprep.subr.mxu1 %v5249_v1 }
 0x8e7   :  { %v5678_v57 = vpop.permute.xlu0 %1411  ;;  %4728 = vmatpush3.msra.mxu0 %v5479_v44  ;;  %4729 = vmatprep.mubr.msk.f32.mxu0 %vm5250_vm0, %v5249_v1 }
 0x8e8   :  { %v1414_v21 = vmul.f32 %v5678_v57, %v5642_v53  ;;  %4725 = vmatmul.mubr.msk.f32.vlgmr.msra.gmra.mrb[16].mxu1 %vm175_vm1, %v5533_v7  ;;  %4927 = vmatprep.subr.bf16.mxu0 %v5252_v58 }
 0x8e9   :  { %4733 = vmatpush3.msra.mxu1 %v5482_v46  ;;  %4734 = vmatprep.mubr.msk.f32.mxu1 %vm5250_vm0, %v5249_v1 }
 0x8ea   :  { %1416 = vrot.lane.b32.xlu1 %v1414_v21, %s5254_s12  ;;  %4933 = vmatprep.subr.bf16.mxu1 %v5252_v58 }
 0x95c   :  { %v1417_v23 = vpop.permute.xlu1 %1416 }
 0x95d   :  { %v1419_v25 = vsel %vm697_vm6, %v1417_v23, 0.0 }
 0x95e   :  { %1420 = vadd.xlane.f32.xlu0 %v1419_v25 }
 0x9b5   :  { %v1527_v27 = vpop.f32.mrb[14].mxu0 }
 0x9b6   :  { %v4711_v28 = vpop.f32.mrb[15].mxu0 }
 0x9b7   :  { %v1608_v30 = vpop.f32.mrb[14].mxu1 }
 0x9b8   :  { %v4716_v31 = vpop.f32.mrb[15].mxu1 }
 0x9b9   :  { %v1722_v33 = vpop.f32.mrb[16].mxu0 }
 0x9ba   :  { %v4721_v34 = vpop.f32.mrb[17].mxu0 }
 0x9bb   :  { %v1795_v35 = vpop.f32.mrb[16].mxu1 }
 0x9bc   :  { %v4726_v36 = vpop.f32.mrb[17].mxu1 }
 0x9eb   :  { %v1421_v37 = vpop.xlane.xlu0 %1420 }
 0x9ec   :  { %v1800_v38 = vrot.slane %v1421_v37, 1  ;;  %v1803_v39 = vadd.f32 %v1421_v37, %v5557_v18 }
 0x9ee   :  { %v1804_v40 = vadd.f32 %v1800_v38, %v5559_v22  ;;  %v1805_v41 = vadd.f32 %v1803_v39, %v1527_v27 }
 0x9f0   :  { %v1807_v42 = vadd.f32 %v1805_v41, %v1722_v33  ;;  %v1806_v43 = vadd.f32 %v1804_v40, %v1608_v30 }
 0x9f2   :  { %v1808_v45 = vadd.f32 %v1806_v43, %v1795_v35  ;;  %v1809_v48 = vadd.f32 %v1807_v42, %v5563_v26 }
 0x9f4   :  { %v1810_v47 = vadd.f32 %v1808_v45, %v5567_v32 }
 0x9f6   :  { %v1813_v51 = vrot.slane %v1810_v47, 7 }
 0x9f8   :  { %v1814_v52 = vsel %vm339_vm3, %v1813_v51, %v1809_v48 }
 0x9f9   :  { %v1816_v55 = vsel %vm342_vm4, %v1814_v52, -inf }
 0x9fa   :  { %1817 = vmax.xlane.f32.xlu1 %v1816_v55 }
 0xa87   :  { %v1818_v56 = vpop.xlane.xlu1 %1817 }
 0xa88   :  { %v1820_v59 = vrot.slane %v1818_v56, 1  ;;  %v1823_v5 = vsub.f32 %v1809_v48, %v1818_v56 }
 0xa8a   :  { %v1824_v49 = vsub.f32 %v1810_v47, %v1820_v59  ;;  %v1825_v60 = vmul.f32 1.442695, %v1823_v5 }
 0xa8c   :  { %v1827_v61 = vmul.f32 1.442695, %v1824_v49 }
 0xa8e   :  { %5010 = vpow2.f32 %v1827_v61 }
 0xa8f   :  { %5012 = vpow2.f32 %v1825_v60 }
 0xa98   :  { %v5011_v62 = vpop.eup %5010 }
 0xa99   :  { %v1831_v63 = vrot.slane %v5011_v62, 7  ;;  %v5013_v0 = vpop.eup %5012 }
 0xa9b   :  { %v1832_v3 = vsel %vm339_vm3, %v1831_v63, %v5013_v0 }
 0xa9c   :  { %v1834_v4 = vsel %vm342_vm4, %v1832_v3, 0.0 }
 0xa9d   :  { %1835 = vadd.xlane.f32.xlu0 %v1834_v4 }
 0xab3   :  { %2066 = vrot.lane.b32.xlu0 %v5642_v53, %s5254_s12 }
 0xb2a   :  { %v1836_v9 = vpop.xlane.xlu0 %1835 }
 0xb2b   :  { %5014 = vrcp.f32 %v1836_v9 }
 0xb2e   :  { %v2067_v16 = vpop.permute.xlu0 %2066 }
 0xb35   :  { %v5015_v10 = vpop.eup %5014 }
 0xb36   :  { %v1839_v11 = vrot.slane %v5015_v10, 1  ;;  %v1842_v13 = vmul.f32 %v5015_v10, %v5013_v0 }
 0xb38   :  { %4730 = vmatmul.mubr.msk.f32.vlgmr.msra.gmra.mrb[18].mxu0 %vm371_vm5, %v1842_v13  ;;  %v1843_v14 = vmul.f32 %v5011_v62, %v1839_v11 }
 0xb39   :  { %4929 = vmatpush3.bf16.msra.mxu0 %v5583_v2  ;;  %4745 = vmatprep.mubr.msk.f32.mxu0 %vm5250_vm0, %v5249_v1 }
 0xb3a   :  { %4735 = vmatmul.mubr.msk.f32.vlgmr.msra.gmra.mrb[18].mxu1 %vm371_vm5, %v1843_v14  ;;  %4930 = vmatprep.subr.bf16.mxu0 %v5252_v58 }
 0xb3b   :  { %4935 = vmatpush3.bf16.msra.mxu1 %v5585_v8  ;;  %4756 = vmatprep.mubr.msk.f32.mxu1 %vm5250_vm0, %v5249_v1 }
 0xb3c   :  { %4936 = vmatprep.subr.bf16.mxu1 %v5252_v58 }
 0xb3d   :  { %4932 = vmatpush3.bf16.msra.mxu0 %v5614_v15 }
 0xb3e   :  { %4759 = vmatprep.subr.mxu0 %v5249_v1 }
 0xb3f   :  { %4938 = vmatpush3.bf16.msra.mxu1 %v5594_v12 }
 0xb40   :  { %4764 = vmatprep.subr.mxu1 %v5249_v1 }
 0xb42   :  { %4757 = vmatmul.mubr.msk.f32.vlgmr.msra.gmra.mrb[20].mxu1 %vm175_vm1, %v2067_v16 }
 0xb43   :  { %4766 = vmatprep.mubr.msk.f32.mxu1 %vm5250_vm0, %v5249_v1 }
 0xb48   :  { %4765 = vmatpush3.xpose.msk.msra.mxu1 %vm175_vm1, %v5482_v46 }
 0xb49   :  { %4774 = vmatprep.subr.mxu1 %v5249_v1 }
 0xc0b   :  { %v1913_v17 = vpop.f32.mrb[18].mxu0 }
 0xc0c   :  { %v4731_v19 = vpop.f32.mrb[19].mxu0 }
 0xc0d   :  { %v1986_v20 = vpop.f32.mrb[18].mxu1 }
 0xc0e   :  { %v1992_v21 = vrot.slane %v1986_v20, 7  ;;  %v4736_v23 = vpop.f32.mrb[19].mxu1 }
 0xc10   :  { %v1993_v25 = vsel %vm339_vm3, %v1992_v21, %v1913_v17 }
 0xc11   :  { %4746 = vmatmul.mubr.msk.f32.vlgmr.msra.gmra.mrb[20].mxu0 %vm175_vm1, %v1993_v25 }
 0xc12   :  { %4760 = vmatpush3.xpose.msk.msra.mxu0 %vm175_vm1, %v5479_v44  ;;  %4761 = vmatprep.mubr.msk.f32.mxu0 %vm5250_vm0, %v5249_v1 }
 0xc13   :  { %4769 = vmatprep.subr.mxu0 %v5249_v1 }
 0xc15   :  { %v2136_v27 = vpop.f32.mrb[20].mxu1 }
 0xc16   :  { %v2137_v28 = vadd.f32 %v5627_v24, %v2136_v27  ;;  %v4758_v30 = vpop.f32.mrb[21].mxu1 }
 0xc18   :  { %2148 = vrot.lane.b32.xlu1 %v2137_v28, %s5253_s27 }
 0xc8a   :  { %v2149_v40 = vpop.permute.xlu1 %2148 }
 0xce4   :  { %v2062_v31 = vpop.f32.mrb[20].mxu0 }
 0xce5   :  { %v2063_v33 = vadd.f32 %v5635_v29, %v2062_v31  ;;  %v4747_v34 = vpop.f32.mrb[21].mxu0 }
 0xce7   :  { %v2140_v35 = vadd.f32 %v2137_v28, %v2063_v33 }
 0xce9   :  { %v4463_v36 = vmul.f32 -1.442695, %v2140_v35 }
 0xceb   :  { %5016 = vpow2.f32 %v4463_v36 }
 0xcf5   :  { %v5017_v37 = vpop.eup %5016 }
 0xcf6   :  { %v2144_v38 = vadd.f32 1.0, %v5017_v37 }
 0xcf8   :  { %5018 = vrcp.f32 %v2144_v38 }
 0xd02   :  { %v5019_v39 = vpop.eup %5018 }
 0xd03   :  { %v2151_v41 = vmul.f32 %v5019_v39, %v2149_v40  ;;  %v2158_v47 = vsub.f32 1.0, %v5019_v39  ;;  %v2164_v51 = vmul.f32 %v5019_v39, %v5642_v53 }
 0xd05   :  { %2153 = vrot.lane.b32.xlu1 %v2151_v41, %s5253_s27 }
 0xd77   :  { %v2154_v42 = vpop.permute.xlu1 %2153 }
 0xd78   :  { %v2156_v43 = vadd.f32 %v2154_v42, %v2063_v33 }
 0xd7a   :  { %5020 = vtanh.f32 %v2156_v43 }
 0xd84   :  { %v5021_v45 = vpop.eup %5020 }
 0xd85   :  { %2160 = vrot.lane.b32.xlu0 %v5021_v45, %s5254_s12 }
 0xdf7   :  { %v2161_v48 = vpop.permute.xlu0 %2160 }
 0xdf8   :  { %v2163_v52 = vmul.f32 %v2161_v48, %v2158_v47 }
 0xdfa   :  { %v5737_v55 = vadd.f32 %v2164_v51, %v2163_v52 }
 0xdfc   :  { %v2369_v56 = vrot.slane %v5737_v55, %v5451_v6  ;;  %v2176_v59 = vmul.f32 %v5737_v55, %v5644_v54  ;;  %v2168_v10 = vmul.f32 %v5737_v55, %v5678_v57 }
 0xdfe   :  { %v2377_v5 = vrot.slane %v2369_v56, %v5451_v6  ;;  %v2370_v49 = vcombine.high %v2369_v56, %v2369_v56  ;;  %v2184_v60 = vrot.slane %v2176_v59, %v5451_v6 }
 0xe00   :  { %v2388_v61 = vrot.slane %v2377_v5, %v5514_v50  ;;  %v2384_v62 = vrot.slane %v2370_v49, %v5451_v6  ;;  %v2192_v53 = vrot.slane %v2184_v60, %v5451_v6  ;;  %v2185_v63 = vcombine.high %v2184_v60, %v2184_v60 }
 0xe02   :  { %2393 = vrot.lane.b32.xlu0 %v2388_v61, %s5254_s12  ;;  %v2392_v0 = vrot.slane %v2384_v62, %v5514_v50  ;;  %v2199_v3 = vrot.slane %v2185_v63, %v5451_v6  ;;  %v2203_v4 = vrot.slane %v2192_v53, %v5514_v50 }
 0xe04   :  { %2395 = vrot.lane.b32.xlu1 %v2392_v0, %s5254_s12  ;;  %v2284_v9 = vrot.slane %v2199_v3, %v5514_v50 }
 0xe06   :  { %2204 = vrot.lane.b32.xlu0 %v2203_v4, %s5254_s12 }
 0xe08   :  { %2285 = vrot.lane.b32.xlu1 %v2284_v9, %s5254_s12 }
 0xe0c   :  { %2170 = vrot.lane.b32.xlu1 %v2168_v10, %s5254_s12 }
 0xe74   :  { %v2394_v11 = vpop.permute.xlu0 %2393 }
 0xe75   :  { %v2399_v13 = vsub.f32 %v5479_v44, %v2394_v11 }
 0xe76   :  { %v2396_v14 = vpop.permute.xlu1 %2395 }
 0xe77   :  { %v2401_v16 = vand.u32 2147483647, %v2399_v13  ;;  %v2400_v17 = vsub.f32 %v5482_v46, %v2396_v14 }
 0xe78   :  { %v2205_v19 = vpop.permute.xlu0 %2204 }
 0xe79   :  { %v2402_v20 = vand.u32 2147483647, %v2400_v17  ;;  %4762 = vmatmul.mubr.msk.f32.vlgmr.msra.gmra.mrb[22].mxu0 %vm175_vm1, %v2205_v19 }
 0xe7a   :  { %4770 = vmatpush3.xpose.msk.msra.mxu0 %vm175_vm1, %v2401_v16  ;;  %v2286_v21 = vpop.permute.xlu1 %2285  ;;  %4771 = vmatprep.mubr.msk.f32.mxu0 %vm5250_vm0, %v5249_v1 }
 0xe7b   :  { %4767 = vmatmul.mubr.msk.f32.vlgmr.msra.gmra.mrb[22].mxu1 %vm175_vm1, %v2286_v21  ;;  %4779 = vmatprep.subr.mxu0 %v5249_v1 }
 0xe7c   :  { %4775 = vmatpush3.xpose.msk.msra.mxu1 %vm175_vm1, %v2402_v20  ;;  %4776 = vmatprep.mubr.msk.f32.mxu1 %vm5250_vm0, %v5249_v1 }
 0xe7d   :  { %4772 = vmatmul.mubr.msk.f32.vlgmr.msra.gmra.mrb[24].mxu0 %vm175_vm1, %v5533_v7  ;;  %4784 = vmatprep.subr.mxu1 %v5249_v1 }
 0xe7e   :  { %v2171_v23 = vpop.permute.xlu1 %2170  ;;  %4780 = vmatpush3.msra.mxu0 %v5479_v44  ;;  %4781 = vmatprep.mubr.msk.f32.mxu0 %vm5250_vm0, %v5249_v1 }
 0xe7f   :  { %4777 = vmatmul.mubr.msk.f32.vlgmr.msra.gmra.mrb[24].mxu1 %vm175_vm1, %v5533_v7  ;;  %v2173_v25 = vsel %vm697_vm6, %v2171_v23, 0.0  ;;  %4939 = vmatprep.subr.bf16.mxu0 %v5252_v58 }
 0xe80   :  { %2174 = vadd.xlane.f32.xlu0 %v2173_v25  ;;  %4785 = vmatpush3.msra.mxu1 %v5482_v46 }
 0xe81   :  { %4786 = vmatprep.mubr.msk.f32.mxu1 %vm5250_vm0, %v5249_v1  ;;  %4945 = vmatprep.subr.bf16.mxu1 %v5252_v58 }
 0xf0d   :  { %v2175_v27 = vpop.xlane.xlu0 %2174 }
 0xf0e   :  { %v2550_v28 = vrot.slane %v2175_v27, 1  ;;  %v2553_v31 = vadd.f32 %v2175_v27, %v5557_v18 }
 0xf10   :  { %v2554_v36 = vadd.f32 %v2550_v28, %v5559_v22 }
 0xf4c   :  { %v2277_v30 = vpop.f32.mrb[22].mxu0 }
 0xf4d   :  { %v4763_v33 = vpop.f32.mrb[23].mxu0  ;;  %v2555_v35 = vadd.f32 %v2553_v31, %v2277_v30 }
 0xf4e   :  { %v2358_v34 = vpop.f32.mrb[22].mxu1 }
 0xf4f   :  { %v4768_v37 = vpop.f32.mrb[23].mxu1  ;;  %v2556_v39 = vadd.f32 %v2554_v36, %v2358_v34 }
 0xf50   :  { %v2472_v38 = vpop.f32.mrb[24].mxu0 }
 0xf51   :  { %v2557_v40 = vadd.f32 %v2555_v35, %v2472_v38  ;;  %v4773_v41 = vpop.f32.mrb[25].mxu0 }
 0xf52   :  { %v2545_v42 = vpop.f32.mrb[24].mxu1 }
 0xf53   :  { %v2558_v43 = vadd.f32 %v2556_v39, %v2545_v42  ;;  %v4778_v45 = vpop.f32.mrb[25].mxu1  ;;  %v2559_v48 = vadd.f32 %v2557_v40, %v5563_v26 }
 0xf55   :  { %v2560_v47 = vadd.f32 %v2558_v43, %v5567_v32 }
 0xf57   :  { %v2563_v51 = vrot.slane %v2560_v47, 7 }
 0xf59   :  { %v2564_v52 = vsel %vm339_vm3, %v2563_v51, %v2559_v48 }
 0xf5a   :  { %v2566_v56 = vsel %vm342_vm4, %v2564_v52, -inf }
 0xf5b   :  { %2567 = vmax.xlane.f32.xlu1 %v2566_v56 }
 0xfe8   :  { %v2568_v59 = vpop.xlane.xlu1 %2567 }
 0xfe9   :  { %v2570_v5 = vrot.slane %v2568_v59, 1  ;;  %v2573_v49 = vsub.f32 %v2559_v48, %v2568_v59 }
 0xfeb   :  { %v2574_v60 = vsub.f32 %v2560_v47, %v2570_v5  ;;  %v2575_v61 = vmul.f32 1.442695, %v2573_v49 }
 0xfed   :  { %v2577_v62 = vmul.f32 1.442695, %v2574_v60 }
 0xfef   :  { %5022 = vpow2.f32 %v2577_v62 }
 0xff0   :  { %5024 = vpow2.f32 %v2575_v61 }
 0xff9   :  { %v5023_v53 = vpop.eup %5022 }
 0xffa   :  { %v2581_v63 = vrot.slane %v5023_v53, 7  ;;  %v5025_v0 = vpop.eup %5024 }
 0xffc   :  { %v2582_v3 = vsel %vm339_vm3, %v2581_v63, %v5025_v0 }
 0xffd   :  { %v2584_v4 = vsel %vm342_vm4, %v2582_v3, 0.0 }
 0xffe   :  { %2585 = vadd.xlane.f32.xlu0 %v2584_v4 }
0x1014   :  { %2816 = vrot.lane.b32.xlu0 %v5737_v55, %s5254_s12 }
0x108b   :  { %v2586_v9 = vpop.xlane.xlu0 %2585 }
0x108c   :  { %5026 = vrcp.f32 %v2586_v9 }
0x108f   :  { %v2817_v16 = vpop.permute.xlu0 %2816 }
0x1096   :  { %v5027_v10 = vpop.eup %5026 }
0x1097   :  { %v2589_v11 = vrot.slane %v5027_v10, 1  ;;  %v2592_v13 = vmul.f32 %v5027_v10, %v5025_v0 }
0x1099   :  { %4782 = vmatmul.mubr.msk.f32.vlgmr.msra.gmra.mrb[26].mxu0 %vm371_vm5, %v2592_v13  ;;  %v2593_v14 = vmul.f32 %v5023_v53, %v2589_v11 }
0x109a   :  { %4941 = vmatpush3.bf16.msra.mxu0 %v5583_v2  ;;  %4797 = vmatprep.mubr.msk.f32.mxu0 %vm5250_vm0, %v5249_v1 }
0x109b   :  { %4787 = vmatmul.mubr.msk.f32.vlgmr.msra.gmra.mrb[26].mxu1 %vm371_vm5, %v2593_v14  ;;  %4942 = vmatprep.subr.bf16.mxu0 %v5252_v58 }
0x109c   :  { %4947 = vmatpush3.bf16.msra.mxu1 %v5585_v8  ;;  %4808 = vmatprep.mubr.msk.f32.mxu1 %vm5250_vm0, %v5249_v1 }
0x109d   :  { %4948 = vmatprep.subr.bf16.mxu1 %v5252_v58 }
0x109e   :  { %4944 = vmatpush3.bf16.msra.mxu0 %v5614_v15 }
0x109f   :  { %4811 = vmatprep.subr.mxu0 %v5249_v1 }
0x10a0   :  { %4950 = vmatpush3.bf16.msra.mxu1 %v5594_v12 }
0x10a1   :  { %4816 = vmatprep.subr.mxu1 %v5249_v1 }
0x10a3   :  { %4809 = vmatmul.mubr.msk.f32.vlgmr.msra.gmra.mrb[28].mxu1 %vm175_vm1, %v2817_v16 }
0x10a4   :  { %4818 = vmatprep.mubr.msk.f32.mxu1 %vm5250_vm0, %v5249_v1 }
0x10a9   :  { %4817 = vmatpush3.xpose.msk.msra.mxu1 %vm175_vm1, %v5482_v46 }
0x10aa   :  { %4826 = vmatprep.subr.mxu1 %v5249_v1 }
0x116c   :  { %v2663_v17 = vpop.f32.mrb[26].mxu0 }
0x116d   :  { %v4783_v19 = vpop.f32.mrb[27].mxu0 }
0x116e   :  { %v2736_v20 = vpop.f32.mrb[26].mxu1 }
0x116f   :  { %v2742_v21 = vrot.slane %v2736_v20, 7  ;;  %v4788_v23 = vpop.f32.mrb[27].mxu1 }
0x1171   :  { %v2743_v25 = vsel %vm339_vm3, %v2742_v21, %v2663_v17 }
0x1172   :  { %4798 = vmatmul.mubr.msk.f32.vlgmr.msra.gmra.mrb[28].mxu0 %vm175_vm1, %v2743_v25  ;;  %v5053_v25 = vld [vmem:[#allocation4 + $0x8] sm:$0xff] }
0x1173   :  { %4812 = vmatpush3.xpose.msk.msra.mxu0 %vm175_vm1, %v5479_v44  ;;  %4813 = vmatprep.mubr.msk.f32.mxu0 %vm5250_vm0, %v5249_v1 }
0x1174   :  { %4821 = vmatprep.subr.mxu0 %v5249_v1 }
0x1176   :  { %v2886_v27 = vpop.f32.mrb[28].mxu1 }
0x1177   :  { %v2887_v28 = vadd.f32 %v5627_v24, %v2886_v27  ;;  %v4810_v30 = vpop.f32.mrb[29].mxu1 }
0x1179   :  { %2898 = vrot.lane.b32.xlu1 %v2887_v28, %s5253_s27 }
0x11eb   :  { %v2899_v40 = vpop.permute.xlu1 %2898 }
0x1245   :  { %v2812_v31 = vpop.f32.mrb[28].mxu0 }
0x1246   :  { %v2813_v33 = vadd.f32 %v5635_v29, %v2812_v31  ;;  %v4799_v34 = vpop.f32.mrb[29].mxu0 }
0x1248   :  { %v2890_v35 = vadd.f32 %v2887_v28, %v2813_v33 }
0x124a   :  { %v4476_v36 = vmul.f32 -1.442695, %v2890_v35 }
0x124c   :  { %5028 = vpow2.f32 %v4476_v36 }
0x1256   :  { %v5029_v37 = vpop.eup %5028 }
0x1257   :  { %v2894_v38 = vadd.f32 1.0, %v5029_v37 }
0x1259   :  { %5030 = vrcp.f32 %v2894_v38 }
0x1263   :  { %v5031_v39 = vpop.eup %5030 }
0x1264   :  { %v2901_v41 = vmul.f32 %v5031_v39, %v2899_v40  ;;  %v2908_v47 = vsub.f32 1.0, %v5031_v39  ;;  %v2914_v51 = vmul.f32 %v5031_v39, %v5737_v55 }
0x1266   :  { %2903 = vrot.lane.b32.xlu1 %v2901_v41, %s5253_s27 }
0x12d8   :  { %v2904_v42 = vpop.permute.xlu1 %2903 }
0x12d9   :  { %v2906_v43 = vadd.f32 %v2904_v42, %v2813_v33 }
0x12db   :  { %5032 = vtanh.f32 %v2906_v43 }
0x12e5   :  { %v5033_v45 = vpop.eup %5032 }
0x12e6   :  { %2910 = vrot.lane.b32.xlu0 %v5033_v45, %s5254_s12 }
0x1358   :  { %v2911_v48 = vpop.permute.xlu0 %2910 }
0x1359   :  { %v2913_v52 = vmul.f32 %v2911_v48, %v2908_v47 }
0x135b   :  { %v5827_v56 = vadd.f32 %v2914_v51, %v2913_v52 }
0x135d   :  { %v3119_v59 = vrot.slane %v5827_v56, %v5451_v6  ;;  %v2926_v5 = vmul.f32 %v5827_v56, %v5644_v54  ;;  %v2918_v10 = vmul.f32 %v5827_v56, %v5678_v57 }
0x135f   :  { %v3127_v49 = vrot.slane %v3119_v59, %v5451_v6  ;;  %v3120_v60 = vcombine.high %v3119_v59, %v3119_v59  ;;  %v2934_v61 = vrot.slane %v2926_v5, %v5451_v6 }
0x1361   :  { %v3138_v62 = vrot.slane %v3127_v49, %v5514_v50  ;;  %v3134_v53 = vrot.slane %v3120_v60, %v5451_v6  ;;  %v2942_v55 = vrot.slane %v2934_v61, %v5451_v6  ;;  %v2935_v63 = vcombine.high %v2934_v61, %v2934_v61 }
0x1363   :  { %3143 = vrot.lane.b32.xlu0 %v3138_v62, %s5254_s12  ;;  %v3142_v0 = vrot.slane %v3134_v53, %v5514_v50  ;;  %v2949_v3 = vrot.slane %v2935_v63, %v5451_v6  ;;  %v2953_v4 = vrot.slane %v2942_v55, %v5514_v50 }
0x1365   :  { %3145 = vrot.lane.b32.xlu1 %v3142_v0, %s5254_s12  ;;  %v3034_v9 = vrot.slane %v2949_v3, %v5514_v50 }
0x1367   :  { %2954 = vrot.lane.b32.xlu0 %v2953_v4, %s5254_s12 }
0x1369   :  { %3035 = vrot.lane.b32.xlu1 %v3034_v9, %s5254_s12 }
0x136d   :  { %2920 = vrot.lane.b32.xlu1 %v2918_v10, %s5254_s12 }
0x13d5   :  { %v3144_v11 = vpop.permute.xlu0 %3143 }
0x13d6   :  { %v3149_v13 = vsub.f32 %v5479_v44, %v3144_v11 }
0x13d7   :  { %v3146_v14 = vpop.permute.xlu1 %3145 }
0x13d8   :  { %v3151_v16 = vand.u32 2147483647, %v3149_v13  ;;  %v3150_v17 = vsub.f32 %v5482_v46, %v3146_v14  ;;  %v5052_v46 = vld [vmem:[#allocation4] sm:$0xff] }
0x13d9   :  { %v2955_v19 = vpop.permute.xlu0 %2954 }
0x13da   :  { %v3152_v20 = vand.u32 2147483647, %v3150_v17  ;;  %4814 = vmatmul.mubr.msk.f32.vlgmr.msra.gmra.mrb[30].mxu0 %vm175_vm1, %v2955_v19 }
0x13db   :  { %4822 = vmatpush3.xpose.msk.msra.mxu0 %vm175_vm1, %v3151_v16  ;;  %v3036_v21 = vpop.permute.xlu1 %3035  ;;  %4823 = vmatprep.mubr.msk.f32.mxu0 %vm5250_vm0, %v5249_v1 }
0x13dc   :  { %4819 = vmatmul.mubr.msk.f32.vlgmr.msra.gmra.mrb[30].mxu1 %vm175_vm1, %v3036_v21  ;;  %4831 = vmatprep.subr.mxu0 %v5249_v1 }
0x13dd   :  { %4827 = vmatpush3.xpose.msk.msra.mxu1 %vm175_vm1, %v3152_v20  ;;  %4828 = vmatprep.mubr.msk.f32.mxu1 %vm5250_vm0, %v5249_v1 }
0x13de   :  { %4824 = vmatmul.mubr.msk.f32.vlgmr.msra.gmra.mrb[32].mxu0 %vm175_vm1, %v5533_v7  ;;  %4836 = vmatprep.subr.mxu1 %v5249_v1 }
0x13df   :  { %v2921_v44 = vpop.permute.xlu1 %2920  ;;  %4832 = vmatpush3.msra.mxu0 %v5052_v46  ;;  %4833 = vmatprep.mubr.msk.f32.mxu0 %vm5250_vm0, %v5249_v1 }
0x13e0   :  { %4829 = vmatmul.mubr.msk.f32.vlgmr.msra.gmra.mrb[32].mxu1 %vm175_vm1, %v5533_v7  ;;  %v2923_v23 = vsel %vm697_vm6, %v2921_v44, 0.0  ;;  %4951 = vmatprep.subr.bf16.mxu0 %v5252_v58 }
0x13e1   :  { %2924 = vadd.xlane.f32.xlu0 %v2923_v23  ;;  %4837 = vmatpush3.msra.mxu1 %v5053_v25 }
0x13e2   :  { %4838 = vmatprep.mubr.msk.f32.mxu1 %vm5250_vm0, %v5249_v1  ;;  %4957 = vmatprep.subr.bf16.mxu1 %v5252_v58 }
0x146e   :  { %v2925_v27 = vpop.xlane.xlu0 %2924 }
0x146f   :  { %v3300_v28 = vrot.slane %v2925_v27, 1  ;;  %v3303_v31 = vadd.f32 %v2925_v27, %v5557_v18 }
0x1471   :  { %v3304_v36 = vadd.f32 %v3300_v28, %v5559_v22 }
0x14ad   :  { %v3027_v30 = vpop.f32.mrb[30].mxu0 }
0x14ae   :  { %v4815_v33 = vpop.f32.mrb[31].mxu0  ;;  %v3305_v35 = vadd.f32 %v3303_v31, %v3027_v30 }
0x14af   :  { %v3108_v34 = vpop.f32.mrb[30].mxu1 }
0x14b0   :  { %v4820_v37 = vpop.f32.mrb[31].mxu1  ;;  %v3306_v39 = vadd.f32 %v3304_v36, %v3108_v34 }
0x14b1   :  { %v3222_v38 = vpop.f32.mrb[32].mxu0 }
0x14b2   :  { %v3307_v40 = vadd.f32 %v3305_v35, %v3222_v38  ;;  %v4825_v41 = vpop.f32.mrb[33].mxu0  ;;  %v3666_v38 = vld [vmem:[#allocation4] sm:$0xff] }
0x14b3   :  { %v3295_v42 = vpop.f32.mrb[32].mxu1 }
0x14b4   :  { %v3308_v43 = vadd.f32 %v3306_v39, %v3295_v42  ;;  %v4830_v45 = vpop.f32.mrb[33].mxu1  ;;  %v3309_v48 = vadd.f32 %v3307_v40, %v5563_v26  ;;  %v3667_v40 = vld [vmem:[#allocation4 + $0x8] sm:$0xff] }
0x14b6   :  { %v3310_v47 = vadd.f32 %v3308_v43, %v5567_v32 }
0x14b8   :  { %v3313_v51 = vrot.slane %v3310_v47, 7 }
0x14ba   :  { %v3314_v52 = vsel %vm339_vm3, %v3313_v51, %v3309_v48 }
0x14bb   :  { %v3316_v59 = vsel %vm342_vm4, %v3314_v52, -inf }
0x14bc   :  { %3317 = vmax.xlane.f32.xlu1 %v3316_v59 }
0x1549   :  { %v3318_v5 = vpop.xlane.xlu1 %3317 }
0x154a   :  { %v3320_v49 = vrot.slane %v3318_v5, 1  ;;  %v3323_v60 = vsub.f32 %v3309_v48, %v3318_v5 }
0x154c   :  { %v3324_v61 = vsub.f32 %v3310_v47, %v3320_v49  ;;  %v3325_v62 = vmul.f32 1.442695, %v3323_v60 }
0x154e   :  { %v3327_v53 = vmul.f32 1.442695, %v3324_v61 }
0x1550   :  { %5034 = vpow2.f32 %v3327_v53 }
0x1551   :  { %5036 = vpow2.f32 %v3325_v62 }
0x155a   :  { %v5035_v55 = vpop.eup %5034 }
0x155b   :  { %v3331_v63 = vrot.slane %v5035_v55, 7  ;;  %v5037_v0 = vpop.eup %5036 }
0x155d   :  { %v3332_v3 = vsel %vm339_vm3, %v3331_v63, %v5037_v0 }
0x155e   :  { %v3334_v4 = vsel %vm342_vm4, %v3332_v3, 0.0 }
0x155f   :  { %3335 = vadd.xlane.f32.xlu0 %v3334_v4 }
0x1575   :  { %3566 = vrot.lane.b32.xlu0 %v5827_v56, %s5254_s12 }
0x15ec   :  { %v3336_v9 = vpop.xlane.xlu0 %3335 }
0x15ed   :  { %5038 = vrcp.f32 %v3336_v9 }
0x15f7   :  { %v5039_v10 = vpop.eup %5038 }
0x15f8   :  { %v3339_v11 = vrot.slane %v5039_v10, 1  ;;  %v3342_v13 = vmul.f32 %v5039_v10, %v5037_v0 }
0x15fa   :  { %4834 = vmatmul.mubr.msk.f32.vlgmr.msra.gmra.mrb[34].mxu0 %vm371_vm5, %v3342_v13  ;;  %v3343_v14 = vmul.f32 %v5035_v55, %v3339_v11 }
0x15fb   :  { %4953 = vmatpush3.bf16.msra.mxu0 %v5583_v2  ;;  %4849 = vmatprep.mubr.msk.f32.mxu0 %vm5250_vm0, %v5249_v1  ;;  %v3567_v2 = vpop.permute.xlu0 %3566 }
0x15fc   :  { %4839 = vmatmul.mubr.msk.f32.vlgmr.msra.gmra.mrb[34].mxu1 %vm371_vm5, %v3343_v14  ;;  %4954 = vmatprep.subr.bf16.mxu0 %v5252_v58 }
0x15fd   :  { %4959 = vmatpush3.bf16.msra.mxu1 %v5585_v8  ;;  %4860 = vmatprep.mubr.msk.f32.mxu1 %vm5250_vm0, %v5249_v1 }
0x15fe   :  { %4960 = vmatprep.subr.bf16.mxu1 %v5252_v58 }
0x15ff   :  { %4956 = vmatpush3.bf16.msra.mxu0 %v5614_v15 }
0x1600   :  { %4863 = vmatprep.subr.mxu0 %v5249_v1 }
0x1601   :  { %4962 = vmatpush3.bf16.msra.mxu1 %v5594_v12 }
0x1602   :  { %4868 = vmatprep.subr.mxu1 %v5249_v1 }
0x1604   :  { %4861 = vmatmul.mubr.msk.f32.vlgmr.msra.gmra.mrb[36].mxu1 %vm175_vm1, %v3567_v2 }
0x1605   :  { %4870 = vmatprep.mubr.msk.f32.mxu1 %vm5250_vm0, %v5249_v1 }
0x160a   :  { %4869 = vmatpush3.xpose.msk.msra.mxu1 %vm175_vm1, %v3667_v40 }
0x160b   :  { %4878 = vmatprep.subr.mxu1 %v5249_v1 }
0x16cd   :  { %v3413_v8 = vpop.f32.mrb[34].mxu0 }
0x16ce   :  { %v4835_v16 = vpop.f32.mrb[35].mxu0 }
0x16cf   :  { %v3486_v17 = vpop.f32.mrb[34].mxu1 }
0x16d0   :  { %v3492_v19 = vrot.slane %v3486_v17, 7  ;;  %v4840_v20 = vpop.f32.mrb[35].mxu1 }
0x16d2   :  { %v3493_v21 = vsel %vm339_vm3, %v3492_v19, %v3413_v8 }
0x16d3   :  { %4850 = vmatmul.mubr.msk.f32.vlgmr.msra.gmra.mrb[36].mxu0 %vm175_vm1, %v3493_v21 }
0x16d4   :  { %4865 = vmatprep.mubr.msk.f32.mxu0 %vm5250_vm0, %v5249_v1  ;;  %4864 = vmatpush3.xpose.msk.msra.mxu0 %vm175_vm1, %v3666_v38 }
0x16d5   :  { %4873 = vmatprep.subr.mxu0 %v5249_v1 }
0x16d7   :  { %v3636_v12 = vpop.f32.mrb[36].mxu1 }
0x16d8   :  { %v3637_v15 = vadd.f32 %v5627_v24, %v3636_v12  ;;  %v4862_v44 = vpop.f32.mrb[37].mxu1 }
0x16da   :  { %3648 = vrot.lane.b32.xlu1 %v3637_v15, %s5253_s27 }
0x174c   :  { %v3649_v34 = vpop.permute.xlu1 %3648 }
0x17a6   :  { %v3562_v46 = vpop.f32.mrb[36].mxu0 }
0x17a7   :  { %v3563_v23 = vadd.f32 %v5635_v29, %v3562_v46  ;;  %v4851_v25 = vpop.f32.mrb[37].mxu0 }
0x17a9   :  { %v3640_v27 = vadd.f32 %v3637_v15, %v3563_v23 }
0x17ab   :  { %v4489_v28 = vmul.f32 -1.442695, %v3640_v27 }
0x17ad   :  { %5040 = vpow2.f32 %v4489_v28 }
0x17b7   :  { %v5041_v30 = vpop.eup %5040 }
0x17b8   :  { %v3644_v31 = vadd.f32 1.0, %v5041_v30 }
0x17ba   :  { %5042 = vrcp.f32 %v3644_v31 }
0x17c4   :  { %v5043_v33 = vpop.eup %5042 }
0x17c5   :  { %v3651_v35 = vmul.f32 %v5043_v33, %v3649_v34  ;;  %v3658_v29 = vsub.f32 1.0, %v5043_v33  ;;  %v3664_v41 = vmul.f32 %v5043_v33, %v5827_v56 }
0x17c7   :  { %3653 = vrot.lane.b32.xlu1 %v3651_v35, %s5253_s27 }
0x1839   :  { %v3654_v36 = vpop.permute.xlu1 %3653 }
0x183a   :  { %v3656_v24 = vadd.f32 %v3654_v36, %v3563_v23 }
0x183c   :  { %5044 = vtanh.f32 %v3656_v24 }
0x1846   :  { %v5045_v37 = vpop.eup %5044 }
0x1847   :  { %3660 = vrot.lane.b32.xlu0 %v5045_v37, %s5254_s12 }
0x18b9   :  { %v3661_v39 = vpop.permute.xlu0 %3660 }
0x18ba   :  { %v3663_v42 = vmul.f32 %v3661_v39, %v3658_v29  ;;  %v4244_v39 = vld [vmem:[#allocation12 + $0x20] sm:$0xff] }
0x18bc   :  { %v5913_v43 = vadd.f32 %v3664_v41, %v3663_v42  ;;  %v4240_v41 = vld [vmem:[#allocation12] sm:$0xff]  ;;  %v4241_v42 = vld [vmem:[#allocation12 + $0x8] sm:$0xff] }
0x18be   :  { %v3869_v45 = vrot.slane %v5913_v43, %v5451_v6  ;;  %v3676_v47 = vmul.f32 %v5913_v43, %v5644_v54  ;;  %v3668_v53 = vmul.f32 %v5913_v43, %v5678_v57 }
0x18c0   :  { %v3877_v48 = vrot.slane %v3869_v45, %v5451_v6  ;;  %v3870_v51 = vcombine.high %v3869_v45, %v3869_v45  ;;  %v3684_v52 = vrot.slane %v3676_v47, %v5451_v6 }
0x18c2   :  { %v3888_v56 = vrot.slane %v3877_v48, %v5514_v50  ;;  %v3884_v59 = vrot.slane %v3870_v51, %v5451_v6  ;;  %v3692_v5 = vrot.slane %v3684_v52, %v5451_v6  ;;  %v3685_v49 = vcombine.high %v3684_v52, %v3684_v52  ;;  %v4246_v52 = vld [vmem:[#allocation12 + $0x30] sm:$0xff] }
0x18c4   :  { %3893 = vrot.lane.b32.xlu0 %v3888_v56, %s5254_s12  ;;  %v3892_v60 = vrot.slane %v3884_v59, %v5514_v50  ;;  %v3699_v61 = vrot.slane %v3685_v49, %v5451_v6  ;;  %v3703_v54 = vrot.slane %v3692_v5, %v5514_v50  ;;  %v4247_v56 = vld [vmem:[#allocation12 + $0x38] sm:$0xff]  ;;  %v4970_v59 = vpack.c.bf16 %v4241_v42, %v4240_v41 }
0x18c5   :  { %v4967_v49 = vpack.c.bf16 %v4247_v56, %v4246_v52 }
0x18c6   :  { %3895 = vrot.lane.b32.xlu1 %v3892_v60, %s5254_s12  ;;  %v3784_v62 = vrot.slane %v3699_v61, %v5514_v50  ;;  %v4242_v60 = vld [vmem:[#allocation12 + $0x10] sm:$0xff]  ;;  %v4243_v61 = vld [vmem:[#allocation12 + $0x18] sm:$0xff] }
0x18c8   :  { %3704 = vrot.lane.b32.xlu0 %v3703_v54, %s5254_s12  ;;  %v4973_v54 = vpack.c.bf16 %v4243_v61, %v4242_v60 }
0x18ca   :  { %3785 = vrot.lane.b32.xlu1 %v3784_v62, %s5254_s12 }
0x18ce   :  { %3670 = vrot.lane.b32.xlu1 %v3668_v53, %s5254_s12 }
0x1936   :  { %v3894_v55 = vpop.permute.xlu0 %3893 }
0x1937   :  { %v3899_v63 = vsub.f32 %v3666_v38, %v3894_v55 }
0x1938   :  { %v3896_v0 = vpop.permute.xlu1 %3895 }
0x1939   :  { %v3901_v3 = vand.u32 2147483647, %v3899_v63  ;;  %v3900_v6 = vsub.f32 %v3667_v40, %v3896_v0 }
0x193a   :  { %v3705_v4 = vpop.permute.xlu0 %3704 }
0x193b   :  { %v3902_v9 = vand.u32 2147483647, %v3900_v6  ;;  %4866 = vmatmul.mubr.msk.f32.vlgmr.msra.gmra.mrb[38].mxu0 %vm175_vm1, %v3705_v4  ;;  %v4502_v4 = vld [vmem:[#allocation13] ss:$0 sm:$0xff] }
0x193c   :  { %4874 = vmatpush3.xpose.msk.msra.mxu0 %vm175_vm1, %v3901_v3  ;;  %v3786_v10 = vpop.permute.xlu1 %3785  ;;  %4875 = vmatprep.mubr.msk.f32.mxu0 %vm5250_vm0, %v5249_v1 }
0x193d   :  { %4871 = vmatmul.mubr.msk.f32.vlgmr.msra.gmra.mrb[38].mxu1 %vm175_vm1, %v3786_v10  ;;  %4883 = vmatprep.subr.mxu0 %v5249_v1 }
0x193e   :  { %4879 = vmatpush3.xpose.msk.msra.mxu1 %vm175_vm1, %v3902_v9  ;;  %4880 = vmatprep.mubr.msk.f32.mxu1 %vm5250_vm0, %v5249_v1 }
0x193f   :  { %4876 = vmatmul.mubr.msk.f32.vlgmr.msra.gmra.mrb[40].mxu0 %vm175_vm1, %v5533_v7  ;;  %4888 = vmatprep.subr.mxu1 %v5249_v1 }
0x1940   :  { %v3671_v50 = vpop.permute.xlu1 %3670  ;;  %4884 = vmatpush3.msra.mxu0 %v3666_v38  ;;  %4885 = vmatprep.mubr.msk.f32.mxu0 %vm5250_vm0, %v5249_v1 }
0x1941   :  { %4881 = vmatmul.mubr.msk.f32.vlgmr.msra.gmra.mrb[40].mxu1 %vm175_vm1, %v5533_v7  ;;  %v3673_v57 = vsel %vm697_vm6, %v3671_v50, 0.0  ;;  %4963 = vmatprep.subr.bf16.mxu0 %v5252_v58 }
0x1942   :  { %3674 = vadd.xlane.f32.xlu0 %v3673_v57  ;;  %4889 = vmatpush3.msra.mxu1 %v3667_v40  ;;  %v4245_v40 = vld [vmem:[#allocation12 + $0x28] sm:$0xff] }
0x1943   :  { %4890 = vmatprep.mubr.msk.f32.mxu1 %vm5250_vm0, %v5249_v1  ;;  %4969 = vmatprep.subr.bf16.mxu1 %v5252_v58  ;;  %v4964_v47 = vpack.c.bf16 %v4245_v40, %v4244_v39 }
0x19cf   :  { %v3675_v11 = vpop.xlane.xlu0 %3674 }
0x19d0   :  { %v4050_v13 = vrot.slane %v3675_v11, 1  ;;  %v4053_v2 = vadd.f32 %v3675_v11, %v5557_v18 }
0x19d2   :  { %v4054_v7 = vadd.f32 %v4050_v13, %v5559_v22 }
0x1a0e   :  { %v3777_v14 = vpop.f32.mrb[38].mxu0 }
0x1a0f   :  { %v4867_v8 = vpop.f32.mrb[39].mxu0  ;;  %v4055_v17 = vadd.f32 %v4053_v2, %v3777_v14 }
0x1a10   :  { %v3858_v16 = vpop.f32.mrb[38].mxu1 }
0x1a11   :  { %v4872_v19 = vpop.f32.mrb[39].mxu1  ;;  %v4056_v21 = vadd.f32 %v4054_v7, %v3858_v16 }
0x1a12   :  { %v3972_v20 = vpop.f32.mrb[40].mxu0 }
0x1a13   :  { %v4057_v12 = vadd.f32 %v4055_v17, %v3972_v20  ;;  %v4877_v15 = vpop.f32.mrb[41].mxu0 }
0x1a14   :  { %v4045_v44 = vpop.f32.mrb[40].mxu1 }
0x1a15   :  { %v4058_v46 = vadd.f32 %v4056_v21, %v4045_v44  ;;  %v4882_v23 = vpop.f32.mrb[41].mxu1  ;;  %v4059_v27 = vadd.f32 %v4057_v12, %v5563_v26 }
0x1a17   :  { %v4060_v25 = vadd.f32 %v4058_v46, %v5567_v32 }
0x1a19   :  { %v4063_v28 = vrot.slane %v4060_v25, 7 }
0x1a1b   :  { %v4064_v18 = vsel %vm339_vm3, %v4063_v28, %v4059_v27 }
0x1a1c   :  { %v4066_v30 = vsel %vm342_vm4, %v4064_v18, -inf }
0x1a1d   :  { %4067 = vmax.xlane.f32.xlu1 %v4066_v30 }
0x1aaa   :  { %v4068_v31 = vpop.xlane.xlu1 %4067 }
0x1aab   :  { %v4070_v22 = vrot.slane %v4068_v31, 1  ;;  %v4073_v33 = vsub.f32 %v4059_v27, %v4068_v31 }
0x1aad   :  { %v4074_v34 = vsub.f32 %v4060_v25, %v4070_v22  ;;  %v4075_v35 = vmul.f32 1.442695, %v4073_v33 }
0x1aaf   :  { %v4077_v36 = vmul.f32 1.442695, %v4074_v34 }
0x1ab1   :  { %5046 = vpow2.f32 %v4077_v36 }
0x1ab2   :  { %5048 = vpow2.f32 %v4075_v35 }
0x1abb   :  { %v5047_v24 = vpop.eup %5046 }
0x1abc   :  { %v4081_v37 = vrot.slane %v5047_v24, 7  ;;  %v5049_v38 = vpop.eup %5048 }
0x1abe   :  { %v4082_v32 = vsel %vm339_vm3, %v4081_v37, %v5049_v38 }
0x1abf   :  { %v4084_v26 = vsel %vm342_vm4, %v4082_v32, 0.0 }
0x1ac0   :  { %4085 = vadd.xlane.f32.xlu0 %v4084_v26 }
0x1ad6   :  { %4248 = vrot.lane.b32.xlu0 %v5913_v43, %s5254_s12 }
0x1b4d   :  { %v4086_v29 = vpop.xlane.xlu0 %4085 }
0x1b4e   :  { %5050 = vrcp.f32 %v4086_v29 }
0x1b51   :  { %v4249_v43 = vpop.permute.xlu0 %4248 }
0x1b58   :  { %v5051_v45 = vpop.eup %5050 }
0x1b59   :  { %v4089_v48 = vrot.slane %v5051_v45, 1  ;;  %v4092_v51 = vmul.f32 %v5051_v45, %v5049_v38 }
0x1b5b   :  { %4886 = vmatmul.mubr.msk.f32.vlgmr.msra.gmra.mrb[42].mxu0 %vm371_vm5, %v4092_v51  ;;  %v4093_v5 = vmul.f32 %v5047_v24, %v4089_v48 }
0x1b5c   :  { %4965 = vmatpush3.bf16.msra.mxu0 %v4964_v47  ;;  %4901 = vmatprep.mubr.msk.f32.mxu0 %vm5250_vm0, %v5249_v1 }
0x1b5d   :  { %4891 = vmatmul.mubr.msk.f32.vlgmr.msra.gmra.mrb[42].mxu1 %vm371_vm5, %v4093_v5  ;;  %4966 = vmatprep.subr.bf16.mxu0 %v5252_v58 }
0x1b5e   :  { %4971 = vmatpush3.bf16.msra.mxu1 %v4970_v59  ;;  %4912 = vmatprep.mubr.msk.f32.mxu1 %vm5250_vm0, %v5249_v1 }
0x1b5f   :  { %4972 = vmatprep.subr.bf16.mxu1 %v5252_v58 }
0x1b60   :  { %4968 = vmatpush3.bf16.msra.mxu0 %v4967_v49 }
0x1b62   :  { %4974 = vmatpush3.bf16.msra.mxu1 %v4973_v54 }
0x1b63   :  { %4902 = vmatmul.mubr.msk.f32.vlgmr.msra.gmra.mrb[44].mxu0 %vm175_vm1, %v4249_v43 }
0x1c2e   :  { %v4163_v62 = vpop.f32.mrb[42].mxu0 }
0x1c2f   :  { %v4887_v53 = vpop.f32.mrb[43].mxu0 }
0x1c30   :  { %v4236_v55 = vpop.f32.mrb[42].mxu1 }
0x1c31   :  { %v4324_v63 = vrot.slane %v4236_v55, 7  ;;  %v4892_v0 = vpop.f32.mrb[43].mxu1 }
0x1c33   :  { %v4325_v3 = vsel %vm339_vm3, %v4324_v63, %v4163_v62 }
0x1c34   :  { %4913 = vmatmul.mubr.msk.f32.vlgmr.msra.gmra.mrb[44].mxu1 %vm175_vm1, %v4325_v3 }
0x1c36   :  { %v4318_v1 = vpop.f32.mrb[44].mxu0 }
0x1c37   :  { %v4903_v6 = vpop.f32.mrb[45].mxu0 }
0x1d07   :  { %v4394_v58 = vpop.f32.mrb[44].mxu1 }
0x1d08   :  { %v4395_v9 = vadd.f32 %v4394_v58, %v4318_v1  ;;  %v4914_v10 = vpop.f32.mrb[45].mxu1 }
0x1d0a   :  { %v4405_v50 = vadd.f32 %v4502_v4, %v4395_v9 }
0x1d0c   :  { %4406 = vst [vmem:[#allocation16] sm:$0x3] %v4405_v50 }
0x1d0d   :  { %5219 = shalt.err (!%p5216_p4)
}
0x1d0e   :  { %s5220_s8 = scalar_lea.hbm %s6003_s14, 32 }
0x1d0f   :  { %p5221_p5 = scmp.ne.s32.totalorder %s6003_s14, %s5220_s8  ;;  %p5224_p6 = scmp.lt.u32.totalorder %s5220_s8, %s6003_s14 }
0x1d11   :  { %p5226_p7 = pnand %p5224_p6, %p5221_p5 }
0x1d13   :  { %5229 = shalt.err (!%p5226_p7)
}
0x1d14   :  { %4416 = dma.vmem_to_hbm [thread:$0]  %s4414_s28, 32, %s6003_s14, [#allocation6]  }
0x1d15   :  { %5238 = dma.done.wait [#allocation6], 32  }
0x1d16   :  { %5239 = vsyncadd [#allocation6], 4294967264 }
0x1d17   :  { %4420 = vsyncpa [#allocation5], 1 }
0x1d18   :  { %4421 = vsyncpa [#allocation8], 1 }
0x1d19   :  { %4422 = vsyncpa [#allocation11], 1 }
0x1d1a   :  { %4423 = vsyncpa [#allocation14], 1 }
0x1d1b   :  { %4424 = vsyncpa [#allocation6], 1 }

// kernel: tpu_custom_call.1
= control target key start
LH: loop header
LB: loop body
LE: loop exit
PB: predicated region body
PF: predicated region fallthrough
CT: control target
= control target key end

     0   :  { %21 = vsyncpa [#allocation5], 0  ;;  %s5989_s0 = inlined_call_operand.hbm [shape: f32[2,8,32], index: 0, kind: input, shape index: {}]   ;;  %s5990_s1 = inlined_call_operand.hbm [shape: f32[2,8,32], index: 1, kind: input, shape index: {}]   ;;  %s5991_s2 = inlined_call_operand.hbm [shape: f32[2,8], index: 2, kind: input, shape index: {}]   ;;  %s5992_s3 = inlined_call_operand.hbm [shape: f32[2,8], index: 3, kind: input, shape index: {}]   ;;  %s5993_s4 = inlined_call_operand.vmem [shape: f32[1,32], index: 4, kind: input, shape index: {}]   ;;  %s5994_s5 = inlined_call_operand.<no memory space> [shape: f32[1,1], index: 5, kind: input, shape index: {}]   ;;  %s5995_s6 = inlined_call_operand.vmem [shape: f32[4,32], index: 6, kind: input, shape index: {}]   ;;  %s5996_s7 = inlined_call_operand.<no memory space> [shape: f32[1,1], index: 7, kind: input, shape index: {}]   ;;  %s5997_s8 = inlined_call_operand.hbm [shape: f32[64,128], index: 8, kind: input, shape index: {}]   ;;  %s5998_s9 = inlined_call_operand.hbm [shape: f32[1,128], index: 9, kind: input, shape index: {}]   ;;  %s5999_s10 = inlined_call_operand.vmem [shape: f32[32,96], index: 10, kind: input, shape index: {}]   ;;  %s6000_s11 = inlined_call_operand.hbm [shape: f32[32,96], index: 11, kind: input, shape index: {}]   ;;  %s6001_s12 = inlined_call_operand.vmem [shape: f32[1,96], index: 12, kind: input, shape index: {}]   ;;  %s6002_s13 = inlined_call_operand.vmem [shape: f32[1,96], index: 13, kind: input, shape index: {}]   ;;  %s6003_s14 = inlined_call_operand.hbm [shape: f32[2,128], index: 14, kind: output, shape index: {}]  }
   0x1   :  { %22 = vsyncpa [#allocation8], 0 }
   0x2   :  { %23 = vsyncpa [#allocation11], 0 }
   0x3   :  { %24 = vsyncpa [#allocation14], 0 }
   0x4   :  { %25 = vsyncpa [#allocation6], 0  ;;  %s5240_s29 = smov [#allocation7]   ;;  %s5241_s15 = smov [#allocation10]  }
   0x5   :  { %s43_s30 = sshll.u32 %s5240_s29, 4  ;;  %s66_s16 = sshll.u32 %s5241_s15, 4  ;;  %s44_s30 = int_to_ptr.vmem [resolvable:$true] %s43_s30  ;;  %s67_s16 = int_to_ptr.vmem [resolvable:$true] %s66_s16 }
   0x6   :  { %s5054_s19 = scalar_lea.hbm %s5990_s1, 256 }
   0x7   :  { %p5055_p0 = scmp.ne.s32.totalorder %s5990_s1, %s5054_s19  ;;  %p5058_p1 = scmp.lt.u32.totalorder %s5054_s19, %s5990_s1 }
   0x9   :  { %p5060_p2 = pnand %p5058_p1, %p5055_p0 }
   0xb   :  { %5063 = shalt.err (!%p5060_p2)
}
   0xc   :  { %s5064_s24 = scalar_lea.vmem %s44_s30, 256  ;;  %p5069_p4 = scmp.lt.s32.totalorder %s44_s30, %s44_s30 }
   0xd   :  { %p5065_p3 = scmp.ne.s32.totalorder %s44_s30, %s5064_s24  ;;  %p5070_p5 = scmp.lt.s32.totalorder %s5064_s24, %s5064_s24 }
   0xf   :  { %p5071_p6 = por %p5070_p5, %p5069_p4 }
  0x11   :  { %p5072_p7 = pnand %p5071_p6, %p5065_p3 }
  0x13   :  { %5075 = shalt.err (!%p5072_p7)
}
  0x14   :  { %s5242_s25 = smov 128   ;;  %s5243_s26 = smov 8  }
  0x15   :  { %49 = dma.hbm_to_vmem [thread:$0]  %s5990_s1, 256, %s44_s30, [#allocation8], %s5242_s25, %s5242_s25, %s5243_s26  }
  0x16   :  { %s5076_s17 = scalar_lea.hbm %s5992_s3, 32 }
  0x17   :  { %p5077_p8 = scmp.ne.s32.totalorder %s5992_s3, %s5076_s17  ;;  %p5080_p9 = scmp.lt.u32.totalorder %s5076_s17, %s5992_s3 }
  0x19   :  { %p5082_p10 = pnand %p5080_p9, %p5077_p8 }
  0x1b   :  { %5085 = shalt.err (!%p5082_p10)
}
  0x1c   :  { %s5086_s22 = scalar_lea.vmem %s67_s16, 32  ;;  %p5091_p12 = scmp.lt.s32.totalorder %s67_s16, %s67_s16 }
  0x1d   :  { %p5087_p11 = scmp.ne.s32.totalorder %s67_s16, %s5086_s22  ;;  %p5092_p13 = scmp.lt.s32.totalorder %s5086_s22, %s5086_s22 }
  0x1f   :  { %p5093_p0 = por %p5092_p13, %p5091_p12 }
  0x21   :  { %p5094_p1 = pnand %p5093_p0, %p5087_p11 }
  0x23   :  { %5097 = shalt.err (!%p5094_p1)
}
  0x24   :  { %69 = dma.hbm_to_vmem [thread:$0]  %s5992_s3, 32, %s67_s16, [#allocation11]  }
  0x25   :  { %s5244_s23 = smov [#allocation13]   ;;  %s5245_s27 = smov [#allocation4]  }
  0x26   :  { %s96_s24 = sshll.u32 %s5244_s23, 4  ;;  %s31_s28 = sshll.u32 %s5245_s27, 4  ;;  %s97_s24 = int_to_ptr.vmem [resolvable:$true] %s96_s24  ;;  %s5359_s28 = int_to_ptr.vmem [resolvable:$true] %s31_s28 }
  0x27   :  { %s5098_s17 = scalar_lea.hbm %s5998_s9, 16 }
  0x28   :  { %p5099_p2 = scmp.ne.s32.totalorder %s5998_s9, %s5098_s17  ;;  %p5102_p3 = scmp.lt.u32.totalorder %s5098_s17, %s5998_s9 }
  0x2a   :  { %p5104_p4 = pnand %p5102_p3, %p5099_p2 }
  0x2c   :  { %5107 = shalt.err (!%p5104_p4)
}
  0x2d   :  { %s5108_s3 = scalar_lea.vmem %s97_s24, 16  ;;  %s5112_s16 = scalar_lea.vmem %s97_s24, 32 }
  0x2e   :  { %p5109_p5 = scmp.ne.s32.totalorder %s97_s24, %s5108_s3  ;;  %p5113_p6 = scmp.lt.s32.totalorder %s97_s24, %s97_s24 }
  0x2f   :  { %p5114_p7 = scmp.lt.s32.totalorder %s5112_s16, %s5108_s3 }
  0x31   :  { %p5115_p8 = por %p5114_p7, %p5113_p6 }
  0x33   :  { %p5116_p9 = pnand %p5115_p8, %p5109_p5 }
  0x35   :  { %5119 = shalt.err (!%p5116_p9)
}
  0x36   :  { %99 = dma.hbm_to_vmem [thread:$0]  %s5998_s9, 16, %s97_s24, [#allocation14]  }
  0x37   :  { %s5120_s27 = scalar_lea.hbm %s5989_s0, 256 }
  0x38   :  { %p5121_p10 = scmp.ne.s32.totalorder %s5989_s0, %s5120_s27  ;;  %p5124_p11 = scmp.lt.u32.totalorder %s5120_s27, %s5989_s0 }
  0x3a   :  { %p5126_p12 = pnand %p5124_p11, %p5121_p10 }
  0x3c   :  { %5129 = shalt.err (!%p5126_p12)
}
  0x3d   :  { %s5130_s19 = scalar_lea.vmem %s5359_s28, 256  ;;  %p5135_p0 = scmp.lt.s32.totalorder %s5359_s28, %s5359_s28 }
  0x3e   :  { %p5131_p13 = scmp.ne.s32.totalorder %s5359_s28, %s5130_s19  ;;  %p5136_p1 = scmp.lt.s32.totalorder %s5130_s19, %s5130_s19 }
  0x40   :  { %p5137_p2 = por %p5136_p1, %p5135_p0 }
  0x42   :  { %p5138_p3 = pnand %p5137_p2, %p5131_p13 }
  0x44   :  { %5141 = shalt.err (!%p5138_p3)
}
  0x45   :  { %37 = dma.hbm_to_vmem [thread:$0]  %s5989_s0, 256, %s5359_s28, [#allocation5], %s5242_s25, %s5242_s25, %s5243_s26  }
  0x46   :  { %s5246_s20 = smov [#allocation9]   ;;  %s5247_s3 = smov [#allocation12]  }
  0x47   :  { %s56_s21 = sshll.u32 %s5246_s20, 4  ;;  %s83_s16 = sshll.u32 %s5247_s3, 4  ;;  %s57_s21 = int_to_ptr.vmem [resolvable:$true] %s56_s21  ;;  %s5393_s16 = int_to_ptr.vmem [resolvable:$true] %s83_s16 }
  0x48   :  { %s5142_s30 = scalar_lea.hbm %s5991_s2, 32 }
  0x49   :  { %p5143_p4 = scmp.ne.s32.totalorder %s5991_s2, %s5142_s30  ;;  %p5146_p5 = scmp.lt.u32.totalorder %s5142_s30, %s5991_s2 }
  0x4b   :  { %p5148_p6 = pnand %p5146_p5, %p5143_p4 }
  0x4d   :  { %5151 = shalt.err (!%p5148_p6)
}
  0x4e   :  { %s5152_s0 = scalar_lea.vmem %s57_s21, 32  ;;  %p5157_p8 = scmp.lt.s32.totalorder %s57_s21, %s57_s21 }
  0x4f   :  { %p5153_p7 = scmp.ne.s32.totalorder %s57_s21, %s5152_s0  ;;  %p5158_p9 = scmp.lt.s32.totalorder %s5152_s0, %s5152_s0 }
  0x51   :  { %p5159_p10 = por %p5158_p9, %p5157_p8 }
  0x53   :  { %p5160_p11 = pnand %p5159_p10, %p5153_p7 }
  0x55   :  { %5163 = shalt.err (!%p5160_p11)
}
  0x56   :  { %59 = dma.hbm_to_vmem [thread:$0]  %s5991_s2, 32, %s57_s21, [#allocation8]  }
  0x57   :  { %s5164_s9 = scalar_lea.hbm %s5997_s8, 1024 }
  0x58   :  { %p5165_p12 = scmp.ne.s32.totalorder %s5997_s8, %s5164_s9  ;;  %p5168_p13 = scmp.lt.u32.totalorder %s5164_s9, %s5997_s8 }
  0x5a   :  { %p5170_p0 = pnand %p5168_p13, %p5165_p12 }
  0x5c   :  { %5173 = shalt.err (!%p5170_p0)
}
  0x5d   :  { %s5174_s1 = scalar_lea.vmem %s5393_s16, 1024  ;;  %p5179_p2 = scmp.lt.s32.totalorder %s5393_s16, %s5393_s16 }
  0x5e   :  { %p5175_p1 = scmp.ne.s32.totalorder %s5393_s16, %s5174_s1  ;;  %p5180_p3 = scmp.lt.s32.totalorder %s5174_s1, %s5174_s1 }
  0x60   :  { %p5181_p4 = por %p5180_p3, %p5179_p2 }
  0x62   :  { %p5182_p5 = pnand %p5181_p4, %p5175_p1 }
  0x64   :  { %5185 = shalt.err (!%p5182_p5)
}
  0x65   :  { %89 = dma.hbm_to_vmem [thread:$0]  %s5997_s8, 1024, %s5393_s16, [#allocation11], %s5242_s25, %s5242_s25, %s5243_s26  }
  0x66   :  { %s5248_s30 = smov [#allocation15]   ;;  %s5186_s15 = scalar_lea.hbm %s6000_s11, 512 }
  0x67   :  { %s107_s23 = sshll.u32 %s5248_s30, 4  ;;  %p5187_p6 = scmp.ne.s32.totalorder %s6000_s11, %s5186_s15  ;;  %s108_s23 = int_to_ptr.vmem [resolvable:$true] %s107_s23 }
  0x68   :  { %p5190_p7 = scmp.lt.u32.totalorder %s5186_s15, %s6000_s11 }
  0x6a   :  { %p5192_p8 = pnand %p5190_p7, %p5187_p6 }
  0x6c   :  { %5195 = shalt.err (!%p5192_p8)
}
  0x6d   :  { %s5196_s19 = scalar_lea.vmem %s108_s23, 512  ;;  %p5201_p10 = scmp.lt.s32.totalorder %s108_s23, %s108_s23 }
  0x6e   :  { %p5197_p9 = scmp.ne.s32.totalorder %s108_s23, %s5196_s19  ;;  %p5202_p11 = scmp.lt.s32.totalorder %s5196_s19, %s5196_s19 }
  0x70   :  { %p5203_p12 = por %p5202_p11, %p5201_p10 }
  0x72   :  { %p5204_p13 = pnand %p5203_p12, %p5197_p9 }
  0x74   :  { %5207 = shalt.err (!%p5204_p13)
}
  0x75   :  { %113 = dma.hbm_to_vmem [thread:$0]  %s6000_s11, 512, %s108_s23, [#allocation14], %s5242_s25, %s5242_s25, %s5243_s26  }
  0x76   :  { %5230 = dma.done.wait [#allocation5], 256  }
  0x77   :  { %5231 = vsyncadd [#allocation5], 4294967040 }
  0x78   :  { %5232 = dma.done.wait [#allocation8], 288  }
  0x79   :  { %5233 = vsyncadd [#allocation8], 4294967008 }
  0x7a   :  { %5234 = dma.done.wait [#allocation11], 1056  }
  0x7b   :  { %5235 = vsyncadd [#allocation11], 4294966240 }
  0x7c   :  { %5236 = dma.done.wait [#allocation14], 528  }
  0x7d   :  { %5237 = vsyncadd [#allocation14], 4294966768  ;;  %v156_v0 = vlaneseq  ;;  %v5249_v1 = vmov 0.0   ;;  %vm5250_vm0 = vmmov 0   ;;  %v5251_v2 = vmov 1966171168  }
  0x7e   :  { %4630 = vmatprep.subr.mxu1 %v5249_v1  ;;  %4625 = vmatprep.subr.mxu0 %v5249_v1  ;;  %v154_v3 = vunpack.c.l.s4 %v5251_v2  ;;  %vm175_vm1 = vcmask 261120   ;;  %v146_v7 = vld [vmem:[#allocation7 + $0x8] sm:$0xff]  ;;  %v145_v8 = vld [vmem:[#allocation7] sm:$0xff]  ;;  %v4425_v9 = vld [vmem:[%s5993_s4] ss:$0 sm:$0xff]  ;;  %v327_v16 = vstv %s5994_s5  ;;  %vm339_vm3 = vcmask 1041409  }
  0x7f   :  { %4632 = vmatprep.mubr.msk.f32.mxu1 %vm5250_vm0, %v5249_v1  ;;  %4627 = vmatprep.mubr.msk.f32.mxu0 %vm5250_vm0, %v5249_v1  ;;  %v5448_v4 = vshrl.u32 %v156_v0, 7  ;;  %v142_v14 = vld [vmem:[#allocation10] sm:$0x3]  ;;  %vm342_vm4 = vcmask 58368   ;;  %vm371_vm5 = vcmask 64512   ;;  %v5482_v46 = vld [vmem:[#allocation4 + $0x8] sm:$0xff] }
  0x80   :  { %v155_v5 = vunpack.c.0.s8 %v154_v3  ;;  %4631 = vmatpush3.xpose.msk.msra.mxu1 %vm175_vm1, %v146_v7  ;;  %4626 = vmatpush3.xpose.msk.msra.mxu0 %vm175_vm1, %v145_v8  ;;  %vm143_vm2 = vcmp.gt.f32.partialorder %v142_v14, 0.0  ;;  %v5479_v44 = vld [vmem:[#allocation4] sm:$0xff]  ;;  %vm697_vm6 = vcmask 254976   ;;  %s5253_s27 = smov 64   ;;  %s5256_s0 = smov [#allocation16]  }
  0x81   :  { %4635 = vmatprep.subr.mxu0 %v5249_v1  ;;  %4640 = vmatprep.subr.mxu1 %v5249_v1  ;;  %v144_v15 = vsel %vm143_vm2, -inf, %v5249_v1  ;;  %v518_v47 = vld [vmem:[%s5995_s6] sm:$0xf]  ;;  %v703_v48 = vsub.s32 2, %v5448_v4  ;;  %v5514_v50 = vsub.s32 0, %v5448_v4  ;;  %v688_v51 = vsub.s32 1, %v5448_v4 }
  0x82   :  { %v5451_v6 = vsub.s32 %v155_v5, %v5448_v4  ;;  %v331_v18 = vrot.slane %v144_v15, 1  ;;  %s4413_s28 = sshll.u32 %s5256_s0, 4  ;;  %s4414_s28 = int_to_ptr.vmem [resolvable:$true] %s4413_s28 }
  0x83   :  { %v5511_v49 = vrot.slane %v518_v47, %v703_v48  ;;  %v5519_v57 = vrot.slane %v518_v47, %v688_v51  ;;  %s5208_s17 = scalar_lea.vmem %s4414_s28, 32  ;;  %p5213_p1 = scmp.lt.s32.totalorder %s4414_s28, %s4414_s28 }
  0x84   :  { %v159_v10 = vrot.slane %v4425_v9, %v5451_v6  ;;  %p5209_p0 = scmp.ne.s32.totalorder %s4414_s28, %s5208_s17  ;;  %p5214_p2 = scmp.lt.s32.totalorder %s5208_s17, %s5208_s17 }
  0x86   :  { %v160_v11 = vcombine.high %v159_v10, %v159_v10  ;;  %v167_v12 = vrot.slane %v159_v10, %v5451_v6  ;;  %p5215_p3 = por %p5214_p2, %p5213_p1 }
  0x88   :  { %v174_v13 = vrot.slane %v160_v11, %v5451_v6  ;;  %4628 = vmatmul.mubr.msk.f32.vlgmr.msra.gmra.mrb[0].mxu0 %vm175_vm1, %v167_v12  ;;  %p5216_p4 = pnand %p5215_p3, %p5209_p0 }
  0x89   :  { %4636 = vmatpush3.msra.mxu0 %v145_v8  ;;  %4637 = vmatprep.mubr.msk.f32.mxu0 %vm5250_vm0, %v5249_v1 }
  0x8a   :  { %4633 = vmatmul.mubr.msk.f32.vlgmr.msra.gmra.mrb[0].mxu1 %vm175_vm1, %v174_v13  ;;  %4645 = vmatprep.subr.mxu0 %v5249_v1 }
  0x8b   :  { %4641 = vmatpush3.msra.mxu1 %v146_v7  ;;  %4642 = vmatprep.mubr.msk.f32.mxu1 %vm5250_vm0, %v5249_v1  ;;  %v5533_v7 = vrot.slane %v518_v47, 3 }
  0x8c   :  { %4650 = vmatprep.subr.mxu1 %v5249_v1 }
 0x15b   :  { %v247_v17 = vpop.f32.mrb[0].mxu0 }
 0x15c   :  { %v328_v19 = vadd.f32 %v327_v16, %v247_v17  ;;  %v4629_v20 = vpop.f32.mrb[1].mxu0  ;;  %v139_v17 = vld [vmem:[#allocation9] sm:$0x3] }
 0x15d   :  { %v322_v21 = vpop.f32.mrb[0].mxu1  ;;  %vm140_vm7 = vcmp.gt.f32.partialorder %v139_v17, 0.0 }
 0x15e   :  { %v329_v22 = vadd.f32 %v327_v16, %v322_v21  ;;  %v4634_v23 = vpop.f32.mrb[1].mxu1  ;;  %v334_v25 = vadd.f32 %v328_v19, %v144_v15  ;;  %v671_v15 = vstv %s5996_s7 }
 0x160   :  { %v335_v24 = vadd.f32 %v331_v18, %v329_v22 }
 0x162   :  { %v338_v26 = vrot.slane %v335_v24, 7 }
 0x164   :  { %v340_v27 = vsel %vm339_vm3, %v338_v26, %v334_v25  ;;  %v5563_v26 = vsel %vm140_vm7, -inf, %v5249_v1 }
 0x165   :  { %v343_v28 = vsel %vm342_vm4, %v340_v27, -inf }
 0x166   :  { %344 = vmax.xlane.f32.xlu0 %v343_v28 }
 0x1f3   :  { %v345_v29 = vpop.xlane.xlu0 %344 }
 0x1f4   :  { %v347_v30 = vrot.slane %v345_v29, 1  ;;  %v350_v31 = vsub.f32 %v334_v25, %v345_v29 }
 0x1f6   :  { %v351_v32 = vsub.f32 %v335_v24, %v347_v30  ;;  %v352_v33 = vmul.f32 1.442695, %v350_v31 }
 0x1f8   :  { %v354_v34 = vmul.f32 1.442695, %v351_v32  ;;  %v5567_v32 = vrot.slane %v5563_v26, 1 }
 0x1fa   :  { %4992 = vpow2.f32 %v354_v34 }
 0x1fb   :  { %4994 = vpow2.f32 %v352_v33 }
 0x204   :  { %v4993_v35 = vpop.eup %4992 }
 0x205   :  { %v358_v36 = vrot.slane %v4993_v35, 7  ;;  %v4995_v37 = vpop.eup %4994 }
 0x207   :  { %v359_v38 = vsel %vm339_vm3, %v358_v36, %v4995_v37 }
 0x208   :  { %v361_v39 = vsel %vm342_vm4, %v359_v38, 0.0 }
 0x209   :  { %362 = vadd.xlane.f32.xlu0 %v361_v39 }
 0x296   :  { %v363_v40 = vpop.xlane.xlu0 %362 }
 0x297   :  { %4996 = vrcp.f32 %v363_v40 }
 0x2a1   :  { %v4997_v41 = vpop.eup %4996 }
 0x2a2   :  { %v366_v42 = vrot.slane %v4997_v41, 1  ;;  %v369_v43 = vmul.f32 %v4997_v41, %v4995_v37 }
 0x2a4   :  { %4638 = vmatmul.mubr.msk.f32.vlgmr.msra.gmra.mrb[2].mxu0 %vm371_vm5, %v369_v43  ;;  %v370_v45 = vmul.f32 %v4993_v35, %v366_v42 }
 0x2a5   :  { %4646 = vmatpush3.xpose.msk.msra.mxu0 %vm175_vm1, %v5479_v44  ;;  %4647 = vmatprep.mubr.msk.f32.mxu0 %vm5250_vm0, %v5249_v1 }
 0x2a6   :  { %4643 = vmatmul.mubr.msk.f32.vlgmr.msra.gmra.mrb[2].mxu1 %vm371_vm5, %v370_v45  ;;  %4655 = vmatprep.subr.mxu0 %v5249_v1 }
 0x2a7   :  { %4651 = vmatpush3.xpose.msk.msra.mxu1 %vm175_vm1, %v5482_v46  ;;  %4652 = vmatprep.mubr.msk.f32.mxu1 %vm5250_vm0, %v5249_v1 }
 0x2a8   :  { %4648 = vmatmul.mubr.msk.f32.vlgmr.msra.gmra.mrb[4].mxu0 %vm175_vm1, %v518_v47  ;;  %4660 = vmatprep.subr.mxu1 %v5249_v1 }
 0x2a9   :  { %4656 = vmatpush3.xpose.msk.msra.mxu0 %vm175_vm1, %v5479_v44  ;;  %4657 = vmatprep.mubr.msk.f32.mxu0 %vm5250_vm0, %v5249_v1 }
 0x2aa   :  { %4653 = vmatmul.mubr.msk.f32.vlgmr.msra.gmra.mrb[4].mxu1 %vm175_vm1, %v518_v47  ;;  %4665 = vmatprep.subr.mxu0 %v5249_v1 }
 0x2ab   :  { %4661 = vmatpush3.xpose.msk.msra.mxu1 %vm175_vm1, %v5482_v46  ;;  %4662 = vmatprep.mubr.msk.f32.mxu1 %vm5250_vm0, %v5249_v1 }
 0x2ac   :  { %4670 = vmatprep.subr.mxu1 %v5249_v1 }
 0x377   :  { %v441_v52 = vpop.f32.mrb[2].mxu0 }
 0x378   :  { %v705_v53 = vmul.f32 %v5511_v49, %v441_v52  ;;  %v862_v54 = vrot.slane %v441_v52, %v5514_v50  ;;  %v4639_v55 = vpop.f32.mrb[3].mxu0  ;;  %v690_v8 = vmul.f32 %v5519_v57, %v441_v52 }
 0x379   :  { %v514_v56 = vpop.f32.mrb[2].mxu1 }
 0x37a   :  { %v867_v58 = vsub.f32 %v5479_v44, %v862_v54  ;;  %v706_v59 = vmul.f32 %v5511_v49, %v514_v56  ;;  %v866_v60 = vrot.slane %v514_v56, %v5514_v50  ;;  %v1305_v61 = vrot.slane %v514_v56, 7  ;;  %v4644_v62 = vpop.f32.mrb[3].mxu1  ;;  %4658 = vmatmul.mubr.msk.f32.vlgmr.msra.gmra.mrb[6].mxu0 %vm175_vm1, %v705_v53 }
 0x37b   :  { %4667 = vmatprep.mubr.msk.f32.mxu0 %vm5250_vm0, %v5249_v1  ;;  %v691_v63 = vmul.f32 %v5519_v57, %v514_v56  ;;  %v593_v0 = vpop.f32.mrb[4].mxu0  ;;  %v678_v62 = vld [vmem:[#allocation15] sm:$0xff] }
 0x37c   :  { %v869_v2 = vand.u32 2147483647, %v867_v58  ;;  %v868_v3 = vsub.f32 %v5482_v46, %v866_v60  ;;  %4663 = vmatmul.mubr.msk.f32.vlgmr.msra.gmra.mrb[6].mxu1 %vm175_vm1, %v706_v59  ;;  %v4649_v4 = vpop.f32.mrb[5].mxu0  ;;  %v5531_v5 = vsel %vm339_vm3, %v1305_v61, %v441_v52  ;;  %v5557_v18 = vadd.f32 %v671_v15, %v593_v0  ;;  %v674_v60 = vld [vmem:[%s5999_s10] sm:$0xff]  ;;  %v675_v61 = vld [vmem:[%s5999_s10 + $0x8] sm:$0xff] }
 0x37d   :  { %v694_v9 = vrot.slane %v691_v63, 7  ;;  %4672 = vmatprep.mubr.msk.f32.mxu1 %vm5250_vm0, %v5249_v1  ;;  %v666_v13 = vpop.f32.mrb[4].mxu1  ;;  %v5252_v58 = vmov 0.0|0.0   ;;  %v679_v63 = vld [vmem:[#allocation15 + $0x8] sm:$0xff] }
 0x37e   :  { %v870_v10 = vand.u32 2147483647, %v868_v3  ;;  %4666 = vmatpush3.xpose.msk.msra.mxu0 %vm175_vm1, %v869_v2  ;;  %v4654_v14 = vpop.f32.mrb[5].mxu1  ;;  %v5559_v22 = vadd.f32 %v671_v15, %v666_v13  ;;  %v5583_v2 = vpack.c.bf16 %v675_v61, %v674_v60  ;;  %v676_v13 = vld [vmem:[%s5999_s10 + $0x10] sm:$0xff] }
 0x37f   :  { %v695_v11 = vsel %vm339_vm3, %v694_v9, %v690_v8  ;;  %4675 = vmatprep.subr.mxu0 %v5249_v1  ;;  %v5585_v8 = vpack.c.bf16 %v679_v63, %v678_v62  ;;  %v677_v14 = vld [vmem:[%s5999_s10 + $0x18] sm:$0xff] }
 0x380   :  { %4671 = vmatpush3.xpose.msk.msra.mxu1 %vm175_vm1, %v870_v10  ;;  %v698_v12 = vsel %vm697_vm6, %v695_v11, 0.0  ;;  %v680_v10 = vld [vmem:[#allocation15 + $0x10] sm:$0xff]  ;;  %v681_v11 = vld [vmem:[#allocation15 + $0x18] sm:$0xff]  ;;  %v5614_v15 = vpack.c.bf16 %v677_v14, %v676_v13 }
 0x381   :  { %699 = vadd.xlane.f32.xlu1 %v698_v12  ;;  %4668 = vmatmul.mubr.msk.f32.vlgmr.msra.gmra.mrb[8].mxu0 %vm175_vm1, %v5533_v7  ;;  %v5594_v12 = vpack.c.bf16 %v681_v11, %v680_v10 }
 0x382   :  { %4680 = vmatprep.subr.mxu1 %v5249_v1  ;;  %4676 = vmatpush3.msra.mxu0 %v5479_v44 }
 0x383   :  { %4673 = vmatmul.mubr.msk.f32.vlgmr.msra.gmra.mrb[8].mxu1 %vm175_vm1, %v5533_v7  ;;  %4677 = vmatprep.mubr.msk.f32.mxu0 %vm5250_vm0, %v5249_v1 }
 0x384   :  { %4681 = vmatpush3.msra.mxu1 %v5482_v46  ;;  %4682 = vmatprep.mubr.msk.f32.mxu1 %vm5250_vm0, %v5249_v1 }
 0x385   :  { %4921 = vmatprep.subr.bf16.mxu1 %v5252_v58  ;;  %4915 = vmatprep.subr.bf16.mxu0 %v5252_v58 }
 0x40e   :  { %v700_v16 = vpop.xlane.xlu1 %699 }
 0x40f   :  { %v1021_v21 = vrot.slane %v700_v16, 1  ;;  %v1024_v25 = vadd.f32 %v700_v16, %v5557_v18 }
 0x411   :  { %v1025_v28 = vadd.f32 %v1021_v21, %v5559_v22 }
 0x44d   :  { %v779_v19 = vpop.f32.mrb[6].mxu0 }
 0x44e   :  { %v4659_v20 = vpop.f32.mrb[7].mxu0  ;;  %v1026_v27 = vadd.f32 %v1024_v25, %v779_v19 }
 0x44f   :  { %v855_v23 = vpop.f32.mrb[6].mxu1 }
 0x450   :  { %v4664_v24 = vpop.f32.mrb[7].mxu1  ;;  %v1027_v30 = vadd.f32 %v1025_v28, %v855_v23 }
 0x451   :  { %v5627_v24 = vld [vmem:[%s6002_s13] ss:$0 sm:$0xff]  ;;  %s5255_s13 = smov 32  }
 0x454   :  { %v943_v29 = vpop.f32.mrb[8].mxu0 }
 0x455   :  { %v1028_v31 = vadd.f32 %v1026_v27, %v943_v29  ;;  %v4669_v33 = vpop.f32.mrb[9].mxu0  ;;  %v5635_v29 = vld [vmem:[%s6001_s12] ss:$0 sm:$0xff]  ;;  %s5254_s12 = smov 96  }
 0x456   :  { %v1016_v34 = vpop.f32.mrb[8].mxu1 }
 0x457   :  { %v1029_v35 = vadd.f32 %v1027_v30, %v1016_v34  ;;  %v4674_v36 = vpop.f32.mrb[9].mxu1  ;;  %v1034_v38 = vadd.f32 %v1028_v31, %v5563_v26 }
 0x459   :  { %v1035_v37 = vadd.f32 %v5567_v32, %v1029_v35 }
 0x45b   :  { %v1038_v39 = vrot.slane %v1035_v37, 7 }
 0x45d   :  { %v1039_v40 = vsel %vm339_vm3, %v1038_v39, %v1034_v38 }
 0x45e   :  { %v1041_v41 = vsel %vm342_vm4, %v1039_v40, -inf }
 0x45f   :  { %1042 = vmax.xlane.f32.xlu1 %v1041_v41 }
 0x4ec   :  { %v1043_v42 = vpop.xlane.xlu1 %1042 }
 0x4ed   :  { %v1045_v43 = vrot.slane %v1043_v42, 1  ;;  %v1048_v45 = vsub.f32 %v1034_v38, %v1043_v42 }
 0x4ef   :  { %v1049_v47 = vsub.f32 %v1035_v37, %v1045_v43  ;;  %v1050_v48 = vmul.f32 1.442695, %v1048_v45 }
 0x4f1   :  { %v1052_v51 = vmul.f32 1.442695, %v1049_v47 }
 0x4f3   :  { %4998 = vpow2.f32 %v1052_v51 }
 0x4f4   :  { %5000 = vpow2.f32 %v1050_v48 }
 0x4fd   :  { %v4999_v52 = vpop.eup %4998 }
 0x4fe   :  { %v1056_v53 = vrot.slane %v4999_v52, 7  ;;  %v5001_v54 = vpop.eup %5000 }
 0x500   :  { %v1057_v55 = vsel %vm339_vm3, %v1056_v53, %v5001_v54 }
 0x501   :  { %v1059_v56 = vsel %vm342_vm4, %v1057_v55, 0.0 }
 0x502   :  { %1060 = vadd.xlane.f32.xlu0 %v1059_v56 }
 0x58f   :  { %v1061_v59 = vpop.xlane.xlu0 %1060 }
 0x590   :  { %5002 = vrcp.f32 %v1061_v59 }
 0x59a   :  { %v5003_v0 = vpop.eup %5002 }
 0x59b   :  { %v1064_v3 = vrot.slane %v5003_v0, 1  ;;  %v1067_v4 = vmul.f32 %v5003_v0, %v5001_v54 }
 0x59d   :  { %4678 = vmatmul.mubr.msk.f32.vlgmr.msra.gmra.mrb[10].mxu0 %vm371_vm5, %v1067_v4  ;;  %v1068_v9 = vmul.f32 %v4999_v52, %v1064_v3 }
 0x59e   :  { %4917 = vmatpush3.bf16.msra.mxu0 %v5583_v2  ;;  %4693 = vmatprep.mubr.msk.f32.mxu0 %vm5250_vm0, %v5249_v1 }
 0x59f   :  { %4683 = vmatmul.mubr.msk.f32.vlgmr.msra.gmra.mrb[10].mxu1 %vm371_vm5, %v1068_v9  ;;  %4918 = vmatprep.subr.bf16.mxu0 %v5252_v58 }
 0x5a0   :  { %4923 = vmatpush3.bf16.msra.mxu1 %v5585_v8  ;;  %4704 = vmatprep.mubr.msk.f32.mxu1 %vm5250_vm0, %v5249_v1 }
 0x5a1   :  { %4924 = vmatprep.subr.bf16.mxu1 %v5252_v58 }
 0x5a2   :  { %4920 = vmatpush3.bf16.msra.mxu0 %v5614_v15 }
 0x5a3   :  { %4707 = vmatprep.subr.mxu0 %v5249_v1 }
 0x5a4   :  { %4926 = vmatpush3.bf16.msra.mxu1 %v5594_v12 }
 0x5a5   :  { %4712 = vmatprep.subr.mxu1 %v5249_v1 }
 0x5a7   :  { %4705 = vmatmul.mubr.msk.f32.vlgmr.msra.gmra.mrb[12].mxu1 %vm175_vm1, %v5531_v5 }
 0x5a8   :  { %4714 = vmatprep.mubr.msk.f32.mxu1 %vm5250_vm0, %v5249_v1 }
 0x5ad   :  { %4713 = vmatpush3.xpose.msk.msra.mxu1 %vm175_vm1, %v5482_v46 }
 0x5ae   :  { %4722 = vmatprep.subr.mxu1 %v5249_v1 }
 0x670   :  { %v1138_v16 = vpop.f32.mrb[10].mxu0 }
 0x671   :  { %v4679_v17 = vpop.f32.mrb[11].mxu0 }
 0x672   :  { %v1211_v19 = vpop.f32.mrb[10].mxu1 }
 0x673   :  { %v1223_v20 = vrot.slane %v1211_v19, 7  ;;  %v4684_v21 = vpop.f32.mrb[11].mxu1 }
 0x675   :  { %v1224_v23 = vsel %vm339_vm3, %v1223_v20, %v1138_v16 }
 0x676   :  { %4694 = vmatmul.mubr.msk.f32.vlgmr.msra.gmra.mrb[12].mxu0 %vm175_vm1, %v1224_v23 }
 0x677   :  { %4708 = vmatpush3.xpose.msk.msra.mxu0 %vm175_vm1, %v5479_v44  ;;  %4709 = vmatprep.mubr.msk.f32.mxu0 %vm5250_vm0, %v5249_v1 }
 0x678   :  { %4717 = vmatprep.subr.mxu0 %v5249_v1 }
 0x67a   :  { %v1375_v25 = vpop.f32.mrb[12].mxu1 }
 0x67b   :  { %v1376_v27 = vadd.f32 %v5627_v24, %v1375_v25  ;;  %v4706_v28 = vpop.f32.mrb[13].mxu1 }
 0x67d   :  { %1387 = vrot.lane.b32.xlu1 %v1376_v27, %s5253_s27 }
 0x6ef   :  { %v1388_v39 = vpop.permute.xlu1 %1387 }
 0x749   :  { %v1293_v30 = vpop.f32.mrb[12].mxu0 }
 0x74a   :  { %v1294_v31 = vadd.f32 %v5635_v29, %v1293_v30  ;;  %v4695_v33 = vpop.f32.mrb[13].mxu0 }
 0x74c   :  { %v1379_v34 = vadd.f32 %v1376_v27, %v1294_v31 }
 0x74e   :  { %v4450_v35 = vmul.f32 -1.442695, %v1379_v34 }
 0x750   :  { %5004 = vpow2.f32 %v4450_v35 }
 0x75a   :  { %v5005_v36 = vpop.eup %5004 }
 0x75b   :  { %v1383_v37 = vadd.f32 1.0, %v5005_v36 }
 0x75d   :  { %5006 = vrcp.f32 %v1383_v37 }
 0x767   :  { %v5007_v38 = vpop.eup %5006 }
 0x768   :  { %v1390_v40 = vmul.f32 %v5007_v38, %v1388_v39  ;;  %v1397_v47 = vsub.f32 1.0, %v5007_v38 }
 0x76a   :  { %1392 = vrot.lane.b32.xlu0 %v1390_v40, %s5253_s27 }
 0x7dc   :  { %v1393_v41 = vpop.permute.xlu0 %1392 }
 0x7dd   :  { %v1395_v42 = vadd.f32 %v1393_v41, %v1294_v31 }
 0x7df   :  { %5008 = vtanh.f32 %v1395_v42 }
 0x7e9   :  { %v5009_v43 = vpop.eup %5008 }
 0x7ea   :  { %1399 = vrot.lane.b32.xlu1 %v5009_v43, %s5254_s12 }
 0x7ee   :  { %1403 = vrot.lane.b32.xlu1 %v5531_v5, %s5255_s13 }
 0x7f2   :  { %1423 = vrot.lane.b32.xlu1 %v5511_v49, %s5255_s13 }
 0x85c   :  { %v1400_v45 = vpop.permute.xlu1 %1399 }
 0x85d   :  { %v1402_v51 = vmul.f32 %v1400_v45, %v1397_v47 }
 0x860   :  { %v1404_v48 = vpop.permute.xlu1 %1403 }
 0x861   :  { %v1406_v52 = vmul.f32 %v5007_v38, %v1404_v48 }
 0x863   :  { %v5642_v53 = vadd.f32 %v1406_v52, %v1402_v51 }
 0x864   :  { %v5644_v54 = vpop.permute.xlu1 %1423 }
 0x865   :  { %v1426_v55 = vmul.f32 %v5644_v54, %v5642_v53  ;;  %v1619_v56 = vrot.slane %v5642_v53, %v5451_v6 }
 0x867   :  { %v1434_v59 = vrot.slane %v1426_v55, %v5451_v6  ;;  %v1627_v5 = vrot.slane %v1619_v56, %v5451_v6  ;;  %v1620_v49 = vcombine.high %v1619_v56, %v1619_v56 }
 0x869   :  { %v1638_v60 = vrot.slane %v1627_v5, %v5514_v50  ;;  %v1634_v61 = vrot.slane %v1620_v49, %v5451_v6  ;;  %v1442_v62 = vrot.slane %v1434_v59, %v5451_v6  ;;  %v1435_v63 = vcombine.high %v1434_v59, %v1434_v59 }
 0x86b   :  { %1643 = vrot.lane.b32.xlu1 %v1638_v60, %s5254_s12  ;;  %v1642_v0 = vrot.slane %v1634_v61, %v5514_v50  ;;  %v1449_v3 = vrot.slane %v1435_v63, %v5451_v6  ;;  %v1453_v4 = vrot.slane %v1442_v62, %v5514_v50 }
 0x86d   :  { %1645 = vrot.lane.b32.xlu0 %v1642_v0, %s5254_s12  ;;  %v1534_v9 = vrot.slane %v1449_v3, %v5514_v50 }
 0x86f   :  { %1454 = vrot.lane.b32.xlu1 %v1453_v4, %s5254_s12 }
 0x871   :  { %1535 = vrot.lane.b32.xlu0 %v1534_v9, %s5254_s12 }
 0x875   :  { %1411 = vrot.lane.b32.xlu0 %v5519_v57, %s5255_s13 }
 0x8dd   :  { %v1644_v10 = vpop.permute.xlu1 %1643 }
 0x8de   :  { %v1649_v11 = vsub.f32 %v5479_v44, %v1644_v10 }
 0x8df   :  { %v1646_v13 = vpop.permute.xlu0 %1645 }
 0x8e0   :  { %v1651_v14 = vand.u32 2147483647, %v1649_v11  ;;  %v1650_v16 = vsub.f32 %v5482_v46, %v1646_v13 }
 0x8e1   :  { %v1455_v17 = vpop.permute.xlu1 %1454 }
 0x8e2   :  { %v1652_v19 = vand.u32 2147483647, %v1650_v16  ;;  %4710 = vmatmul.mubr.msk.f32.vlgmr.msra.gmra.mrb[14].mxu0 %vm175_vm1, %v1455_v17 }
 0x8e3   :  { %4718 = vmatpush3.xpose.msk.msra.mxu0 %vm175_vm1, %v1651_v14  ;;  %v1536_v20 = vpop.permute.xlu0 %1535  ;;  %4719 = vmatprep.mubr.msk.f32.mxu0 %vm5250_vm0, %v5249_v1 }
 0x8e4   :  { %4715 = vmatmul.mubr.msk.f32.vlgmr.msra.gmra.mrb[14].mxu1 %vm175_vm1, %v1536_v20  ;;  %4727 = vmatprep.subr.mxu0 %v5249_v1 }
 0x8e5   :  { %4723 = vmatpush3.xpose.msk.msra.mxu1 %vm175_vm1, %v1652_v19  ;;  %4724 = vmatprep.mubr.msk.f32.mxu1 %vm5250_vm0, %v5249_v1 }
 0x8e6   :  { %4720 = vmatmul.mubr.msk.f32.vlgmr.msra.gmra.mrb[16].mxu0 %vm175_vm1, %v5533_v7  ;;  %4732 = vmatprep.subr.mxu1 %v5249_v1 }
 0x8e7   :  { %v5678_v57 = vpop.permute.xlu0 %1411  ;;  %4728 = vmatpush3.msra.mxu0 %v5479_v44  ;;  %4729 = vmatprep.mubr.msk.f32.mxu0 %vm5250_vm0, %v5249_v1 }
 0x8e8   :  { %v1414_v21 = vmul.f32 %v5678_v57, %v5642_v53  ;;  %4725 = vmatmul.mubr.msk.f32.vlgmr.msra.gmra.mrb[16].mxu1 %vm175_vm1, %v5533_v7  ;;  %4927 = vmatprep.subr.bf16.mxu0 %v5252_v58 }
 0x8e9   :  { %4733 = vmatpush3.msra.mxu1 %v5482_v46  ;;  %4734 = vmatprep.mubr.msk.f32.mxu1 %vm5250_vm0, %v5249_v1 }
 0x8ea   :  { %1416 = vrot.lane.b32.xlu1 %v1414_v21, %s5254_s12  ;;  %4933 = vmatprep.subr.bf16.mxu1 %v5252_v58 }
 0x95c   :  { %v1417_v23 = vpop.permute.xlu1 %1416 }
 0x95d   :  { %v1419_v25 = vsel %vm697_vm6, %v1417_v23, 0.0 }
 0x95e   :  { %1420 = vadd.xlane.f32.xlu0 %v1419_v25 }
 0x9b5   :  { %v1527_v27 = vpop.f32.mrb[14].mxu0 }
 0x9b6   :  { %v4711_v28 = vpop.f32.mrb[15].mxu0 }
 0x9b7   :  { %v1608_v30 = vpop.f32.mrb[14].mxu1 }
 0x9b8   :  { %v4716_v31 = vpop.f32.mrb[15].mxu1 }
 0x9b9   :  { %v1722_v33 = vpop.f32.mrb[16].mxu0 }
 0x9ba   :  { %v4721_v34 = vpop.f32.mrb[17].mxu0 }
 0x9bb   :  { %v1795_v35 = vpop.f32.mrb[16].mxu1 }
 0x9bc   :  { %v4726_v36 = vpop.f32.mrb[17].mxu1 }
 0x9eb   :  { %v1421_v37 = vpop.xlane.xlu0 %1420 }
 0x9ec   :  { %v1800_v38 = vrot.slane %v1421_v37, 1  ;;  %v1803_v39 = vadd.f32 %v1421_v37, %v5557_v18 }
 0x9ee   :  { %v1804_v40 = vadd.f32 %v1800_v38, %v5559_v22  ;;  %v1805_v41 = vadd.f32 %v1803_v39, %v1527_v27 }
 0x9f0   :  { %v1807_v42 = vadd.f32 %v1805_v41, %v1722_v33  ;;  %v1806_v43 = vadd.f32 %v1804_v40, %v1608_v30 }
 0x9f2   :  { %v1808_v45 = vadd.f32 %v1806_v43, %v1795_v35  ;;  %v1809_v48 = vadd.f32 %v1807_v42, %v5563_v26 }
 0x9f4   :  { %v1810_v47 = vadd.f32 %v1808_v45, %v5567_v32 }
 0x9f6   :  { %v1813_v51 = vrot.slane %v1810_v47, 7 }
 0x9f8   :  { %v1814_v52 = vsel %vm339_vm3, %v1813_v51, %v1809_v48 }
 0x9f9   :  { %v1816_v55 = vsel %vm342_vm4, %v1814_v52, -inf }
 0x9fa   :  { %1817 = vmax.xlane.f32.xlu1 %v1816_v55 }
 0xa87   :  { %v1818_v56 = vpop.xlane.xlu1 %1817 }
 0xa88   :  { %v1820_v59 = vrot.slane %v1818_v56, 1  ;;  %v1823_v5 = vsub.f32 %v1809_v48, %v1818_v56 }
 0xa8a   :  { %v1824_v49 = vsub.f32 %v1810_v47, %v1820_v59  ;;  %v1825_v60 = vmul.f32 1.442695, %v1823_v5 }
 0xa8c   :  { %v1827_v61 = vmul.f32 1.442695, %v1824_v49 }
 0xa8e   :  { %5010 = vpow2.f32 %v1827_v61 }
 0xa8f   :  { %5012 = vpow2.f32 %v1825_v60 }
 0xa98   :  { %v5011_v62 = vpop.eup %5010 }
 0xa99   :  { %v1831_v63 = vrot.slane %v5011_v62, 7  ;;  %v5013_v0 = vpop.eup %5012 }
 0xa9b   :  { %v1832_v3 = vsel %vm339_vm3, %v1831_v63, %v5013_v0 }
 0xa9c   :  { %v1834_v4 = vsel %vm342_vm4, %v1832_v3, 0.0 }
 0xa9d   :  { %1835 = vadd.xlane.f32.xlu0 %v1834_v4 }
 0xab3   :  { %2066 = vrot.lane.b32.xlu0 %v5642_v53, %s5254_s12 }
 0xb2a   :  { %v1836_v9 = vpop.xlane.xlu0 %1835 }
 0xb2b   :  { %5014 = vrcp.f32 %v1836_v9 }
 0xb2e   :  { %v2067_v16 = vpop.permute.xlu0 %2066 }
 0xb35   :  { %v5015_v10 = vpop.eup %5014 }
 0xb36   :  { %v1839_v11 = vrot.slane %v5015_v10, 1  ;;  %v1842_v13 = vmul.f32 %v5015_v10, %v5013_v0 }
 0xb38   :  { %4730 = vmatmul.mubr.msk.f32.vlgmr.msra.gmra.mrb[18].mxu0 %vm371_vm5, %v1842_v13  ;;  %v1843_v14 = vmul.f32 %v5011_v62, %v1839_v11 }
 0xb39   :  { %4929 = vmatpush3.bf16.msra.mxu0 %v5583_v2  ;;  %4745 = vmatprep.mubr.msk.f32.mxu0 %vm5250_vm0, %v5249_v1 }
 0xb3a   :  { %4735 = vmatmul.mubr.msk.f32.vlgmr.msra.gmra.mrb[18].mxu1 %vm371_vm5, %v1843_v14  ;;  %4930 = vmatprep.subr.bf16.mxu0 %v5252_v58 }
 0xb3b   :  { %4935 = vmatpush3.bf16.msra.mxu1 %v5585_v8  ;;  %4756 = vmatprep.mubr.msk.f32.mxu1 %vm5250_vm0, %v5249_v1 }
 0xb3c   :  { %4936 = vmatprep.subr.bf16.mxu1 %v5252_v58 }
 0xb3d   :  { %4932 = vmatpush3.bf16.msra.mxu0 %v5614_v15 }
 0xb3e   :  { %4759 = vmatprep.subr.mxu0 %v5249_v1 }
 0xb3f   :  { %4938 = vmatpush3.bf16.msra.mxu1 %v5594_v12 }
 0xb40   :  { %4764 = vmatprep.subr.mxu1 %v5249_v1 }
 0xb42   :  { %4757 = vmatmul.mubr.msk.f32.vlgmr.msra.gmra.mrb[20].mxu1 %vm175_vm1, %v2067_v16 }
 0xb43   :  { %4766 = vmatprep.mubr.msk.f32.mxu1 %vm5250_vm0, %v5249_v1 }
 0xb48   :  { %4765 = vmatpush3.xpose.msk.msra.mxu1 %vm175_vm1, %v5482_v46 }
 0xb49   :  { %4774 = vmatprep.subr.mxu1 %v5249_v1 }
 0xc0b   :  { %v1913_v17 = vpop.f32.mrb[18].mxu0 }
 0xc0c   :  { %v4731_v19 = vpop.f32.mrb[19].mxu0 }
 0xc0d   :  { %v1986_v20 = vpop.f32.mrb[18].mxu1 }
 0xc0e   :  { %v1992_v21 = vrot.slane %v1986_v20, 7  ;;  %v4736_v23 = vpop.f32.mrb[19].mxu1 }
 0xc10   :  { %v1993_v25 = vsel %vm339_vm3, %v1992_v21, %v1913_v17 }
 0xc11   :  { %4746 = vmatmul.mubr.msk.f32.vlgmr.msra.gmra.mrb[20].mxu0 %vm175_vm1, %v1993_v25 }
 0xc12   :  { %4760 = vmatpush3.xpose.msk.msra.mxu0 %vm175_vm1, %v5479_v44  ;;  %4761 = vmatprep.mubr.msk.f32.mxu0 %vm5250_vm0, %v5249_v1 }
 0xc13   :  { %4769 = vmatprep.subr.mxu0 %v5249_v1 }
 0xc15   :  { %v2136_v27 = vpop.f32.mrb[20].mxu1 }
 0xc16   :  { %v2137_v28 = vadd.f32 %v5627_v24, %v2136_v27  ;;  %v4758_v30 = vpop.f32.mrb[21].mxu1 }
 0xc18   :  { %2148 = vrot.lane.b32.xlu1 %v2137_v28, %s5253_s27 }
 0xc8a   :  { %v2149_v40 = vpop.permute.xlu1 %2148 }
 0xce4   :  { %v2062_v31 = vpop.f32.mrb[20].mxu0 }
 0xce5   :  { %v2063_v33 = vadd.f32 %v5635_v29, %v2062_v31  ;;  %v4747_v34 = vpop.f32.mrb[21].mxu0 }
 0xce7   :  { %v2140_v35 = vadd.f32 %v2137_v28, %v2063_v33 }
 0xce9   :  { %v4463_v36 = vmul.f32 -1.442695, %v2140_v35 }
 0xceb   :  { %5016 = vpow2.f32 %v4463_v36 }
 0xcf5   :  { %v5017_v37 = vpop.eup %5016 }
 0xcf6   :  { %v2144_v38 = vadd.f32 1.0, %v5017_v37 }
 0xcf8   :  { %5018 = vrcp.f32 %v2144_v38 }
 0xd02   :  { %v5019_v39 = vpop.eup %5018 }
 0xd03   :  { %v2151_v41 = vmul.f32 %v5019_v39, %v2149_v40  ;;  %v2158_v47 = vsub.f32 1.0, %v5019_v39  ;;  %v2164_v51 = vmul.f32 %v5019_v39, %v5642_v53 }
 0xd05   :  { %2153 = vrot.lane.b32.xlu1 %v2151_v41, %s5253_s27 }
 0xd77   :  { %v2154_v42 = vpop.permute.xlu1 %2153 }
 0xd78   :  { %v2156_v43 = vadd.f32 %v2154_v42, %v2063_v33 }
 0xd7a   :  { %5020 = vtanh.f32 %v2156_v43 }
 0xd84   :  { %v5021_v45 = vpop.eup %5020 }
 0xd85   :  { %2160 = vrot.lane.b32.xlu0 %v5021_v45, %s5254_s12 }
 0xdf7   :  { %v2161_v48 = vpop.permute.xlu0 %2160 }
 0xdf8   :  { %v2163_v52 = vmul.f32 %v2161_v48, %v2158_v47 }
 0xdfa   :  { %v5737_v55 = vadd.f32 %v2164_v51, %v2163_v52 }
 0xdfc   :  { %v2369_v56 = vrot.slane %v5737_v55, %v5451_v6  ;;  %v2176_v59 = vmul.f32 %v5737_v55, %v5644_v54  ;;  %v2168_v10 = vmul.f32 %v5737_v55, %v5678_v57 }
 0xdfe   :  { %v2377_v5 = vrot.slane %v2369_v56, %v5451_v6  ;;  %v2370_v49 = vcombine.high %v2369_v56, %v2369_v56  ;;  %v2184_v60 = vrot.slane %v2176_v59, %v5451_v6 }
 0xe00   :  { %v2388_v61 = vrot.slane %v2377_v5, %v5514_v50  ;;  %v2384_v62 = vrot.slane %v2370_v49, %v5451_v6  ;;  %v2192_v53 = vrot.slane %v2184_v60, %v5451_v6  ;;  %v2185_v63 = vcombine.high %v2184_v60, %v2184_v60 }
 0xe02   :  { %2393 = vrot.lane.b32.xlu0 %v2388_v61, %s5254_s12  ;;  %v2392_v0 = vrot.slane %v2384_v62, %v5514_v50  ;;  %v2199_v3 = vrot.slane %v2185_v63, %v5451_v6  ;;  %v2203_v4 = vrot.slane %v2192_v53, %v5514_v50 }
 0xe04   :  { %2395 = vrot.lane.b32.xlu1 %v2392_v0, %s5254_s12  ;;  %v2284_v9 = vrot.slane %v2199_v3, %v5514_v50 }
 0xe06   :  { %2204 = vrot.lane.b32.xlu0 %v2203_v4, %s5254_s12 }
 0xe08   :  { %2285 = vrot.lane.b32.xlu1 %v2284_v9, %s5254_s12 }
 0xe0c   :  { %2170 = vrot.lane.b32.xlu1 %v2168_v10, %s5254_s12 }
 0xe74   :  { %v2394_v11 = vpop.permute.xlu0 %2393 }
 0xe75   :  { %v2399_v13 = vsub.f32 %v5479_v44, %v2394_v11 }
 0xe76   :  { %v2396_v14 = vpop.permute.xlu1 %2395 }
 0xe77   :  { %v2401_v16 = vand.u32 2147483647, %v2399_v13  ;;  %v2400_v17 = vsub.f32 %v5482_v46, %v2396_v14 }
 0xe78   :  { %v2205_v19 = vpop.permute.xlu0 %2204 }
 0xe79   :  { %v2402_v20 = vand.u32 2147483647, %v2400_v17  ;;  %4762 = vmatmul.mubr.msk.f32.vlgmr.msra.gmra.mrb[22].mxu0 %vm175_vm1, %v2205_v19 }
 0xe7a   :  { %4770 = vmatpush3.xpose.msk.msra.mxu0 %vm175_vm1, %v2401_v16  ;;  %v2286_v21 = vpop.permute.xlu1 %2285  ;;  %4771 = vmatprep.mubr.msk.f32.mxu0 %vm5250_vm0, %v5249_v1 }
 0xe7b   :  { %4767 = vmatmul.mubr.msk.f32.vlgmr.msra.gmra.mrb[22].mxu1 %vm175_vm1, %v2286_v21  ;;  %4779 = vmatprep.subr.mxu0 %v5249_v1 }
 0xe7c   :  { %4775 = vmatpush3.xpose.msk.msra.mxu1 %vm175_vm1, %v2402_v20  ;;  %4776 = vmatprep.mubr.msk.f32.mxu1 %vm5250_vm0, %v5249_v1 }
 0xe7d   :  { %4772 = vmatmul.mubr.msk.f32.vlgmr.msra.gmra.mrb[24].mxu0 %vm175_vm1, %v5533_v7  ;;  %4784 = vmatprep.subr.mxu1 %v5249_v1 }
 0xe7e   :  { %v2171_v23 = vpop.permute.xlu1 %2170  ;;  %4780 = vmatpush3.msra.mxu0 %v5479_v44  ;;  %4781 = vmatprep.mubr.msk.f32.mxu0 %vm5250_vm0, %v5249_v1 }
 0xe7f   :  { %4777 = vmatmul.mubr.msk.f32.vlgmr.msra.gmra.mrb[24].mxu1 %vm175_vm1, %v5533_v7  ;;  %v2173_v25 = vsel %vm697_vm6, %v2171_v23, 0.0  ;;  %4939 = vmatprep.subr.bf16.mxu0 %v5252_v58 }
 0xe80   :  { %2174 = vadd.xlane.f32.xlu0 %v2173_v25  ;;  %4785 = vmatpush3.msra.mxu1 %v5482_v46 }
 0xe81   :  { %4786 = vmatprep.mubr.msk.f32.mxu1 %vm5250_vm0, %v5249_v1  ;;  %4945 = vmatprep.subr.bf16.mxu1 %v5252_v58 }
 0xf0d   :  { %v2175_v27 = vpop.xlane.xlu0 %2174 }
 0xf0e   :  { %v2550_v28 = vrot.slane %v2175_v27, 1  ;;  %v2553_v31 = vadd.f32 %v2175_v27, %v5557_v18 }
 0xf10   :  { %v2554_v36 = vadd.f32 %v2550_v28, %v5559_v22 }
 0xf4c   :  { %v2277_v30 = vpop.f32.mrb[22].mxu0 }
 0xf4d   :  { %v4763_v33 = vpop.f32.mrb[23].mxu0  ;;  %v2555_v35 = vadd.f32 %v2553_v31, %v2277_v30 }
 0xf4e   :  { %v2358_v34 = vpop.f32.mrb[22].mxu1 }
 0xf4f   :  { %v4768_v37 = vpop.f32.mrb[23].mxu1  ;;  %v2556_v39 = vadd.f32 %v2554_v36, %v2358_v34 }
 0xf50   :  { %v2472_v38 = vpop.f32.mrb[24].mxu0 }
 0xf51   :  { %v2557_v40 = vadd.f32 %v2555_v35, %v2472_v38  ;;  %v4773_v41 = vpop.f32.mrb[25].mxu0 }
 0xf52   :  { %v2545_v42 = vpop.f32.mrb[24].mxu1 }
 0xf53   :  { %v2558_v43 = vadd.f32 %v2556_v39, %v2545_v42  ;;  %v4778_v45 = vpop.f32.mrb[25].mxu1  ;;  %v2559_v48 = vadd.f32 %v2557_v40, %v5563_v26 }
 0xf55   :  { %v2560_v47 = vadd.f32 %v2558_v43, %v5567_v32 }
 0xf57   :  { %v2563_v51 = vrot.slane %v2560_v47, 7 }
 0xf59   :  { %v2564_v52 = vsel %vm339_vm3, %v2563_v51, %v2559_v48 }
 0xf5a   :  { %v2566_v56 = vsel %vm342_vm4, %v2564_v52, -inf }
 0xf5b   :  { %2567 = vmax.xlane.f32.xlu1 %v2566_v56 }
 0xfe8   :  { %v2568_v59 = vpop.xlane.xlu1 %2567 }
 0xfe9   :  { %v2570_v5 = vrot.slane %v2568_v59, 1  ;;  %v2573_v49 = vsub.f32 %v2559_v48, %v2568_v59 }
 0xfeb   :  { %v2574_v60 = vsub.f32 %v2560_v47, %v2570_v5  ;;  %v2575_v61 = vmul.f32 1.442695, %v2573_v49 }
 0xfed   :  { %v2577_v62 = vmul.f32 1.442695, %v2574_v60 }
 0xfef   :  { %5022 = vpow2.f32 %v2577_v62 }
 0xff0   :  { %5024 = vpow2.f32 %v2575_v61 }
 0xff9   :  { %v5023_v53 = vpop.eup %5022 }
 0xffa   :  { %v2581_v63 = vrot.slane %v5023_v53, 7  ;;  %v5025_v0 = vpop.eup %5024 }
 0xffc   :  { %v2582_v3 = vsel %vm339_vm3, %v2581_v63, %v5025_v0 }
 0xffd   :  { %v2584_v4 = vsel %vm342_vm4, %v2582_v3, 0.0 }
 0xffe   :  { %2585 = vadd.xlane.f32.xlu0 %v2584_v4 }
0x1014   :  { %2816 = vrot.lane.b32.xlu0 %v5737_v55, %s5254_s12 }
0x108b   :  { %v2586_v9 = vpop.xlane.xlu0 %2585 }
0x108c   :  { %5026 = vrcp.f32 %v2586_v9 }
0x108f   :  { %v2817_v16 = vpop.permute.xlu0 %2816 }
0x1096   :  { %v5027_v10 = vpop.eup %5026 }
0x1097   :  { %v2589_v11 = vrot.slane %v5027_v10, 1  ;;  %v2592_v13 = vmul.f32 %v5027_v10, %v5025_v0 }
0x1099   :  { %4782 = vmatmul.mubr.msk.f32.vlgmr.msra.gmra.mrb[26].mxu0 %vm371_vm5, %v2592_v13  ;;  %v2593_v14 = vmul.f32 %v5023_v53, %v2589_v11 }
0x109a   :  { %4941 = vmatpush3.bf16.msra.mxu0 %v5583_v2  ;;  %4797 = vmatprep.mubr.msk.f32.mxu0 %vm5250_vm0, %v5249_v1 }
0x109b   :  { %4787 = vmatmul.mubr.msk.f32.vlgmr.msra.gmra.mrb[26].mxu1 %vm371_vm5, %v2593_v14  ;;  %4942 = vmatprep.subr.bf16.mxu0 %v5252_v58 }
0x109c   :  { %4947 = vmatpush3.bf16.msra.mxu1 %v5585_v8  ;;  %4808 = vmatprep.mubr.msk.f32.mxu1 %vm5250_vm0, %v5249_v1 }
0x109d   :  { %4948 = vmatprep.subr.bf16.mxu1 %v5252_v58 }
0x109e   :  { %4944 = vmatpush3.bf16.msra.mxu0 %v5614_v15 }
0x109f   :  { %4811 = vmatprep.subr.mxu0 %v5249_v1 }
0x10a0   :  { %4950 = vmatpush3.bf16.msra.mxu1 %v5594_v12 }
0x10a1   :  { %4816 = vmatprep.subr.mxu1 %v5249_v1 }
0x10a3   :  { %4809 = vmatmul.mubr.msk.f32.vlgmr.msra.gmra.mrb[28].mxu1 %vm175_vm1, %v2817_v16 }
0x10a4   :  { %4818 = vmatprep.mubr.msk.f32.mxu1 %vm5250_vm0, %v5249_v1 }
0x10a9   :  { %4817 = vmatpush3.xpose.msk.msra.mxu1 %vm175_vm1, %v5482_v46 }
0x10aa   :  { %4826 = vmatprep.subr.mxu1 %v5249_v1 }
0x116c   :  { %v2663_v17 = vpop.f32.mrb[26].mxu0 }
0x116d   :  { %v4783_v19 = vpop.f32.mrb[27].mxu0 }
0x116e   :  { %v2736_v20 = vpop.f32.mrb[26].mxu1 }
0x116f   :  { %v2742_v21 = vrot.slane %v2736_v20, 7  ;;  %v4788_v23 = vpop.f32.mrb[27].mxu1 }
0x1171   :  { %v2743_v25 = vsel %vm339_vm3, %v2742_v21, %v2663_v17 }
0x1172   :  { %4798 = vmatmul.mubr.msk.f32.vlgmr.msra.gmra.mrb[28].mxu0 %vm175_vm1, %v2743_v25  ;;  %v5053_v25 = vld [vmem:[#allocation4 + $0x8] sm:$0xff] }
0x1173   :  { %4812 = vmatpush3.xpose.msk.msra.mxu0 %vm175_vm1, %v5479_v44  ;;  %4813 = vmatprep.mubr.msk.f32.mxu0 %vm5250_vm0, %v5249_v1 }
0x1174   :  { %4821 = vmatprep.subr.mxu0 %v5249_v1 }
0x1176   :  { %v2886_v27 = vpop.f32.mrb[28].mxu1 }
0x1177   :  { %v2887_v28 = vadd.f32 %v5627_v24, %v2886_v27  ;;  %v4810_v30 = vpop.f32.mrb[29].mxu1 }
0x1179   :  { %2898 = vrot.lane.b32.xlu1 %v2887_v28, %s5253_s27 }
0x11eb   :  { %v2899_v40 = vpop.permute.xlu1 %2898 }
0x1245   :  { %v2812_v31 = vpop.f32.mrb[28].mxu0 }
0x1246   :  { %v2813_v33 = vadd.f32 %v5635_v29, %v2812_v31  ;;  %v4799_v34 = vpop.f32.mrb[29].mxu0 }
0x1248   :  { %v2890_v35 = vadd.f32 %v2887_v28, %v2813_v33 }
0x124a   :  { %v4476_v36 = vmul.f32 -1.442695, %v2890_v35 }
0x124c   :  { %5028 = vpow2.f32 %v4476_v36 }
0x1256   :  { %v5029_v37 = vpop.eup %5028 }
0x1257   :  { %v2894_v38 = vadd.f32 1.0, %v5029_v37 }
0x1259   :  { %5030 = vrcp.f32 %v2894_v38 }
0x1263   :  { %v5031_v39 = vpop.eup %5030 }
0x1264   :  { %v2901_v41 = vmul.f32 %v5031_v39, %v2899_v40  ;;  %v2908_v47 = vsub.f32 1.0, %v5031_v39  ;;  %v2914_v51 = vmul.f32 %v5031_v39, %v5737_v55 }
0x1266   :  { %2903 = vrot.lane.b32.xlu1 %v2901_v41, %s5253_s27 }
0x12d8   :  { %v2904_v42 = vpop.permute.xlu1 %2903 }
0x12d9   :  { %v2906_v43 = vadd.f32 %v2904_v42, %v2813_v33 }
0x12db   :  { %5032 = vtanh.f32 %v2906_v43 }
0x12e5   :  { %v5033_v45 = vpop.eup %5032 }
0x12e6   :  { %2910 = vrot.lane.b32.xlu0 %v5033_v45, %s5254_s12 }
0x1358   :  { %v2911_v48 = vpop.permute.xlu0 %2910 }
0x1359   :  { %v2913_v52 = vmul.f32 %v2911_v48, %v2908_v47 }
0x135b   :  { %v5827_v56 = vadd.f32 %v2914_v51, %v2913_v52 }
0x135d   :  { %v3119_v59 = vrot.slane %v5827_v56, %v5451_v6  ;;  %v2926_v5 = vmul.f32 %v5827_v56, %v5644_v54  ;;  %v2918_v10 = vmul.f32 %v5827_v56, %v5678_v57 }
0x135f   :  { %v3127_v49 = vrot.slane %v3119_v59, %v5451_v6  ;;  %v3120_v60 = vcombine.high %v3119_v59, %v3119_v59  ;;  %v2934_v61 = vrot.slane %v2926_v5, %v5451_v6 }
0x1361   :  { %v3138_v62 = vrot.slane %v3127_v49, %v5514_v50  ;;  %v3134_v53 = vrot.slane %v3120_v60, %v5451_v6  ;;  %v2942_v55 = vrot.slane %v2934_v61, %v5451_v6  ;;  %v2935_v63 = vcombine.high %v2934_v61, %v2934_v61 }
0x1363   :  { %3143 = vrot.lane.b32.xlu0 %v3138_v62, %s5254_s12  ;;  %v3142_v0 = vrot.slane %v3134_v53, %v5514_v50  ;;  %v2949_v3 = vrot.slane %v2935_v63, %v5451_v6  ;;  %v2953_v4 = vrot.slane %v2942_v55, %v5514_v50 }
0x1365   :  { %3145 = vrot.lane.b32.xlu1 %v3142_v0, %s5254_s12  ;;  %v3034_v9 = vrot.slane %v2949_v3, %v5514_v50 }
0x1367   :  { %2954 = vrot.lane.b32.xlu0 %v2953_v4, %s5254_s12 }
0x1369   :  { %3035 = vrot.lane.b32.xlu1 %v3034_v9, %s5254_s12 }
0x136d   :  { %2920 = vrot.lane.b32.xlu1 %v2918_v10, %s5254_s12 }
0x13d5   :  { %v3144_v11 = vpop.permute.xlu0 %3143 }
0x13d6   :  { %v3149_v13 = vsub.f32 %v5479_v44, %v3144_v11 }
0x13d7   :  { %v3146_v14 = vpop.permute.xlu1 %3145 }
0x13d8   :  { %v3151_v16 = vand.u32 2147483647, %v3149_v13  ;;  %v3150_v17 = vsub.f32 %v5482_v46, %v3146_v14  ;;  %v5052_v46 = vld [vmem:[#allocation4] sm:$0xff] }
0x13d9   :  { %v2955_v19 = vpop.permute.xlu0 %2954 }
0x13da   :  { %v3152_v20 = vand.u32 2147483647, %v3150_v17  ;;  %4814 = vmatmul.mubr.msk.f32.vlgmr.msra.gmra.mrb[30].mxu0 %vm175_vm1, %v2955_v19 }
0x13db   :  { %4822 = vmatpush3.xpose.msk.msra.mxu0 %vm175_vm1, %v3151_v16  ;;  %v3036_v21 = vpop.permute.xlu1 %3035  ;;  %4823 = vmatprep.mubr.msk.f32.mxu0 %vm5250_vm0, %v5249_v1 }
0x13dc   :  { %4819 = vmatmul.mubr.msk.f32.vlgmr.msra.gmra.mrb[30].mxu1 %vm175_vm1, %v3036_v21  ;;  %4831 = vmatprep.subr.mxu0 %v5249_v1 }
0x13dd   :  { %4827 = vmatpush3.xpose.msk.msra.mxu1 %vm175_vm1, %v3152_v20  ;;  %4828 = vmatprep.mubr.msk.f32.mxu1 %vm5250_vm0, %v5249_v1 }
0x13de   :  { %4824 = vmatmul.mubr.msk.f32.vlgmr.msra.gmra.mrb[32].mxu0 %vm175_vm1, %v5533_v7  ;;  %4836 = vmatprep.subr.mxu1 %v5249_v1 }
0x13df   :  { %v2921_v44 = vpop.permute.xlu1 %2920  ;;  %4832 = vmatpush3.msra.mxu0 %v5052_v46  ;;  %4833 = vmatprep.mubr.msk.f32.mxu0 %vm5250_vm0, %v5249_v1 }
0x13e0   :  { %4829 = vmatmul.mubr.msk.f32.vlgmr.msra.gmra.mrb[32].mxu1 %vm175_vm1, %v5533_v7  ;;  %v2923_v23 = vsel %vm697_vm6, %v2921_v44, 0.0  ;;  %4951 = vmatprep.subr.bf16.mxu0 %v5252_v58 }
0x13e1   :  { %2924 = vadd.xlane.f32.xlu0 %v2923_v23  ;;  %4837 = vmatpush3.msra.mxu1 %v5053_v25 }
0x13e2   :  { %4838 = vmatprep.mubr.msk.f32.mxu1 %vm5250_vm0, %v5249_v1  ;;  %4957 = vmatprep.subr.bf16.mxu1 %v5252_v58 }
0x146e   :  { %v2925_v27 = vpop.xlane.xlu0 %2924 }
0x146f   :  { %v3300_v28 = vrot.slane %v2925_v27, 1  ;;  %v3303_v31 = vadd.f32 %v2925_v27, %v5557_v18 }
0x1471   :  { %v3304_v36 = vadd.f32 %v3300_v28, %v5559_v22 }
0x14ad   :  { %v3027_v30 = vpop.f32.mrb[30].mxu0 }
0x14ae   :  { %v4815_v33 = vpop.f32.mrb[31].mxu0  ;;  %v3305_v35 = vadd.f32 %v3303_v31, %v3027_v30 }
0x14af   :  { %v3108_v34 = vpop.f32.mrb[30].mxu1 }
0x14b0   :  { %v4820_v37 = vpop.f32.mrb[31].mxu1  ;;  %v3306_v39 = vadd.f32 %v3304_v36, %v3108_v34 }
0x14b1   :  { %v3222_v38 = vpop.f32.mrb[32].mxu0 }
0x14b2   :  { %v3307_v40 = vadd.f32 %v3305_v35, %v3222_v38  ;;  %v4825_v41 = vpop.f32.mrb[33].mxu0  ;;  %v3666_v38 = vld [vmem:[#allocation4] sm:$0xff] }
0x14b3   :  { %v3295_v42 = vpop.f32.mrb[32].mxu1 }
0x14b4   :  { %v3308_v43 = vadd.f32 %v3306_v39, %v3295_v42  ;;  %v4830_v45 = vpop.f32.mrb[33].mxu1  ;;  %v3309_v48 = vadd.f32 %v3307_v40, %v5563_v26  ;;  %v3667_v40 = vld [vmem:[#allocation4 + $0x8] sm:$0xff] }
0x14b6   :  { %v3310_v47 = vadd.f32 %v3308_v43, %v5567_v32 }
0x14b8   :  { %v3313_v51 = vrot.slane %v3310_v47, 7 }
0x14ba   :  { %v3314_v52 = vsel %vm339_vm3, %v3313_v51, %v3309_v48 }
0x14bb   :  { %v3316_v59 = vsel %vm342_vm4, %v3314_v52, -inf }
0x14bc   :  { %3317 = vmax.xlane.f32.xlu1 %v3316_v59 }
0x1549   :  { %v3318_v5 = vpop.xlane.xlu1 %3317 }
0x154a   :  { %v3320_v49 = vrot.slane %v3318_v5, 1  ;;  %v3323_v60 = vsub.f32 %v3309_v48, %v3318_v5 }
0x154c   :  { %v3324_v61 = vsub.f32 %v3310_v47, %v3320_v49  ;;  %v3325_v62 = vmul.f32 1.442695, %v3323_v60 }
0x154e   :  { %v3327_v53 = vmul.f32 1.442695, %v3324_v61 }
0x1550   :  { %5034 = vpow2.f32 %v3327_v53 }
0x1551   :  { %5036 = vpow2.f32 %v3325_v62 }
0x155a   :  { %v5035_v55 = vpop.eup %5034 }
0x155b   :  { %v3331_v63 = vrot.slane %v5035_v55, 7  ;;  %v5037_v0 = vpop.eup %5036 }
0x155d   :  { %v3332_v3 = vsel %vm339_vm3, %v3331_v63, %v5037_v0 }
0x155e   :  { %v3334_v4 = vsel %vm342_vm4, %v3332_v3, 0.0 }
0x155f   :  { %3335 = vadd.xlane.f32.xlu0 %v3334_v4 }
0x1575   :  { %3566 = vrot.lane.b32.xlu0 %v5827_v56, %s5254_s12 }
0x15ec   :  { %v3336_v9 = vpop.xlane.xlu0 %3335 }
0x15ed   :  { %5038 = vrcp.f32 %v3336_v9 }
0x15f7   :  { %v5039_v10 = vpop.eup %5038 }
0x15f8   :  { %v3339_v11 = vrot.slane %v5039_v10, 1  ;;  %v3342_v13 = vmul.f32 %v5039_v10, %v5037_v0 }
0x15fa   :  { %4834 = vmatmul.mubr.msk.f32.vlgmr.msra.gmra.mrb[34].mxu0 %vm371_vm5, %v3342_v13  ;;  %v3343_v14 = vmul.f32 %v5035_v55, %v3339_v11 }
0x15fb   :  { %4953 = vmatpush3.bf16.msra.mxu0 %v5583_v2  ;;  %4849 = vmatprep.mubr.msk.f32.mxu0 %vm5250_vm0, %v5249_v1  ;;  %v3567_v2 = vpop.permute.xlu0 %3566 }
0x15fc   :  { %4839 = vmatmul.mubr.msk.f32.vlgmr.msra.gmra.mrb[34].mxu1 %vm371_vm5, %v3343_v14  ;;  %4954 = vmatprep.subr.bf16.mxu0 %v5252_v58 }
0x15fd   :  { %4959 = vmatpush3.bf16.msra.mxu1 %v5585_v8  ;;  %4860 = vmatprep.mubr.msk.f32.mxu1 %vm5250_vm0, %v5249_v1 }
0x15fe   :  { %4960 = vmatprep.subr.bf16.mxu1 %v5252_v58 }
0x15ff   :  { %4956 = vmatpush3.bf16.msra.mxu0 %v5614_v15 }
0x1600   :  { %4863 = vmatprep.subr.mxu0 %v5249_v1 }
0x1601   :  { %4962 = vmatpush3.bf16.msra.mxu1 %v5594_v12 }
0x1602   :  { %4868 = vmatprep.subr.mxu1 %v5249_v1 }
0x1604   :  { %4861 = vmatmul.mubr.msk.f32.vlgmr.msra.gmra.mrb[36].mxu1 %vm175_vm1, %v3567_v2 }
0x1605   :  { %4870 = vmatprep.mubr.msk.f32.mxu1 %vm5250_vm0, %v5249_v1 }
0x160a   :  { %4869 = vmatpush3.xpose.msk.msra.mxu1 %vm175_vm1, %v3667_v40 }
0x160b   :  { %4878 = vmatprep.subr.mxu1 %v5249_v1 }
0x16cd   :  { %v3413_v8 = vpop.f32.mrb[34].mxu0 }
0x16ce   :  { %v4835_v16 = vpop.f32.mrb[35].mxu0 }
0x16cf   :  { %v3486_v17 = vpop.f32.mrb[34].mxu1 }
0x16d0   :  { %v3492_v19 = vrot.slane %v3486_v17, 7  ;;  %v4840_v20 = vpop.f32.mrb[35].mxu1 }
0x16d2   :  { %v3493_v21 = vsel %vm339_vm3, %v3492_v19, %v3413_v8 }
0x16d3   :  { %4850 = vmatmul.mubr.msk.f32.vlgmr.msra.gmra.mrb[36].mxu0 %vm175_vm1, %v3493_v21 }
0x16d4   :  { %4865 = vmatprep.mubr.msk.f32.mxu0 %vm5250_vm0, %v5249_v1  ;;  %4864 = vmatpush3.xpose.msk.msra.mxu0 %vm175_vm1, %v3666_v38 }
0x16d5   :  { %4873 = vmatprep.subr.mxu0 %v5249_v1 }
0x16d7   :  { %v3636_v12 = vpop.f32.mrb[36].mxu1 }
0x16d8   :  { %v3637_v15 = vadd.f32 %v5627_v24, %v3636_v12  ;;  %v4862_v44 = vpop.f32.mrb[37].mxu1 }
0x16da   :  { %3648 = vrot.lane.b32.xlu1 %v3637_v15, %s5253_s27 }
0x174c   :  { %v3649_v34 = vpop.permute.xlu1 %3648 }
0x17a6   :  { %v3562_v46 = vpop.f32.mrb[36].mxu0 }
0x17a7   :  { %v3563_v23 = vadd.f32 %v5635_v29, %v3562_v46  ;;  %v4851_v25 = vpop.f32.mrb[37].mxu0 }
0x17a9   :  { %v3640_v27 = vadd.f32 %v3637_v15, %v3563_v23 }
0x17ab   :  { %v4489_v28 = vmul.f32 -1.442695, %v3640_v27 }
0x17ad   :  { %5040 = vpow2.f32 %v4489_v28 }
0x17b7   :  { %v5041_v30 = vpop.eup %5040 }
0x17b8   :  { %v3644_v31 = vadd.f32 1.0, %v5041_v30 }
0x17ba   :  { %5042 = vrcp.f32 %v3644_v31 }
0x17c4   :  { %v5043_v33 = vpop.eup %5042 }
0x17c5   :  { %v3651_v35 = vmul.f32 %v5043_v33, %v3649_v34  ;;  %v3658_v29 = vsub.f32 1.0, %v5043_v33  ;;  %v3664_v41 = vmul.f32 %v5043_v33, %v5827_v56 }
0x17c7   :  { %3653 = vrot.lane.b32.xlu1 %v3651_v35, %s5253_s27 }
0x1839   :  { %v3654_v36 = vpop.permute.xlu1 %3653 }
0x183a   :  { %v3656_v24 = vadd.f32 %v3654_v36, %v3563_v23 }
0x183c   :  { %5044 = vtanh.f32 %v3656_v24 }
0x1846   :  { %v5045_v37 = vpop.eup %5044 }
0x1847   :  { %3660 = vrot.lane.b32.xlu0 %v5045_v37, %s5254_s12 }
0x18b9   :  { %v3661_v39 = vpop.permute.xlu0 %3660 }
0x18ba   :  { %v3663_v42 = vmul.f32 %v3661_v39, %v3658_v29  ;;  %v4244_v39 = vld [vmem:[#allocation12 + $0x20] sm:$0xff] }
0x18bc   :  { %v5913_v43 = vadd.f32 %v3664_v41, %v3663_v42  ;;  %v4240_v41 = vld [vmem:[#allocation12] sm:$0xff]  ;;  %v4241_v42 = vld [vmem:[#allocation12 + $0x8] sm:$0xff] }
0x18be   :  { %v3869_v45 = vrot.slane %v5913_v43, %v5451_v6  ;;  %v3676_v47 = vmul.f32 %v5913_v43, %v5644_v54  ;;  %v3668_v53 = vmul.f32 %v5913_v43, %v5678_v57 }
0x18c0   :  { %v3877_v48 = vrot.slane %v3869_v45, %v5451_v6  ;;  %v3870_v51 = vcombine.high %v3869_v45, %v3869_v45  ;;  %v3684_v52 = vrot.slane %v3676_v47, %v5451_v6 }
0x18c2   :  { %v3888_v56 = vrot.slane %v3877_v48, %v5514_v50  ;;  %v3884_v59 = vrot.slane %v3870_v51, %v5451_v6  ;;  %v3692_v5 = vrot.slane %v3684_v52, %v5451_v6  ;;  %v3685_v49 = vcombine.high %v3684_v52, %v3684_v52  ;;  %v4246_v52 = vld [vmem:[#allocation12 + $0x30] sm:$0xff] }
0x18c4   :  { %3893 = vrot.lane.b32.xlu0 %v3888_v56, %s5254_s12  ;;  %v3892_v60 = vrot.slane %v3884_v59, %v5514_v50  ;;  %v3699_v61 = vrot.slane %v3685_v49, %v5451_v6  ;;  %v3703_v54 = vrot.slane %v3692_v5, %v5514_v50  ;;  %v4247_v56 = vld [vmem:[#allocation12 + $0x38] sm:$0xff]  ;;  %v4970_v59 = vpack.c.bf16 %v4241_v42, %v4240_v41 }
0x18c5   :  { %v4967_v49 = vpack.c.bf16 %v4247_v56, %v4246_v52 }
0x18c6   :  { %3895 = vrot.lane.b32.xlu1 %v3892_v60, %s5254_s12  ;;  %v3784_v62 = vrot.slane %v3699_v61, %v5514_v50  ;;  %v4242_v60 = vld [vmem:[#allocation12 + $0x10] sm:$0xff]  ;;  %v4243_v61 = vld [vmem:[#allocation12 + $0x18] sm:$0xff] }
0x18c8   :  { %3704 = vrot.lane.b32.xlu0 %v3703_v54, %s5254_s12  ;;  %v4973_v54 = vpack.c.bf16 %v4243_v61, %v4242_v60 }
0x18ca   :  { %3785 = vrot.lane.b32.xlu1 %v3784_v62, %s5254_s12 }
0x18ce   :  { %3670 = vrot.lane.b32.xlu1 %v3668_v53, %s5254_s12 }
0x1936   :  { %v3894_v55 = vpop.permute.xlu0 %3893 }
0x1937   :  { %v3899_v63 = vsub.f32 %v3666_v38, %v3894_v55 }
0x1938   :  { %v3896_v0 = vpop.permute.xlu1 %3895 }
0x1939   :  { %v3901_v3 = vand.u32 2147483647, %v3899_v63  ;;  %v3900_v6 = vsub.f32 %v3667_v40, %v3896_v0 }
0x193a   :  { %v3705_v4 = vpop.permute.xlu0 %3704 }
0x193b   :  { %v3902_v9 = vand.u32 2147483647, %v3900_v6  ;;  %4866 = vmatmul.mubr.msk.f32.vlgmr.msra.gmra.mrb[38].mxu0 %vm175_vm1, %v3705_v4  ;;  %v4502_v4 = vld [vmem:[#allocation13] ss:$0 sm:$0xff] }
0x193c   :  { %4874 = vmatpush3.xpose.msk.msra.mxu0 %vm175_vm1, %v3901_v3  ;;  %v3786_v10 = vpop.permute.xlu1 %3785  ;;  %4875 = vmatprep.mubr.msk.f32.mxu0 %vm5250_vm0, %v5249_v1 }
0x193d   :  { %4871 = vmatmul.mubr.msk.f32.vlgmr.msra.gmra.mrb[38].mxu1 %vm175_vm1, %v3786_v10  ;;  %4883 = vmatprep.subr.mxu0 %v5249_v1 }
0x193e   :  { %4879 = vmatpush3.xpose.msk.msra.mxu1 %vm175_vm1, %v3902_v9  ;;  %4880 = vmatprep.mubr.msk.f32.mxu1 %vm5250_vm0, %v5249_v1 }
0x193f   :  { %4876 = vmatmul.mubr.msk.f32.vlgmr.msra.gmra.mrb[40].mxu0 %vm175_vm1, %v5533_v7  ;;  %4888 = vmatprep.subr.mxu1 %v5249_v1 }
0x1940   :  { %v3671_v50 = vpop.permute.xlu1 %3670  ;;  %4884 = vmatpush3.msra.mxu0 %v3666_v38  ;;  %4885 = vmatprep.mubr.msk.f32.mxu0 %vm5250_vm0, %v5249_v1 }
0x1941   :  { %4881 = vmatmul.mubr.msk.f32.vlgmr.msra.gmra.mrb[40].mxu1 %vm175_vm1, %v5533_v7  ;;  %v3673_v57 = vsel %vm697_vm6, %v3671_v50, 0.0  ;;  %4963 = vmatprep.subr.bf16.mxu0 %v5252_v58 }
0x1942   :  { %3674 = vadd.xlane.f32.xlu0 %v3673_v57  ;;  %4889 = vmatpush3.msra.mxu1 %v3667_v40  ;;  %v4245_v40 = vld [vmem:[#allocation12 + $0x28] sm:$0xff] }
0x1943   :  { %4890 = vmatprep.mubr.msk.f32.mxu1 %vm5250_vm0, %v5249_v1  ;;  %4969 = vmatprep.subr.bf16.mxu1 %v5252_v58  ;;  %v4964_v47 = vpack.c.bf16 %v4245_v40, %v4244_v39 }
0x19cf   :  { %v3675_v11 = vpop.xlane.xlu0 %3674 }
0x19d0   :  { %v4050_v13 = vrot.slane %v3675_v11, 1  ;;  %v4053_v2 = vadd.f32 %v3675_v11, %v5557_v18 }
0x19d2   :  { %v4054_v7 = vadd.f32 %v4050_v13, %v5559_v22 }
0x1a0e   :  { %v3777_v14 = vpop.f32.mrb[38].mxu0 }
0x1a0f   :  { %v4867_v8 = vpop.f32.mrb[39].mxu0  ;;  %v4055_v17 = vadd.f32 %v4053_v2, %v3777_v14 }
0x1a10   :  { %v3858_v16 = vpop.f32.mrb[38].mxu1 }
0x1a11   :  { %v4872_v19 = vpop.f32.mrb[39].mxu1  ;;  %v4056_v21 = vadd.f32 %v4054_v7, %v3858_v16 }
0x1a12   :  { %v3972_v20 = vpop.f32.mrb[40].mxu0 }
0x1a13   :  { %v4057_v12 = vadd.f32 %v4055_v17, %v3972_v20  ;;  %v4877_v15 = vpop.f32.mrb[41].mxu0 }
0x1a14   :  { %v4045_v44 = vpop.f32.mrb[40].mxu1 }
0x1a15   :  { %v4058_v46 = vadd.f32 %v4056_v21, %v4045_v44  ;;  %v4882_v23 = vpop.f32.mrb[41].mxu1  ;;  %v4059_v27 = vadd.f32 %v4057_v12, %v5563_v26 }
0x1a17   :  { %v4060_v25 = vadd.f32 %v4058_v46, %v5567_v32 }
0x1a19   :  { %v4063_v28 = vrot.slane %v4060_v25, 7 }
0x1a1b   :  { %v4064_v18 = vsel %vm339_vm3, %v4063_v28, %v4059_v27 }
0x1a1c   :  { %v4066_v30 = vsel %vm342_vm4, %v4064_v18, -inf }
0x1a1d   :  { %4067 = vmax.xlane.f32.xlu1 %v4066_v30 }
0x1aaa   :  { %v4068_v31 = vpop.xlane.xlu1 %4067 }
0x1aab   :  { %v4070_v22 = vrot.slane %v4068_v31, 1  ;;  %v4073_v33 = vsub.f32 %v4059_v27, %v4068_v31 }
0x1aad   :  { %v4074_v34 = vsub.f32 %v4060_v25, %v4070_v22  ;;  %v4075_v35 = vmul.f32 1.442695, %v4073_v33 }
0x1aaf   :  { %v4077_v36 = vmul.f32 1.442695, %v4074_v34 }
0x1ab1   :  { %5046 = vpow2.f32 %v4077_v36 }
0x1ab2   :  { %5048 = vpow2.f32 %v4075_v35 }
0x1abb   :  { %v5047_v24 = vpop.eup %5046 }
0x1abc   :  { %v4081_v37 = vrot.slane %v5047_v24, 7  ;;  %v5049_v38 = vpop.eup %5048 }
0x1abe   :  { %v4082_v32 = vsel %vm339_vm3, %v4081_v37, %v5049_v38 }
0x1abf   :  { %v4084_v26 = vsel %vm342_vm4, %v4082_v32, 0.0 }
0x1ac0   :  { %4085 = vadd.xlane.f32.xlu0 %v4084_v26 }
0x1ad6   :  { %4248 = vrot.lane.b32.xlu0 %v5913_v43, %s5254_s12 }
0x1b4d   :  { %v4086_v29 = vpop.xlane.xlu0 %4085 }
0x1b4e   :  { %5050 = vrcp.f32 %v4086_v29 }
0x1b51   :  { %v4249_v43 = vpop.permute.xlu0 %4248 }
0x1b58   :  { %v5051_v45 = vpop.eup %5050 }
0x1b59   :  { %v4089_v48 = vrot.slane %v5051_v45, 1  ;;  %v4092_v51 = vmul.f32 %v5051_v45, %v5049_v38 }
0x1b5b   :  { %4886 = vmatmul.mubr.msk.f32.vlgmr.msra.gmra.mrb[42].mxu0 %vm371_vm5, %v4092_v51  ;;  %v4093_v5 = vmul.f32 %v5047_v24, %v4089_v48 }
0x1b5c   :  { %4965 = vmatpush3.bf16.msra.mxu0 %v4964_v47  ;;  %4901 = vmatprep.mubr.msk.f32.mxu0 %vm5250_vm0, %v5249_v1 }
0x1b5d   :  { %4891 = vmatmul.mubr.msk.f32.vlgmr.msra.gmra.mrb[42].mxu1 %vm371_vm5, %v4093_v5  ;;  %4966 = vmatprep.subr.bf16.mxu0 %v5252_v58 }
0x1b5e   :  { %4971 = vmatpush3.bf16.msra.mxu1 %v4970_v59  ;;  %4912 = vmatprep.mubr.msk.f32.mxu1 %vm5250_vm0, %v5249_v1 }
0x1b5f   :  { %4972 = vmatprep.subr.bf16.mxu1 %v5252_v58 }
0x1b60   :  { %4968 = vmatpush3.bf16.msra.mxu0 %v4967_v49 }
0x1b62   :  { %4974 = vmatpush3.bf16.msra.mxu1 %v4973_v54 }
0x1b63   :  { %4902 = vmatmul.mubr.msk.f32.vlgmr.msra.gmra.mrb[44].mxu0 %vm175_vm1, %v4249_v43 }
0x1c2e   :  { %v4163_v62 = vpop.f32.mrb[42].mxu0 }
0x1c2f   :  { %v4887_v53 = vpop.f32.mrb[43].mxu0 }
0x1c30   :  { %v4236_v55 = vpop.f32.mrb[42].mxu1 }
0x1c31   :  { %v4324_v63 = vrot.slane %v4236_v55, 7  ;;  %v4892_v0 = vpop.f32.mrb[43].mxu1 }
0x1c33   :  { %v4325_v3 = vsel %vm339_vm3, %v4324_v63, %v4163_v62 }
0x1c34   :  { %4913 = vmatmul.mubr.msk.f32.vlgmr.msra.gmra.mrb[44].mxu1 %vm175_vm1, %v4325_v3 }
0x1c36   :  { %v4318_v1 = vpop.f32.mrb[44].mxu0 }
0x1c37   :  { %v4903_v6 = vpop.f32.mrb[45].mxu0 }
0x1d07   :  { %v4394_v58 = vpop.f32.mrb[44].mxu1 }
0x1d08   :  { %v4395_v9 = vadd.f32 %v4394_v58, %v4318_v1  ;;  %v4914_v10 = vpop.f32.mrb[45].mxu1 }
0x1d0a   :  { %v4405_v50 = vadd.f32 %v4502_v4, %v4395_v9 }
0x1d0c   :  { %4406 = vst [vmem:[#allocation16] sm:$0x3] %v4405_v50 }
0x1d0d   :  { %5219 = shalt.err (!%p5216_p4)
}
0x1d0e   :  { %s5220_s8 = scalar_lea.hbm %s6003_s14, 32 }
0x1d0f   :  { %p5221_p5 = scmp.ne.s32.totalorder %s6003_s14, %s5220_s8  ;;  %p5224_p6 = scmp.lt.u32.totalorder %s5220_s8, %s6003_s14 }
0x1d11   :  { %p5226_p7 = pnand %p5224_p6, %p5221_p5 }
0x1d13   :  { %5229 = shalt.err (!%p5226_p7)
}
0x1d14   :  { %4416 = dma.vmem_to_hbm [thread:$0]  %s4414_s28, 32, %s6003_s14, [#allocation6]  }
0x1d15   :  { %5238 = dma.done.wait [#allocation6], 32  }
0x1d16   :  { %5239 = vsyncadd [#allocation6], 4294967264 }
0x1d17   :  { %4420 = vsyncpa [#allocation5], 1 }
0x1d18   :  { %4421 = vsyncpa [#allocation8], 1 }
0x1d19   :  { %4422 = vsyncpa [#allocation11], 1 }
0x1d1a   :  { %4423 = vsyncpa [#allocation14], 1 }
0x1d1b   :  { %4424 = vsyncpa [#allocation6], 1 }

</bundles_post_ra>
